<compile_context>
chip_gen: v6e
topology: v6e:2x2x1
jax: 0.10.0
libtpu: 0.0.40
codegen_flags: <defaults>
</compile_context>

<pallas_src>
import functools

import jax
import jax.numpy as jnp
from jax.experimental import pallas as pl
from jax.experimental.pallas import tpu as pltpu

MXU_DTYPE = jnp.bfloat16        # matmul operand dtype (accumulation stays f32)
N_LAYER_PARAMS = 16             # params per Translayer


# --------------------------------------------------------------------------
# In-kernel building blocks
# --------------------------------------------------------------------------

def _mm(a, b):
    """MXU matmul, bf16 operands, f32 accumulation."""
    return jnp.dot(a.astype(MXU_DTYPE), b.astype(MXU_DTYPE),
                   preferred_element_type=jnp.float32)


def _mm_qkt(q, k):
    """scores[i, j] = sum_d q[i, d] * k[j, d] (contract feature axis, no transpose)."""
    return jax.lax.dot_general(
        q.astype(MXU_DTYPE), k.astype(MXU_DTYPE),
        dimension_numbers=(((1,), (1,)), ((), ())),
        preferred_element_type=jnp.float32)


def _layernorm(v, w, b, eps=1e-5):
    """LayerNorm over the last (feature / lane) axis of a [P, D] slab."""
    mu = jnp.mean(v, axis=-1, keepdims=True)
    var = jnp.mean(jnp.square(v - mu), axis=-1, keepdims=True)
    return (v - mu) * jax.lax.rsqrt(var + eps) * w + b


def _translayer(x, pos, prm, head_num, vec_dim):
    """One Translayer on a patch-major [P, D] activation. `pos` may be None."""
    (ln1_w, ln1_b, wk, bk, wq, bq, wv, bv, wc, bc,
     ln2_w, ln2_b, wm1, bm1, wm2, bm2) = prm
    D = vec_dim
    scale = 1.0 / (D ** 0.5)

    n1 = _layernorm(x, ln1_w, ln1_b)

    # 1x1 Conv1d projections == [P, D] @ [D, H*D]  (lane-dense output)
    k = _mm(n1, wk) + bk
    q = _mm(n1, wq) + bq
    v = _mm(n1, wv) + bv

    ctxs = []
    for h in range(head_num):                         # static, tiny
        sl = slice(h * D, (h + 1) * D)
        qh, kh, vh = q[:, sl], k[:, sl], v[:, sl]     # [P, D] each
        # s[query, key]; torch computes the [key, query] transpose, but the positional
        # bias is symmetric and softmax-over-keys matches the last axis here.
        s = _mm_qkt(qh, kh) * scale                   # [P, P]
        if pos is not None:
            s = s + pos
        m = jnp.max(s, axis=-1, keepdims=True)        # lane reduction
        e = jnp.exp(s - m)
        w_att = e * pl.reciprocal(jnp.sum(e, axis=-1, keepdims=True), approx=True)
        ctxs.append(_mm(w_att, vh))                   # [P, D]

    multi = jnp.concatenate(ctxs, axis=-1)            # [P, H*D], head-major columns
    sa = _mm(multi, wc) + bc                          # [P, D]

    res = sa + x
    n2 = _layernorm(res, ln2_w, ln2_b)
    h1 = jnp.maximum(_mm(n2, wm1) + bm1, 0.0)
    mlp = _mm(h1, wm2) + bm2
    return mlp + res


# --------------------------------------------------------------------------
# Fused Pallas kernel: embedding + layer0(with pos) + (num_layer-1) shared layers
# --------------------------------------------------------------------------

def trans_encoder_kernel(*refs, head_num, vec_dim, num_layer):
    flat_ref, pos_ref, wemb_ref, bemb_ref = refs[:4]
    p0_refs = refs[4:4 + N_LAYER_PARAMS]
    ps_refs = refs[4 + N_LAYER_PARAMS:4 + 2 * N_LAYER_PARAMS]
    o_ref = refs[4 + 2 * N_LAYER_PARAMS]

    # Patch embedding: Linear(Cin -> D), patch-major result [P, D]
    x = _mm(flat_ref[0], wemb_ref[...]) + bemb_ref[...]

    # Layer 0: its own weights + relative-position bias
    p0 = tuple(r[...] for r in p0_refs)
    x = _translayer(x, pos_ref[...], p0, head_num, vec_dim)

    # Remaining layers share ONE weight set (PyTorch reuses the same Translayer module)
    if num_layer > 1:
        ps = tuple(r[...] for r in ps_refs)

        def body(_, xc):
            return _translayer(xc, None, ps, head_num, vec_dim)

        x = jax.lax.fori_loop(0, num_layer - 1, body, x, unroll=True)

    o_ref[0] = x.astype(o_ref.dtype)


# --------------------------------------------------------------------------
# Plain-JAX glue: patching, relative position matrix, parameters, wrapper
# --------------------------------------------------------------------------

def relative_position_code_mat(C, Hg, Wg):
    c = jnp.arange(C // 2, dtype=jnp.float32)
    div = 10000.0 ** (2.0 * c / C)                                   # [C//2]
    tx = jnp.arange(Wg, dtype=jnp.float32)[None, :] / div[:, None]   # [C//2, Wg]
    ty = jnp.arange(Hg, dtype=jnp.float32)[None, :] / div[:, None]   # [C//2, Hg]
    mat_x = jnp.zeros((C, Wg), jnp.float32).at[0::2].set(jnp.sin(tx)).at[1::2].set(jnp.cos(tx))
    mat_y = jnp.zeros((C, Hg), jnp.float32).at[0::2].set(jnp.sin(ty)).at[1::2].set(jnp.cos(ty))
    mx = jnp.broadcast_to(mat_x.T[None, :, :], (Hg, Wg, C)).reshape(Hg * Wg, C)
    my = jnp.broadcast_to(mat_y.T[:, None, :], (Hg, Wg, C)).reshape(Hg * Wg, C)
    pos = mx @ mx.T + my @ my.T
    # f.layer_norm(pos, pos.shape): normalize over the whole matrix, no affine
    return (pos - pos.mean()) * jax.lax.rsqrt(pos.var() + 1e-5)


def _uniform(key, shape, fan_in, dtype=jnp.float32):
    bound = float(fan_in) ** -0.5
    return jax.random.uniform(key, shape, jnp.float32, -bound, bound).astype(dtype)


def init_translayer(key, D, head_num):
    """Params in kernel layout: weights pre-transposed [in, out] (bf16), biases [1, out]."""
    HD = head_num * D
    ks = jax.random.split(key, 12)
    ln1_w = jnp.ones((1, D), jnp.float32)
    ln1_b = jnp.zeros((1, D), jnp.float32)
    wk = _uniform(ks[0], (D, HD), D, MXU_DTYPE); bk = _uniform(ks[1], (1, HD), D)
    wq = _uniform(ks[2], (D, HD), D, MXU_DTYPE); bq = _uniform(ks[3], (1, HD), D)
    wv = _uniform(ks[4], (D, HD), D, MXU_DTYPE); bv = _uniform(ks[5], (1, HD), D)
    wc = _uniform(ks[6], (HD, D), HD, MXU_DTYPE); bc = _uniform(ks[7], (1, D), HD)
    ln2_w = jnp.ones((1, D), jnp.float32)
    ln2_b = jnp.zeros((1, D), jnp.float32)
    wm1 = _uniform(ks[8], (D, D), D, MXU_DTYPE); bm1 = _uniform(ks[9], (1, D), D)
    wm2 = _uniform(ks[10], (D, D), D, MXU_DTYPE); bm2 = _uniform(ks[11], (1, D), D)
    return (ln1_w, ln1_b, wk, bk, wq, bq, wv, bv, wc, bc,
            ln2_w, ln2_b, wm1, bm1, wm2, bm2)


def init_embedding(key, patch_size, C, D):
    cin = patch_size * patch_size * C
    kw, kb = jax.random.split(key)
    wemb = _uniform(kw, (cin, D), cin, MXU_DTYPE)   # Linear weight, transposed [in, out]
    bemb = _uniform(kb, (1, D), cin)
    return wemb, bemb


def trans_encoder_forward(x, *, patch_size, num_layer, head_num,
                          emb_params, layer0_params, shared_params):
    N, C, H, W = x.shape
    P = patch_size
    Hg, Wg = H // P, W // P
    patch_num = Hg * Wg
    cin = C * P * P

    # features2patches: 'b c (h p1) (w p2) -> b (h w) c p1 p2', then Flatten(start_dim=2)
    patches = x.reshape(N, C, Hg, P, Wg, P).transpose(0, 2, 4, 1, 3, 5)
    flat = patches.reshape(N, patch_num, cin)                 # [N, patch_num, Cin]

    pos = relative_position_code_mat(C, Hg, Wg)               # [patch_num, patch_num]

    wemb, bemb = emb_params
    D = wemb.shape[1]

    params = list(layer0_params) + list(shared_params)
    kern = functools.partial(trans_encoder_kernel, head_num=head_num,
                             vec_dim=D, num_layer=num_layer)

    in_specs = [pl.BlockSpec((1, patch_num, cin), lambda n: (n, 0, 0)),
                pl.BlockSpec(pos.shape, lambda n: (0, 0)),
                pl.BlockSpec(wemb.shape, lambda n: (0, 0)),
                pl.BlockSpec(bemb.shape, lambda n: (0, 0))]
    in_specs += [pl.BlockSpec(p.shape, lambda n: (0, 0)) for p in params]

    out_pd = pl.pallas_call(
        kern,
        out_shape=jax.ShapeDtypeStruct((N, patch_num, D), jnp.float32),
        grid=(N,),
        in_specs=in_specs,
        out_specs=pl.BlockSpec((1, patch_num, D), lambda n: (n, 0, 0)),
        compiler_params=pltpu.CompilerParams(dimension_semantics=("parallel",)),
    )(flat, pos, wemb, bemb, *params)

    # Kernel works patch-major [P, D]; restore module layout [N, D, patch_num].
    return jnp.transpose(out_pd, (0, 2, 1))


# --------------------------------------------------------------------------
# Main
# --------------------------------------------------------------------------

if __name__ == "__main__":
    key = jax.random.PRNGKey(0)
    N, C, H, W = 2, 4, 16, 16
    patch_size = 4
    vec_dim = 32
    head_num = 2
    num_layer = 3

    k_x, k_emb, k_l0, k_sh = jax.random.split(key, 4)
    x = jax.random.normal(k_x, (N, C, H, W), jnp.float32)

    emb_params = init_embedding(k_emb, patch_size, C, vec_dim)
    layer0_params = init_translayer(k_l0, vec_dim, head_num)
    shared_params = init_translayer(k_sh, vec_dim, head_num)

    out = trans_encoder_forward(
        x,
        patch_size=patch_size,
        num_layer=num_layer,
        head_num=head_num,
        emb_params=emb_params,
        layer0_params=layer0_params,
        shared_params=shared_params,
    )
    out = jax.block_until_ready(out)
    assert out.shape == (N, vec_dim, (H // patch_size) * (W // patch_size))
    print("KERNEL_OK")
</pallas_src>

<mosaic_0001>
module attributes {stable_mosaic.version = 11 : i64} {
  func.func @trans_encoder_kernel(%arg0: i32, %arg1: memref<1x16x64xf32, #tpu.memory_space<vmem>>, %arg2: memref<16x16xf32, #tpu.memory_space<vmem>>, %arg3: memref<64x32xbf16, #tpu.memory_space<vmem>>, %arg4: memref<1x32xf32, #tpu.memory_space<vmem>>, %arg5: memref<1x32xf32, #tpu.memory_space<vmem>>, %arg6: memref<1x32xf32, #tpu.memory_space<vmem>>, %arg7: memref<32x64xbf16, #tpu.memory_space<vmem>>, %arg8: memref<1x64xf32, #tpu.memory_space<vmem>>, %arg9: memref<32x64xbf16, #tpu.memory_space<vmem>>, %arg10: memref<1x64xf32, #tpu.memory_space<vmem>>, %arg11: memref<32x64xbf16, #tpu.memory_space<vmem>>, %arg12: memref<1x64xf32, #tpu.memory_space<vmem>>, %arg13: memref<64x32xbf16, #tpu.memory_space<vmem>>, %arg14: memref<1x32xf32, #tpu.memory_space<vmem>>, %arg15: memref<1x32xf32, #tpu.memory_space<vmem>>, %arg16: memref<1x32xf32, #tpu.memory_space<vmem>>, %arg17: memref<32x32xbf16, #tpu.memory_space<vmem>>, %arg18: memref<1x32xf32, #tpu.memory_space<vmem>>, %arg19: memref<32x32xbf16, #tpu.memory_space<vmem>>, %arg20: memref<1x32xf32, #tpu.memory_space<vmem>>, %arg21: memref<1x32xf32, #tpu.memory_space<vmem>>, %arg22: memref<1x32xf32, #tpu.memory_space<vmem>>, %arg23: memref<32x64xbf16, #tpu.memory_space<vmem>>, %arg24: memref<1x64xf32, #tpu.memory_space<vmem>>, %arg25: memref<32x64xbf16, #tpu.memory_space<vmem>>, %arg26: memref<1x64xf32, #tpu.memory_space<vmem>>, %arg27: memref<32x64xbf16, #tpu.memory_space<vmem>>, %arg28: memref<1x64xf32, #tpu.memory_space<vmem>>, %arg29: memref<64x32xbf16, #tpu.memory_space<vmem>>, %arg30: memref<1x32xf32, #tpu.memory_space<vmem>>, %arg31: memref<1x32xf32, #tpu.memory_space<vmem>>, %arg32: memref<1x32xf32, #tpu.memory_space<vmem>>, %arg33: memref<32x32xbf16, #tpu.memory_space<vmem>>, %arg34: memref<1x32xf32, #tpu.memory_space<vmem>>, %arg35: memref<32x32xbf16, #tpu.memory_space<vmem>>, %arg36: memref<1x32xf32, #tpu.memory_space<vmem>>, %arg37: memref<1x16x32xf32, #tpu.memory_space<vmem>>) attributes {dimension_semantics = [#tpu.dimension_semantics<parallel>], iteration_bounds = array<i64: 2>, scalar_prefetch = 0 : i64, scratch_operands = 0 : i64, tpu.core_type = #tpu.core_type<tc>, window_params = [{transform_indices = @transform_0, window_bounds = array<i64: 1, 16, 64>}, {pipeline_mode = #tpu.pipeline_mode<synchronous>, transform_indices = @transform_1, window_bounds = array<i64: 16, 16>}, {pipeline_mode = #tpu.pipeline_mode<synchronous>, transform_indices = @transform_2, window_bounds = array<i64: 64, 32>}, {pipeline_mode = #tpu.pipeline_mode<synchronous>, transform_indices = @transform_3, window_bounds = array<i64: 1, 32>}, {pipeline_mode = #tpu.pipeline_mode<synchronous>, transform_indices = @transform_4, window_bounds = array<i64: 1, 32>}, {pipeline_mode = #tpu.pipeline_mode<synchronous>, transform_indices = @transform_5, window_bounds = array<i64: 1, 32>}, {pipeline_mode = #tpu.pipeline_mode<synchronous>, transform_indices = @transform_6, window_bounds = array<i64: 32, 64>}, {pipeline_mode = #tpu.pipeline_mode<synchronous>, transform_indices = @transform_7, window_bounds = array<i64: 1, 64>}, {pipeline_mode = #tpu.pipeline_mode<synchronous>, transform_indices = @transform_8, window_bounds = array<i64: 32, 64>}, {pipeline_mode = #tpu.pipeline_mode<synchronous>, transform_indices = @transform_9, window_bounds = array<i64: 1, 64>}, {pipeline_mode = #tpu.pipeline_mode<synchronous>, transform_indices = @transform_10, window_bounds = array<i64: 32, 64>}, {pipeline_mode = #tpu.pipeline_mode<synchronous>, transform_indices = @transform_11, window_bounds = array<i64: 1, 64>}, {pipeline_mode = #tpu.pipeline_mode<synchronous>, transform_indices = @transform_12, window_bounds = array<i64: 64, 32>}, {pipeline_mode = #tpu.pipeline_mode<synchronous>, transform_indices = @transform_13, window_bounds = array<i64: 1, 32>}, {pipeline_mode = #tpu.pipeline_mode<synchronous>, transform_indices = @transform_14, window_bounds = array<i64: 1, 32>}, {pipeline_mode = #tpu.pipeline_mode<synchronous>, transform_indices = @transform_15, window_bounds = array<i64: 1, 32>}, {pipeline_mode = #tpu.pipeline_mode<synchronous>, transform_indices = @transform_16, window_bounds = array<i64: 32, 32>}, {pipeline_mode = #tpu.pipeline_mode<synchronous>, transform_indices = @transform_17, window_bounds = array<i64: 1, 32>}, {pipeline_mode = #tpu.pipeline_mode<synchronous>, transform_indices = @transform_18, window_bounds = array<i64: 32, 32>}, {pipeline_mode = #tpu.pipeline_mode<synchronous>, transform_indices = @transform_19, window_bounds = array<i64: 1, 32>}, {pipeline_mode = #tpu.pipeline_mode<synchronous>, transform_indices = @transform_20, window_bounds = array<i64: 1, 32>}, {pipeline_mode = #tpu.pipeline_mode<synchronous>, transform_indices = @transform_21, window_bounds = array<i64: 1, 32>}, {pipeline_mode = #tpu.pipeline_mode<synchronous>, transform_indices = @transform_22, window_bounds = array<i64: 32, 64>}, {pipeline_mode = #tpu.pipeline_mode<synchronous>, transform_indices = @transform_23, window_bounds = array<i64: 1, 64>}, {pipeline_mode = #tpu.pipeline_mode<synchronous>, transform_indices = @transform_24, window_bounds = array<i64: 32, 64>}, {pipeline_mode = #tpu.pipeline_mode<synchronous>, transform_indices = @transform_25, window_bounds = array<i64: 1, 64>}, {pipeline_mode = #tpu.pipeline_mode<synchronous>, transform_indices = @transform_26, window_bounds = array<i64: 32, 64>}, {pipeline_mode = #tpu.pipeline_mode<synchronous>, transform_indices = @transform_27, window_bounds = array<i64: 1, 64>}, {pipeline_mode = #tpu.pipeline_mode<synchronous>, transform_indices = @transform_28, window_bounds = array<i64: 64, 32>}, {pipeline_mode = #tpu.pipeline_mode<synchronous>, transform_indices = @transform_29, window_bounds = array<i64: 1, 32>}, {pipeline_mode = #tpu.pipeline_mode<synchronous>, transform_indices = @transform_30, window_bounds = array<i64: 1, 32>}, {pipeline_mode = #tpu.pipeline_mode<synchronous>, transform_indices = @transform_31, window_bounds = array<i64: 1, 32>}, {pipeline_mode = #tpu.pipeline_mode<synchronous>, transform_indices = @transform_32, window_bounds = array<i64: 32, 32>}, {pipeline_mode = #tpu.pipeline_mode<synchronous>, transform_indices = @transform_33, window_bounds = array<i64: 1, 32>}, {pipeline_mode = #tpu.pipeline_mode<synchronous>, transform_indices = @transform_34, window_bounds = array<i64: 32, 32>}, {pipeline_mode = #tpu.pipeline_mode<synchronous>, transform_indices = @transform_35, window_bounds = array<i64: 1, 32>}, {transform_indices = @transform_36, window_bounds = array<i64: 1, 16, 32>}]} {
    %c0 = arith.constant 0 : index
    %c0_0 = arith.constant 0 : index
    %c0_1 = arith.constant 0 : index
    %0 = vector.load %arg1[%c0, %c0_0, %c0_1] : memref<1x16x64xf32, #tpu.memory_space<vmem>>, vector<1x16x64xf32>
    %1 = vector.shape_cast %0 : vector<1x16x64xf32> to vector<16x64xf32>
    %c0_2 = arith.constant 0 : index
    %c0_3 = arith.constant 0 : index
    %2 = vector.load %arg3[%c0_2, %c0_3] : memref<64x32xbf16, #tpu.memory_space<vmem>>, vector<64x32xbf16>
    %3 = arith.truncf %1 : vector<16x64xf32> to vector<16x64xbf16>
    %cst = arith.constant dense<0.000000e+00> : vector<16x32xf32>
    %4 = tpu.matmul %3, %2, %cst {dimension_numbers = #tpu.dot_dimension_numbers<[1], [0], [0], [1], [0, 0, 1, 1], [], []>} : vector<16x64xbf16>, vector<64x32xbf16>, vector<16x32xf32> -> vector<16x32xf32>
    %c0_4 = arith.constant 0 : index
    %c0_5 = arith.constant 0 : index
    %5 = vector.load %arg4[%c0_4, %c0_5] : memref<1x32xf32, #tpu.memory_space<vmem>>, vector<1x32xf32>
    %6 = vector.broadcast %5 : vector<1x32xf32> to vector<16x32xf32>
    %7 = arith.addf %4, %6 : vector<16x32xf32>
    %c0_6 = arith.constant 0 : index
    %c0_7 = arith.constant 0 : index
    %8 = vector.load %arg5[%c0_6, %c0_7] : memref<1x32xf32, #tpu.memory_space<vmem>>, vector<1x32xf32>
    %c0_8 = arith.constant 0 : index
    %c0_9 = arith.constant 0 : index
    %9 = vector.load %arg6[%c0_8, %c0_9] : memref<1x32xf32, #tpu.memory_space<vmem>>, vector<1x32xf32>
    %c0_10 = arith.constant 0 : index
    %c0_11 = arith.constant 0 : index
    %10 = vector.load %arg7[%c0_10, %c0_11] : memref<32x64xbf16, #tpu.memory_space<vmem>>, vector<32x64xbf16>
    %c0_12 = arith.constant 0 : index
    %c0_13 = arith.constant 0 : index
    %11 = vector.load %arg8[%c0_12, %c0_13] : memref<1x64xf32, #tpu.memory_space<vmem>>, vector<1x64xf32>
    %c0_14 = arith.constant 0 : index
    %c0_15 = arith.constant 0 : index
    %12 = vector.load %arg9[%c0_14, %c0_15] : memref<32x64xbf16, #tpu.memory_space<vmem>>, vector<32x64xbf16>
    %c0_16 = arith.constant 0 : index
    %c0_17 = arith.constant 0 : index
    %13 = vector.load %arg10[%c0_16, %c0_17] : memref<1x64xf32, #tpu.memory_space<vmem>>, vector<1x64xf32>
    %c0_18 = arith.constant 0 : index
    %c0_19 = arith.constant 0 : index
    %14 = vector.load %arg11[%c0_18, %c0_19] : memref<32x64xbf16, #tpu.memory_space<vmem>>, vector<32x64xbf16>
    %c0_20 = arith.constant 0 : index
    %c0_21 = arith.constant 0 : index
    %15 = vector.load %arg12[%c0_20, %c0_21] : memref<1x64xf32, #tpu.memory_space<vmem>>, vector<1x64xf32>
    %c0_22 = arith.constant 0 : index
    %c0_23 = arith.constant 0 : index
    %16 = vector.load %arg13[%c0_22, %c0_23] : memref<64x32xbf16, #tpu.memory_space<vmem>>, vector<64x32xbf16>
    %c0_24 = arith.constant 0 : index
    %c0_25 = arith.constant 0 : index
    %17 = vector.load %arg14[%c0_24, %c0_25] : memref<1x32xf32, #tpu.memory_space<vmem>>, vector<1x32xf32>
    %c0_26 = arith.constant 0 : index
    %c0_27 = arith.constant 0 : index
    %18 = vector.load %arg15[%c0_26, %c0_27] : memref<1x32xf32, #tpu.memory_space<vmem>>, vector<1x32xf32>
    %c0_28 = arith.constant 0 : index
    %c0_29 = arith.constant 0 : index
    %19 = vector.load %arg16[%c0_28, %c0_29] : memref<1x32xf32, #tpu.memory_space<vmem>>, vector<1x32xf32>
    %c0_30 = arith.constant 0 : index
    %c0_31 = arith.constant 0 : index
    %20 = vector.load %arg17[%c0_30, %c0_31] : memref<32x32xbf16, #tpu.memory_space<vmem>>, vector<32x32xbf16>
    %c0_32 = arith.constant 0 : index
    %c0_33 = arith.constant 0 : index
    %21 = vector.load %arg18[%c0_32, %c0_33] : memref<1x32xf32, #tpu.memory_space<vmem>>, vector<1x32xf32>
    %c0_34 = arith.constant 0 : index
    %c0_35 = arith.constant 0 : index
    %22 = vector.load %arg19[%c0_34, %c0_35] : memref<32x32xbf16, #tpu.memory_space<vmem>>, vector<32x32xbf16>
    %c0_36 = arith.constant 0 : index
    %c0_37 = arith.constant 0 : index
    %23 = vector.load %arg20[%c0_36, %c0_37] : memref<1x32xf32, #tpu.memory_space<vmem>>, vector<1x32xf32>
    %c0_38 = arith.constant 0 : index
    %c0_39 = arith.constant 0 : index
    %24 = vector.load %arg2[%c0_38, %c0_39] : memref<16x16xf32, #tpu.memory_space<vmem>>, vector<16x16xf32>
    %cst_40 = arith.constant dense<0.000000e+00> : vector<16xf32>
    %25 = vector.multi_reduction <add>, %7, %cst_40 [1] : vector<16x32xf32> to vector<16xf32>
    %26 = vector.shape_cast %25 : vector<16xf32> to vector<16x1xf32>
    %cst_41 = arith.constant 3.200000e+01 : f32
    %27 = vector.broadcast %cst_41 : f32 to vector<16x1xf32>
    %28 = arith.divf %26, %27 : vector<16x1xf32>
    %29 = vector.broadcast %28 : vector<16x1xf32> to vector<16x32xf32>
    %30 = arith.subf %7, %29 : vector<16x32xf32>
    %31 = arith.mulf %30, %30 : vector<16x32xf32>
    %cst_42 = arith.constant dense<0.000000e+00> : vector<16xf32>
    %32 = vector.multi_reduction <add>, %31, %cst_42 [1] : vector<16x32xf32> to vector<16xf32>
    %33 = vector.shape_cast %32 : vector<16xf32> to vector<16x1xf32>
    %cst_43 = arith.constant 3.200000e+01 : f32
    %34 = vector.broadcast %cst_43 : f32 to vector<16x1xf32>
    %35 = arith.divf %33, %34 : vector<16x1xf32>
    %36 = vector.broadcast %28 : vector<16x1xf32> to vector<16x32xf32>
    %37 = arith.subf %7, %36 : vector<16x32xf32>
    %cst_44 = arith.constant 9.99999974E-6 : f32
    %38 = vector.broadcast %cst_44 : f32 to vector<16x1xf32>
    %39 = arith.addf %35, %38 : vector<16x1xf32>
    %40 = math.rsqrt %39 : vector<16x1xf32>
    %41 = vector.broadcast %40 : vector<16x1xf32> to vector<16x32xf32>
    %42 = arith.mulf %37, %41 : vector<16x32xf32>
    %43 = vector.broadcast %8 : vector<1x32xf32> to vector<16x32xf32>
    %44 = arith.mulf %42, %43 : vector<16x32xf32>
    %45 = vector.broadcast %9 : vector<1x32xf32> to vector<16x32xf32>
    %46 = arith.addf %44, %45 : vector<16x32xf32>
    %47 = arith.truncf %46 : vector<16x32xf32> to vector<16x32xbf16>
    %cst_45 = arith.constant dense<0.000000e+00> : vector<16x64xf32>
    %48 = tpu.matmul %47, %10, %cst_45 {dimension_numbers = #tpu.dot_dimension_numbers<[1], [0], [0], [1], [0, 0, 1, 1], [], []>} : vector<16x32xbf16>, vector<32x64xbf16>, vector<16x64xf32> -> vector<16x64xf32>
    %49 = vector.broadcast %11 : vector<1x64xf32> to vector<16x64xf32>
    %50 = arith.addf %48, %49 : vector<16x64xf32>
    %51 = arith.truncf %46 : vector<16x32xf32> to vector<16x32xbf16>
    %cst_46 = arith.constant dense<0.000000e+00> : vector<16x64xf32>
    %52 = tpu.matmul %51, %12, %cst_46 {dimension_numbers = #tpu.dot_dimension_numbers<[1], [0], [0], [1], [0, 0, 1, 1], [], []>} : vector<16x32xbf16>, vector<32x64xbf16>, vector<16x64xf32> -> vector<16x64xf32>
    %53 = vector.broadcast %13 : vector<1x64xf32> to vector<16x64xf32>
    %54 = arith.addf %52, %53 : vector<16x64xf32>
    %55 = arith.truncf %46 : vector<16x32xf32> to vector<16x32xbf16>
    %cst_47 = arith.constant dense<0.000000e+00> : vector<16x64xf32>
    %56 = tpu.matmul %55, %14, %cst_47 {dimension_numbers = #tpu.dot_dimension_numbers<[1], [0], [0], [1], [0, 0, 1, 1], [], []>} : vector<16x32xbf16>, vector<32x64xbf16>, vector<16x64xf32> -> vector<16x64xf32>
    %57 = vector.broadcast %15 : vector<1x64xf32> to vector<16x64xf32>
    %58 = arith.addf %56, %57 : vector<16x64xf32>
    %59 = vector.extract_strided_slice %54 {offsets = [0, 0], sizes = [16, 32], strides = [1, 1]} : vector<16x64xf32> to vector<16x32xf32>
    %60 = vector.extract_strided_slice %50 {offsets = [0, 0], sizes = [16, 32], strides = [1, 1]} : vector<16x64xf32> to vector<16x32xf32>
    %61 = vector.extract_strided_slice %58 {offsets = [0, 0], sizes = [16, 32], strides = [1, 1]} : vector<16x64xf32> to vector<16x32xf32>
    %62 = arith.truncf %59 : vector<16x32xf32> to vector<16x32xbf16>
    %63 = arith.truncf %60 : vector<16x32xf32> to vector<16x32xbf16>
    %cst_48 = arith.constant dense<0.000000e+00> : vector<16x16xf32>
    %64 = tpu.matmul %62, %63, %cst_48 {dimension_numbers = #tpu.dot_dimension_numbers<[1], [1], [0], [0], [0, 0, 1, 0], [], []>} : vector<16x32xbf16>, vector<16x32xbf16>, vector<16x16xf32> -> vector<16x16xf32>
    %cst_49 = arith.constant 0.176776692 : f32
    %65 = vector.broadcast %cst_49 : f32 to vector<16x16xf32>
    %66 = arith.mulf %64, %65 : vector<16x16xf32>
    %67 = arith.addf %66, %24 : vector<16x16xf32>
    %cst_50 = arith.constant dense<0xFF800000> : vector<16xf32>
    %68 = vector.multi_reduction <maximumf>, %67, %cst_50 [1] : vector<16x16xf32> to vector<16xf32>
    %69 = vector.shape_cast %68 : vector<16xf32> to vector<16x1xf32>
    %70 = vector.broadcast %69 : vector<16x1xf32> to vector<16x16xf32>
    %71 = arith.subf %67, %70 : vector<16x16xf32>
    %72 = math.exp %71 : vector<16x16xf32>
    %cst_51 = arith.constant dense<0.000000e+00> : vector<16xf32>
    %73 = vector.multi_reduction <add>, %72, %cst_51 [1] : vector<16x16xf32> to vector<16xf32>
    %74 = vector.shape_cast %73 : vector<16xf32> to vector<16x1xf32>
    %75 = tpu.reciprocal %74 {approx = true} : vector<16x1xf32> -> vector<16x1xf32>
    %76 = vector.broadcast %75 : vector<16x1xf32> to vector<16x16xf32>
    %77 = arith.mulf %72, %76 : vector<16x16xf32>
    %78 = arith.truncf %77 : vector<16x16xf32> to vector<16x16xbf16>
    %79 = arith.truncf %61 : vector<16x32xf32> to vector<16x32xbf16>
    %cst_52 = arith.constant dense<0.000000e+00> : vector<16x32xf32>
    %80 = tpu.matmul %78, %79, %cst_52 {dimension_numbers = #tpu.dot_dimension_numbers<[1], [0], [0], [1], [0, 0, 1, 1], [], []>} : vector<16x16xbf16>, vector<16x32xbf16>, vector<16x32xf32> -> vector<16x32xf32>
    %81 = vector.extract_strided_slice %54 {offsets = [0, 32], sizes = [16, 32], strides = [1, 1]} : vector<16x64xf32> to vector<16x32xf32>
    %82 = vector.extract_strided_slice %50 {offsets = [0, 32], sizes = [16, 32], strides = [1, 1]} : vector<16x64xf32> to vector<16x32xf32>
    %83 = vector.extract_strided_slice %58 {offsets = [0, 32], sizes = [16, 32], strides = [1, 1]} : vector<16x64xf32> to vector<16x32xf32>
    %84 = arith.truncf %81 : vector<16x32xf32> to vector<16x32xbf16>
    %85 = arith.truncf %82 : vector<16x32xf32> to vector<16x32xbf16>
    %cst_53 = arith.constant dense<0.000000e+00> : vector<16x16xf32>
    %86 = tpu.matmul %84, %85, %cst_53 {dimension_numbers = #tpu.dot_dimension_numbers<[1], [1], [0], [0], [0, 0, 1, 0], [], []>} : vector<16x32xbf16>, vector<16x32xbf16>, vector<16x16xf32> -> vector<16x16xf32>
    %cst_54 = arith.constant 0.176776692 : f32
    %87 = vector.broadcast %cst_54 : f32 to vector<16x16xf32>
    %88 = arith.mulf %86, %87 : vector<16x16xf32>
    %89 = arith.addf %88, %24 : vector<16x16xf32>
    %cst_55 = arith.constant dense<0xFF800000> : vector<16xf32>
    %90 = vector.multi_reduction <maximumf>, %89, %cst_55 [1] : vector<16x16xf32> to vector<16xf32>
    %91 = vector.shape_cast %90 : vector<16xf32> to vector<16x1xf32>
    %92 = vector.broadcast %91 : vector<16x1xf32> to vector<16x16xf32>
    %93 = arith.subf %89, %92 : vector<16x16xf32>
    %94 = math.exp %93 : vector<16x16xf32>
    %cst_56 = arith.constant dense<0.000000e+00> : vector<16xf32>
    %95 = vector.multi_reduction <add>, %94, %cst_56 [1] : vector<16x16xf32> to vector<16xf32>
    %96 = vector.shape_cast %95 : vector<16xf32> to vector<16x1xf32>
    %97 = tpu.reciprocal %96 {approx = true} : vector<16x1xf32> -> vector<16x1xf32>
    %98 = vector.broadcast %97 : vector<16x1xf32> to vector<16x16xf32>
    %99 = arith.mulf %94, %98 : vector<16x16xf32>
    %100 = arith.truncf %99 : vector<16x16xf32> to vector<16x16xbf16>
    %101 = arith.truncf %83 : vector<16x32xf32> to vector<16x32xbf16>
    %cst_57 = arith.constant dense<0.000000e+00> : vector<16x32xf32>
    %102 = tpu.matmul %100, %101, %cst_57 {dimension_numbers = #tpu.dot_dimension_numbers<[1], [0], [0], [1], [0, 0, 1, 1], [], []>} : vector<16x16xbf16>, vector<16x32xbf16>, vector<16x32xf32> -> vector<16x32xf32>
    %103 = tpu.concatenate %80, %102 in 1 : vector<16x32xf32>, vector<16x32xf32> -> vector<16x64xf32>
    %104 = arith.truncf %103 : vector<16x64xf32> to vector<16x64xbf16>
    %cst_58 = arith.constant dense<0.000000e+00> : vector<16x32xf32>
    %105 = tpu.matmul %104, %16, %cst_58 {dimension_numbers = #tpu.dot_dimension_numbers<[1], [0], [0], [1], [0, 0, 1, 1], [], []>} : vector<16x64xbf16>, vector<64x32xbf16>, vector<16x32xf32> -> vector<16x32xf32>
    %106 = vector.broadcast %17 : vector<1x32xf32> to vector<16x32xf32>
    %107 = arith.addf %105, %106 : vector<16x32xf32>
    %108 = arith.addf %107, %7 : vector<16x32xf32>
    %cst_59 = arith.constant dense<0.000000e+00> : vector<16xf32>
    %109 = vector.multi_reduction <add>, %108, %cst_59 [1] : vector<16x32xf32> to vector<16xf32>
    %110 = vector.shape_cast %109 : vector<16xf32> to vector<16x1xf32>
    %cst_60 = arith.constant 3.200000e+01 : f32
    %111 = vector.broadcast %cst_60 : f32 to vector<16x1xf32>
    %112 = arith.divf %110, %111 : vector<16x1xf32>
    %113 = vector.broadcast %112 : vector<16x1xf32> to vector<16x32xf32>
    %114 = arith.subf %108, %113 : vector<16x32xf32>
    %115 = arith.mulf %114, %114 : vector<16x32xf32>
    %cst_61 = arith.constant dense<0.000000e+00> : vector<16xf32>
    %116 = vector.multi_reduction <add>, %115, %cst_61 [1] : vector<16x32xf32> to vector<16xf32>
    %117 = vector.shape_cast %116 : vector<16xf32> to vector<16x1xf32>
    %cst_62 = arith.constant 3.200000e+01 : f32
    %118 = vector.broadcast %cst_62 : f32 to vector<16x1xf32>
    %119 = arith.divf %117, %118 : vector<16x1xf32>
    %120 = vector.broadcast %112 : vector<16x1xf32> to vector<16x32xf32>
    %121 = arith.subf %108, %120 : vector<16x32xf32>
    %cst_63 = arith.constant 9.99999974E-6 : f32
    %122 = vector.broadcast %cst_63 : f32 to vector<16x1xf32>
    %123 = arith.addf %119, %122 : vector<16x1xf32>
    %124 = math.rsqrt %123 : vector<16x1xf32>
    %125 = vector.broadcast %124 : vector<16x1xf32> to vector<16x32xf32>
    %126 = arith.mulf %121, %125 : vector<16x32xf32>
    %127 = vector.broadcast %18 : vector<1x32xf32> to vector<16x32xf32>
    %128 = arith.mulf %126, %127 : vector<16x32xf32>
    %129 = vector.broadcast %19 : vector<1x32xf32> to vector<16x32xf32>
    %130 = arith.addf %128, %129 : vector<16x32xf32>
    %131 = arith.truncf %130 : vector<16x32xf32> to vector<16x32xbf16>
    %cst_64 = arith.constant dense<0.000000e+00> : vector<16x32xf32>
    %132 = tpu.matmul %131, %20, %cst_64 {dimension_numbers = #tpu.dot_dimension_numbers<[1], [0], [0], [1], [0, 0, 1, 1], [], []>} : vector<16x32xbf16>, vector<32x32xbf16>, vector<16x32xf32> -> vector<16x32xf32>
    %133 = vector.broadcast %21 : vector<1x32xf32> to vector<16x32xf32>
    %134 = arith.addf %132, %133 : vector<16x32xf32>
    %cst_65 = arith.constant 0.000000e+00 : f32
    %135 = vector.broadcast %cst_65 : f32 to vector<16x32xf32>
    %136 = arith.maximumf %134, %135 : vector<16x32xf32>
    %137 = arith.truncf %136 : vector<16x32xf32> to vector<16x32xbf16>
    %cst_66 = arith.constant dense<0.000000e+00> : vector<16x32xf32>
    %138 = tpu.matmul %137, %22, %cst_66 {dimension_numbers = #tpu.dot_dimension_numbers<[1], [0], [0], [1], [0, 0, 1, 1], [], []>} : vector<16x32xbf16>, vector<32x32xbf16>, vector<16x32xf32> -> vector<16x32xf32>
    %139 = vector.broadcast %23 : vector<1x32xf32> to vector<16x32xf32>
    %140 = arith.addf %138, %139 : vector<16x32xf32>
    %141 = arith.addf %140, %108 : vector<16x32xf32>
    %c0_67 = arith.constant 0 : index
    %c0_68 = arith.constant 0 : index
    %142 = vector.load %arg21[%c0_67, %c0_68] : memref<1x32xf32, #tpu.memory_space<vmem>>, vector<1x32xf32>
    %c0_69 = arith.constant 0 : index
    %c0_70 = arith.constant 0 : index
    %143 = vector.load %arg22[%c0_69, %c0_70] : memref<1x32xf32, #tpu.memory_space<vmem>>, vector<1x32xf32>
    %c0_71 = arith.constant 0 : index
    %c0_72 = arith.constant 0 : index
    %144 = vector.load %arg23[%c0_71, %c0_72] : memref<32x64xbf16, #tpu.memory_space<vmem>>, vector<32x64xbf16>
    %c0_73 = arith.constant 0 : index
    %c0_74 = arith.constant 0 : index
    %145 = vector.load %arg24[%c0_73, %c0_74] : memref<1x64xf32, #tpu.memory_space<vmem>>, vector<1x64xf32>
    %c0_75 = arith.constant 0 : index
    %c0_76 = arith.constant 0 : index
    %146 = vector.load %arg25[%c0_75, %c0_76] : memref<32x64xbf16, #tpu.memory_space<vmem>>, vector<32x64xbf16>
    %c0_77 = arith.constant 0 : index
    %c0_78 = arith.constant 0 : index
    %147 = vector.load %arg26[%c0_77, %c0_78] : memref<1x64xf32, #tpu.memory_space<vmem>>, vector<1x64xf32>
    %c0_79 = arith.constant 0 : index
    %c0_80 = arith.constant 0 : index
    %148 = vector.load %arg27[%c0_79, %c0_80] : memref<32x64xbf16, #tpu.memory_space<vmem>>, vector<32x64xbf16>
    %c0_81 = arith.constant 0 : index
    %c0_82 = arith.constant 0 : index
    %149 = vector.load %arg28[%c0_81, %c0_82] : memref<1x64xf32, #tpu.memory_space<vmem>>, vector<1x64xf32>
    %c0_83 = arith.constant 0 : index
    %c0_84 = arith.constant 0 : index
    %150 = vector.load %arg29[%c0_83, %c0_84] : memref<64x32xbf16, #tpu.memory_space<vmem>>, vector<64x32xbf16>
    %c0_85 = arith.constant 0 : index
    %c0_86 = arith.constant 0 : index
    %151 = vector.load %arg30[%c0_85, %c0_86] : memref<1x32xf32, #tpu.memory_space<vmem>>, vector<1x32xf32>
    %c0_87 = arith.constant 0 : index
    %c0_88 = arith.constant 0 : index
    %152 = vector.load %arg31[%c0_87, %c0_88] : memref<1x32xf32, #tpu.memory_space<vmem>>, vector<1x32xf32>
    %c0_89 = arith.constant 0 : index
    %c0_90 = arith.constant 0 : index
    %153 = vector.load %arg32[%c0_89, %c0_90] : memref<1x32xf32, #tpu.memory_space<vmem>>, vector<1x32xf32>
    %c0_91 = arith.constant 0 : index
    %c0_92 = arith.constant 0 : index
    %154 = vector.load %arg33[%c0_91, %c0_92] : memref<32x32xbf16, #tpu.memory_space<vmem>>, vector<32x32xbf16>
    %c0_93 = arith.constant 0 : index
    %c0_94 = arith.constant 0 : index
    %155 = vector.load %arg34[%c0_93, %c0_94] : memref<1x32xf32, #tpu.memory_space<vmem>>, vector<1x32xf32>
    %c0_95 = arith.constant 0 : index
    %c0_96 = arith.constant 0 : index
    %156 = vector.load %arg35[%c0_95, %c0_96] : memref<32x32xbf16, #tpu.memory_space<vmem>>, vector<32x32xbf16>
    %c0_97 = arith.constant 0 : index
    %c0_98 = arith.constant 0 : index
    %157 = vector.load %arg36[%c0_97, %c0_98] : memref<1x32xf32, #tpu.memory_space<vmem>>, vector<1x32xf32>
    %c0_i32 = arith.constant 0 : i32
    %cst_99 = arith.constant dense<0.000000e+00> : vector<16xf32>
    %158 = vector.multi_reduction <add>, %141, %cst_99 [1] : vector<16x32xf32> to vector<16xf32>
    %159 = vector.shape_cast %158 : vector<16xf32> to vector<16x1xf32>
    %cst_100 = arith.constant 3.200000e+01 : f32
    %160 = vector.broadcast %cst_100 : f32 to vector<16x1xf32>
    %161 = arith.divf %159, %160 : vector<16x1xf32>
    %162 = vector.broadcast %161 : vector<16x1xf32> to vector<16x32xf32>
    %163 = arith.subf %141, %162 : vector<16x32xf32>
    %164 = arith.mulf %163, %163 : vector<16x32xf32>
    %cst_101 = arith.constant dense<0.000000e+00> : vector<16xf32>
    %165 = vector.multi_reduction <add>, %164, %cst_101 [1] : vector<16x32xf32> to vector<16xf32>
    %166 = vector.shape_cast %165 : vector<16xf32> to vector<16x1xf32>
    %cst_102 = arith.constant 3.200000e+01 : f32
    %167 = vector.broadcast %cst_102 : f32 to vector<16x1xf32>
    %168 = arith.divf %166, %167 : vector<16x1xf32>
    %169 = vector.broadcast %161 : vector<16x1xf32> to vector<16x32xf32>
    %170 = arith.subf %141, %169 : vector<16x32xf32>
    %cst_103 = arith.constant 9.99999974E-6 : f32
    %171 = vector.broadcast %cst_103 : f32 to vector<16x1xf32>
    %172 = arith.addf %168, %171 : vector<16x1xf32>
    %173 = math.rsqrt %172 : vector<16x1xf32>
    %174 = vector.broadcast %173 : vector<16x1xf32> to vector<16x32xf32>
    %175 = arith.mulf %170, %174 : vector<16x32xf32>
    %176 = vector.broadcast %142 : vector<1x32xf32> to vector<16x32xf32>
    %177 = arith.mulf %175, %176 : vector<16x32xf32>
    %178 = vector.broadcast %143 : vector<1x32xf32> to vector<16x32xf32>
    %179 = arith.addf %177, %178 : vector<16x32xf32>
    %180 = arith.truncf %179 : vector<16x32xf32> to vector<16x32xbf16>
    %cst_104 = arith.constant dense<0.000000e+00> : vector<16x64xf32>
    %181 = tpu.matmul %180, %144, %cst_104 {dimension_numbers = #tpu.dot_dimension_numbers<[1], [0], [0], [1], [0, 0, 1, 1], [], []>} : vector<16x32xbf16>, vector<32x64xbf16>, vector<16x64xf32> -> vector<16x64xf32>
    %182 = vector.broadcast %145 : vector<1x64xf32> to vector<16x64xf32>
    %183 = arith.addf %181, %182 : vector<16x64xf32>
    %184 = arith.truncf %179 : vector<16x32xf32> to vector<16x32xbf16>
    %cst_105 = arith.constant dense<0.000000e+00> : vector<16x64xf32>
    %185 = tpu.matmul %184, %146, %cst_105 {dimension_numbers = #tpu.dot_dimension_numbers<[1], [0], [0], [1], [0, 0, 1, 1], [], []>} : vector<16x32xbf16>, vector<32x64xbf16>, vector<16x64xf32> -> vector<16x64xf32>
    %186 = vector.broadcast %147 : vector<1x64xf32> to vector<16x64xf32>
    %187 = arith.addf %185, %186 : vector<16x64xf32>
    %188 = arith.truncf %179 : vector<16x32xf32> to vector<16x32xbf16>
    %cst_106 = arith.constant dense<0.000000e+00> : vector<16x64xf32>
    %189 = tpu.matmul %188, %148, %cst_106 {dimension_numbers = #tpu.dot_dimension_numbers<[1], [0], [0], [1], [0, 0, 1, 1], [], []>} : vector<16x32xbf16>, vector<32x64xbf16>, vector<16x64xf32> -> vector<16x64xf32>
    %190 = vector.broadcast %149 : vector<1x64xf32> to vector<16x64xf32>
    %191 = arith.addf %189, %190 : vector<16x64xf32>
    %192 = vector.extract_strided_slice %187 {offsets = [0, 0], sizes = [16, 32], strides = [1, 1]} : vector<16x64xf32> to vector<16x32xf32>
    %193 = vector.extract_strided_slice %183 {offsets = [0, 0], sizes = [16, 32], strides = [1, 1]} : vector<16x64xf32> to vector<16x32xf32>
    %194 = vector.extract_strided_slice %191 {offsets = [0, 0], sizes = [16, 32], strides = [1, 1]} : vector<16x64xf32> to vector<16x32xf32>
    %195 = arith.truncf %192 : vector<16x32xf32> to vector<16x32xbf16>
    %196 = arith.truncf %193 : vector<16x32xf32> to vector<16x32xbf16>
    %cst_107 = arith.constant dense<0.000000e+00> : vector<16x16xf32>
    %197 = tpu.matmul %195, %196, %cst_107 {dimension_numbers = #tpu.dot_dimension_numbers<[1], [1], [0], [0], [0, 0, 1, 0], [], []>} : vector<16x32xbf16>, vector<16x32xbf16>, vector<16x16xf32> -> vector<16x16xf32>
    %cst_108 = arith.constant 0.176776692 : f32
    %198 = vector.broadcast %cst_108 : f32 to vector<16x16xf32>
    %199 = arith.mulf %197, %198 : vector<16x16xf32>
    %cst_109 = arith.constant dense<0xFF800000> : vector<16xf32>
    %200 = vector.multi_reduction <maximumf>, %199, %cst_109 [1] : vector<16x16xf32> to vector<16xf32>
    %201 = vector.shape_cast %200 : vector<16xf32> to vector<16x1xf32>
    %202 = vector.broadcast %201 : vector<16x1xf32> to vector<16x16xf32>
    %203 = arith.subf %199, %202 : vector<16x16xf32>
    %204 = math.exp %203 : vector<16x16xf32>
    %cst_110 = arith.constant dense<0.000000e+00> : vector<16xf32>
    %205 = vector.multi_reduction <add>, %204, %cst_110 [1] : vector<16x16xf32> to vector<16xf32>
    %206 = vector.shape_cast %205 : vector<16xf32> to vector<16x1xf32>
    %207 = tpu.reciprocal %206 {approx = true} : vector<16x1xf32> -> vector<16x1xf32>
    %208 = vector.broadcast %207 : vector<16x1xf32> to vector<16x16xf32>
    %209 = arith.mulf %204, %208 : vector<16x16xf32>
    %210 = arith.truncf %209 : vector<16x16xf32> to vector<16x16xbf16>
    %211 = arith.truncf %194 : vector<16x32xf32> to vector<16x32xbf16>
    %cst_111 = arith.constant dense<0.000000e+00> : vector<16x32xf32>
    %212 = tpu.matmul %210, %211, %cst_111 {dimension_numbers = #tpu.dot_dimension_numbers<[1], [0], [0], [1], [0, 0, 1, 1], [], []>} : vector<16x16xbf16>, vector<16x32xbf16>, vector<16x32xf32> -> vector<16x32xf32>
    %213 = vector.extract_strided_slice %187 {offsets = [0, 32], sizes = [16, 32], strides = [1, 1]} : vector<16x64xf32> to vector<16x32xf32>
    %214 = vector.extract_strided_slice %183 {offsets = [0, 32], sizes = [16, 32], strides = [1, 1]} : vector<16x64xf32> to vector<16x32xf32>
    %215 = vector.extract_strided_slice %191 {offsets = [0, 32], sizes = [16, 32], strides = [1, 1]} : vector<16x64xf32> to vector<16x32xf32>
    %216 = arith.truncf %213 : vector<16x32xf32> to vector<16x32xbf16>
    %217 = arith.truncf %214 : vector<16x32xf32> to vector<16x32xbf16>
    %cst_112 = arith.constant dense<0.000000e+00> : vector<16x16xf32>
    %218 = tpu.matmul %216, %217, %cst_112 {dimension_numbers = #tpu.dot_dimension_numbers<[1], [1], [0], [0], [0, 0, 1, 0], [], []>} : vector<16x32xbf16>, vector<16x32xbf16>, vector<16x16xf32> -> vector<16x16xf32>
    %cst_113 = arith.constant 0.176776692 : f32
    %219 = vector.broadcast %cst_113 : f32 to vector<16x16xf32>
    %220 = arith.mulf %218, %219 : vector<16x16xf32>
    %cst_114 = arith.constant dense<0xFF800000> : vector<16xf32>
    %221 = vector.multi_reduction <maximumf>, %220, %cst_114 [1] : vector<16x16xf32> to vector<16xf32>
    %222 = vector.shape_cast %221 : vector<16xf32> to vector<16x1xf32>
    %223 = vector.broadcast %222 : vector<16x1xf32> to vector<16x16xf32>
    %224 = arith.subf %220, %223 : vector<16x16xf32>
    %225 = math.exp %224 : vector<16x16xf32>
    %cst_115 = arith.constant dense<0.000000e+00> : vector<16xf32>
    %226 = vector.multi_reduction <add>, %225, %cst_115 [1] : vector<16x16xf32> to vector<16xf32>
    %227 = vector.shape_cast %226 : vector<16xf32> to vector<16x1xf32>
    %228 = tpu.reciprocal %227 {approx = true} : vector<16x1xf32> -> vector<16x1xf32>
    %229 = vector.broadcast %228 : vector<16x1xf32> to vector<16x16xf32>
    %230 = arith.mulf %225, %229 : vector<16x16xf32>
    %231 = arith.truncf %230 : vector<16x16xf32> to vector<16x16xbf16>
    %232 = arith.truncf %215 : vector<16x32xf32> to vector<16x32xbf16>
    %cst_116 = arith.constant dense<0.000000e+00> : vector<16x32xf32>
    %233 = tpu.matmul %231, %232, %cst_116 {dimension_numbers = #tpu.dot_dimension_numbers<[1], [0], [0], [1], [0, 0, 1, 1], [], []>} : vector<16x16xbf16>, vector<16x32xbf16>, vector<16x32xf32> -> vector<16x32xf32>
    %234 = tpu.concatenate %212, %233 in 1 : vector<16x32xf32>, vector<16x32xf32> -> vector<16x64xf32>
    %235 = arith.truncf %234 : vector<16x64xf32> to vector<16x64xbf16>
    %cst_117 = arith.constant dense<0.000000e+00> : vector<16x32xf32>
    %236 = tpu.matmul %235, %150, %cst_117 {dimension_numbers = #tpu.dot_dimension_numbers<[1], [0], [0], [1], [0, 0, 1, 1], [], []>} : vector<16x64xbf16>, vector<64x32xbf16>, vector<16x32xf32> -> vector<16x32xf32>
    %237 = vector.broadcast %151 : vector<1x32xf32> to vector<16x32xf32>
    %238 = arith.addf %236, %237 : vector<16x32xf32>
    %239 = arith.addf %238, %141 : vector<16x32xf32>
    %cst_118 = arith.constant dense<0.000000e+00> : vector<16xf32>
    %240 = vector.multi_reduction <add>, %239, %cst_118 [1] : vector<16x32xf32> to vector<16xf32>
    %241 = vector.shape_cast %240 : vector<16xf32> to vector<16x1xf32>
    %cst_119 = arith.constant 3.200000e+01 : f32
    %242 = vector.broadcast %cst_119 : f32 to vector<16x1xf32>
    %243 = arith.divf %241, %242 : vector<16x1xf32>
    %244 = vector.broadcast %243 : vector<16x1xf32> to vector<16x32xf32>
    %245 = arith.subf %239, %244 : vector<16x32xf32>
    %246 = arith.mulf %245, %245 : vector<16x32xf32>
    %cst_120 = arith.constant dense<0.000000e+00> : vector<16xf32>
    %247 = vector.multi_reduction <add>, %246, %cst_120 [1] : vector<16x32xf32> to vector<16xf32>
    %248 = vector.shape_cast %247 : vector<16xf32> to vector<16x1xf32>
    %cst_121 = arith.constant 3.200000e+01 : f32
    %249 = vector.broadcast %cst_121 : f32 to vector<16x1xf32>
    %250 = arith.divf %248, %249 : vector<16x1xf32>
    %251 = vector.broadcast %243 : vector<16x1xf32> to vector<16x32xf32>
    %252 = arith.subf %239, %251 : vector<16x32xf32>
    %cst_122 = arith.constant 9.99999974E-6 : f32
    %253 = vector.broadcast %cst_122 : f32 to vector<16x1xf32>
    %254 = arith.addf %250, %253 : vector<16x1xf32>
    %255 = math.rsqrt %254 : vector<16x1xf32>
    %256 = vector.broadcast %255 : vector<16x1xf32> to vector<16x32xf32>
    %257 = arith.mulf %252, %256 : vector<16x32xf32>
    %258 = vector.broadcast %152 : vector<1x32xf32> to vector<16x32xf32>
    %259 = arith.mulf %257, %258 : vector<16x32xf32>
    %260 = vector.broadcast %153 : vector<1x32xf32> to vector<16x32xf32>
    %261 = arith.addf %259, %260 : vector<16x32xf32>
    %262 = arith.truncf %261 : vector<16x32xf32> to vector<16x32xbf16>
    %cst_123 = arith.constant dense<0.000000e+00> : vector<16x32xf32>
    %263 = tpu.matmul %262, %154, %cst_123 {dimension_numbers = #tpu.dot_dimension_numbers<[1], [0], [0], [1], [0, 0, 1, 1], [], []>} : vector<16x32xbf16>, vector<32x32xbf16>, vector<16x32xf32> -> vector<16x32xf32>
    %264 = vector.broadcast %155 : vector<1x32xf32> to vector<16x32xf32>
    %265 = arith.addf %263, %264 : vector<16x32xf32>
    %cst_124 = arith.constant 0.000000e+00 : f32
    %266 = vector.broadcast %cst_124 : f32 to vector<16x32xf32>
    %267 = arith.maximumf %265, %266 : vector<16x32xf32>
    %268 = arith.truncf %267 : vector<16x32xf32> to vector<16x32xbf16>
    %cst_125 = arith.constant dense<0.000000e+00> : vector<16x32xf32>
    %269 = tpu.matmul %268, %156, %cst_125 {dimension_numbers = #tpu.dot_dimension_numbers<[1], [0], [0], [1], [0, 0, 1, 1], [], []>} : vector<16x32xbf16>, vector<32x32xbf16>, vector<16x32xf32> -> vector<16x32xf32>
    %270 = vector.broadcast %157 : vector<1x32xf32> to vector<16x32xf32>
    %271 = arith.addf %269, %270 : vector<16x32xf32>
    %272 = arith.addf %271, %239 : vector<16x32xf32>
    %c1_i32 = arith.constant 1 : i32
    %cst_126 = arith.constant dense<0.000000e+00> : vector<16xf32>
    %273 = vector.multi_reduction <add>, %272, %cst_126 [1] : vector<16x32xf32> to vector<16xf32>
    %274 = vector.shape_cast %273 : vector<16xf32> to vector<16x1xf32>
    %cst_127 = arith.constant 3.200000e+01 : f32
    %275 = vector.broadcast %cst_127 : f32 to vector<16x1xf32>
    %276 = arith.divf %274, %275 : vector<16x1xf32>
    %277 = vector.broadcast %276 : vector<16x1xf32> to vector<16x32xf32>
    %278 = arith.subf %272, %277 : vector<16x32xf32>
    %279 = arith.mulf %278, %278 : vector<16x32xf32>
    %cst_128 = arith.constant dense<0.000000e+00> : vector<16xf32>
    %280 = vector.multi_reduction <add>, %279, %cst_128 [1] : vector<16x32xf32> to vector<16xf32>
    %281 = vector.shape_cast %280 : vector<16xf32> to vector<16x1xf32>
    %cst_129 = arith.constant 3.200000e+01 : f32
    %282 = vector.broadcast %cst_129 : f32 to vector<16x1xf32>
    %283 = arith.divf %281, %282 : vector<16x1xf32>
    %284 = vector.broadcast %276 : vector<16x1xf32> to vector<16x32xf32>
    %285 = arith.subf %272, %284 : vector<16x32xf32>
    %cst_130 = arith.constant 9.99999974E-6 : f32
    %286 = vector.broadcast %cst_130 : f32 to vector<16x1xf32>
    %287 = arith.addf %283, %286 : vector<16x1xf32>
    %288 = math.rsqrt %287 : vector<16x1xf32>
    %289 = vector.broadcast %288 : vector<16x1xf32> to vector<16x32xf32>
    %290 = arith.mulf %285, %289 : vector<16x32xf32>
    %291 = vector.broadcast %142 : vector<1x32xf32> to vector<16x32xf32>
    %292 = arith.mulf %290, %291 : vector<16x32xf32>
    %293 = vector.broadcast %143 : vector<1x32xf32> to vector<16x32xf32>
    %294 = arith.addf %292, %293 : vector<16x32xf32>
    %295 = arith.truncf %294 : vector<16x32xf32> to vector<16x32xbf16>
    %cst_131 = arith.constant dense<0.000000e+00> : vector<16x64xf32>
    %296 = tpu.matmul %295, %144, %cst_131 {dimension_numbers = #tpu.dot_dimension_numbers<[1], [0], [0], [1], [0, 0, 1, 1], [], []>} : vector<16x32xbf16>, vector<32x64xbf16>, vector<16x64xf32> -> vector<16x64xf32>
    %297 = vector.broadcast %145 : vector<1x64xf32> to vector<16x64xf32>
    %298 = arith.addf %296, %297 : vector<16x64xf32>
    %299 = arith.truncf %294 : vector<16x32xf32> to vector<16x32xbf16>
    %cst_132 = arith.constant dense<0.000000e+00> : vector<16x64xf32>
    %300 = tpu.matmul %299, %146, %cst_132 {dimension_numbers = #tpu.dot_dimension_numbers<[1], [0], [0], [1], [0, 0, 1, 1], [], []>} : vector<16x32xbf16>, vector<32x64xbf16>, vector<16x64xf32> -> vector<16x64xf32>
    %301 = vector.broadcast %147 : vector<1x64xf32> to vector<16x64xf32>
    %302 = arith.addf %300, %301 : vector<16x64xf32>
    %303 = arith.truncf %294 : vector<16x32xf32> to vector<16x32xbf16>
    %cst_133 = arith.constant dense<0.000000e+00> : vector<16x64xf32>
    %304 = tpu.matmul %303, %148, %cst_133 {dimension_numbers = #tpu.dot_dimension_numbers<[1], [0], [0], [1], [0, 0, 1, 1], [], []>} : vector<16x32xbf16>, vector<32x64xbf16>, vector<16x64xf32> -> vector<16x64xf32>
    %305 = vector.broadcast %149 : vector<1x64xf32> to vector<16x64xf32>
    %306 = arith.addf %304, %305 : vector<16x64xf32>
    %307 = vector.extract_strided_slice %302 {offsets = [0, 0], sizes = [16, 32], strides = [1, 1]} : vector<16x64xf32> to vector<16x32xf32>
    %308 = vector.extract_strided_slice %298 {offsets = [0, 0], sizes = [16, 32], strides = [1, 1]} : vector<16x64xf32> to vector<16x32xf32>
    %309 = vector.extract_strided_slice %306 {offsets = [0, 0], sizes = [16, 32], strides = [1, 1]} : vector<16x64xf32> to vector<16x32xf32>
    %310 = arith.truncf %307 : vector<16x32xf32> to vector<16x32xbf16>
    %311 = arith.truncf %308 : vector<16x32xf32> to vector<16x32xbf16>
    %cst_134 = arith.constant dense<0.000000e+00> : vector<16x16xf32>
    %312 = tpu.matmul %310, %311, %cst_134 {dimension_numbers = #tpu.dot_dimension_numbers<[1], [1], [0], [0], [0, 0, 1, 0], [], []>} : vector<16x32xbf16>, vector<16x32xbf16>, vector<16x16xf32> -> vector<16x16xf32>
    %cst_135 = arith.constant 0.176776692 : f32
    %313 = vector.broadcast %cst_135 : f32 to vector<16x16xf32>
    %314 = arith.mulf %312, %313 : vector<16x16xf32>
    %cst_136 = arith.constant dense<0xFF800000> : vector<16xf32>
    %315 = vector.multi_reduction <maximumf>, %314, %cst_136 [1] : vector<16x16xf32> to vector<16xf32>
    %316 = vector.shape_cast %315 : vector<16xf32> to vector<16x1xf32>
    %317 = vector.broadcast %316 : vector<16x1xf32> to vector<16x16xf32>
    %318 = arith.subf %314, %317 : vector<16x16xf32>
    %319 = math.exp %318 : vector<16x16xf32>
    %cst_137 = arith.constant dense<0.000000e+00> : vector<16xf32>
    %320 = vector.multi_reduction <add>, %319, %cst_137 [1] : vector<16x16xf32> to vector<16xf32>
    %321 = vector.shape_cast %320 : vector<16xf32> to vector<16x1xf32>
    %322 = tpu.reciprocal %321 {approx = true} : vector<16x1xf32> -> vector<16x1xf32>
    %323 = vector.broadcast %322 : vector<16x1xf32> to vector<16x16xf32>
    %324 = arith.mulf %319, %323 : vector<16x16xf32>
    %325 = arith.truncf %324 : vector<16x16xf32> to vector<16x16xbf16>
    %326 = arith.truncf %309 : vector<16x32xf32> to vector<16x32xbf16>
    %cst_138 = arith.constant dense<0.000000e+00> : vector<16x32xf32>
    %327 = tpu.matmul %325, %326, %cst_138 {dimension_numbers = #tpu.dot_dimension_numbers<[1], [0], [0], [1], [0, 0, 1, 1], [], []>} : vector<16x16xbf16>, vector<16x32xbf16>, vector<16x32xf32> -> vector<16x32xf32>
    %328 = vector.extract_strided_slice %302 {offsets = [0, 32], sizes = [16, 32], strides = [1, 1]} : vector<16x64xf32> to vector<16x32xf32>
    %329 = vector.extract_strided_slice %298 {offsets = [0, 32], sizes = [16, 32], strides = [1, 1]} : vector<16x64xf32> to vector<16x32xf32>
    %330 = vector.extract_strided_slice %306 {offsets = [0, 32], sizes = [16, 32], strides = [1, 1]} : vector<16x64xf32> to vector<16x32xf32>
    %331 = arith.truncf %328 : vector<16x32xf32> to vector<16x32xbf16>
    %332 = arith.truncf %329 : vector<16x32xf32> to vector<16x32xbf16>
    %cst_139 = arith.constant dense<0.000000e+00> : vector<16x16xf32>
    %333 = tpu.matmul %331, %332, %cst_139 {dimension_numbers = #tpu.dot_dimension_numbers<[1], [1], [0], [0], [0, 0, 1, 0], [], []>} : vector<16x32xbf16>, vector<16x32xbf16>, vector<16x16xf32> -> vector<16x16xf32>
    %cst_140 = arith.constant 0.176776692 : f32
    %334 = vector.broadcast %cst_140 : f32 to vector<16x16xf32>
    %335 = arith.mulf %333, %334 : vector<16x16xf32>
    %cst_141 = arith.constant dense<0xFF800000> : vector<16xf32>
    %336 = vector.multi_reduction <maximumf>, %335, %cst_141 [1] : vector<16x16xf32> to vector<16xf32>
    %337 = vector.shape_cast %336 : vector<16xf32> to vector<16x1xf32>
    %338 = vector.broadcast %337 : vector<16x1xf32> to vector<16x16xf32>
    %339 = arith.subf %335, %338 : vector<16x16xf32>
    %340 = math.exp %339 : vector<16x16xf32>
    %cst_142 = arith.constant dense<0.000000e+00> : vector<16xf32>
    %341 = vector.multi_reduction <add>, %340, %cst_142 [1] : vector<16x16xf32> to vector<16xf32>
    %342 = vector.shape_cast %341 : vector<16xf32> to vector<16x1xf32>
    %343 = tpu.reciprocal %342 {approx = true} : vector<16x1xf32> -> vector<16x1xf32>
    %344 = vector.broadcast %343 : vector<16x1xf32> to vector<16x16xf32>
    %345 = arith.mulf %340, %344 : vector<16x16xf32>
    %346 = arith.truncf %345 : vector<16x16xf32> to vector<16x16xbf16>
    %347 = arith.truncf %330 : vector<16x32xf32> to vector<16x32xbf16>
    %cst_143 = arith.constant dense<0.000000e+00> : vector<16x32xf32>
    %348 = tpu.matmul %346, %347, %cst_143 {dimension_numbers = #tpu.dot_dimension_numbers<[1], [0], [0], [1], [0, 0, 1, 1], [], []>} : vector<16x16xbf16>, vector<16x32xbf16>, vector<16x32xf32> -> vector<16x32xf32>
    %349 = tpu.concatenate %327, %348 in 1 : vector<16x32xf32>, vector<16x32xf32> -> vector<16x64xf32>
    %350 = arith.truncf %349 : vector<16x64xf32> to vector<16x64xbf16>
    %cst_144 = arith.constant dense<0.000000e+00> : vector<16x32xf32>
    %351 = tpu.matmul %350, %150, %cst_144 {dimension_numbers = #tpu.dot_dimension_numbers<[1], [0], [0], [1], [0, 0, 1, 1], [], []>} : vector<16x64xbf16>, vector<64x32xbf16>, vector<16x32xf32> -> vector<16x32xf32>
    %352 = vector.broadcast %151 : vector<1x32xf32> to vector<16x32xf32>
    %353 = arith.addf %351, %352 : vector<16x32xf32>
    %354 = arith.addf %353, %272 : vector<16x32xf32>
    %cst_145 = arith.constant dense<0.000000e+00> : vector<16xf32>
    %355 = vector.multi_reduction <add>, %354, %cst_145 [1] : vector<16x32xf32> to vector<16xf32>
    %356 = vector.shape_cast %355 : vector<16xf32> to vector<16x1xf32>
    %cst_146 = arith.constant 3.200000e+01 : f32
    %357 = vector.broadcast %cst_146 : f32 to vector<16x1xf32>
    %358 = arith.divf %356, %357 : vector<16x1xf32>
    %359 = vector.broadcast %358 : vector<16x1xf32> to vector<16x32xf32>
    %360 = arith.subf %354, %359 : vector<16x32xf32>
    %361 = arith.mulf %360, %360 : vector<16x32xf32>
    %cst_147 = arith.constant dense<0.000000e+00> : vector<16xf32>
    %362 = vector.multi_reduction <add>, %361, %cst_147 [1] : vector<16x32xf32> to vector<16xf32>
    %363 = vector.shape_cast %362 : vector<16xf32> to vector<16x1xf32>
    %cst_148 = arith.constant 3.200000e+01 : f32
    %364 = vector.broadcast %cst_148 : f32 to vector<16x1xf32>
    %365 = arith.divf %363, %364 : vector<16x1xf32>
    %366 = vector.broadcast %358 : vector<16x1xf32> to vector<16x32xf32>
    %367 = arith.subf %354, %366 : vector<16x32xf32>
    %cst_149 = arith.constant 9.99999974E-6 : f32
    %368 = vector.broadcast %cst_149 : f32 to vector<16x1xf32>
    %369 = arith.addf %365, %368 : vector<16x1xf32>
    %370 = math.rsqrt %369 : vector<16x1xf32>
    %371 = vector.broadcast %370 : vector<16x1xf32> to vector<16x32xf32>
    %372 = arith.mulf %367, %371 : vector<16x32xf32>
    %373 = vector.broadcast %152 : vector<1x32xf32> to vector<16x32xf32>
    %374 = arith.mulf %372, %373 : vector<16x32xf32>
    %375 = vector.broadcast %153 : vector<1x32xf32> to vector<16x32xf32>
    %376 = arith.addf %374, %375 : vector<16x32xf32>
    %377 = arith.truncf %376 : vector<16x32xf32> to vector<16x32xbf16>
    %cst_150 = arith.constant dense<0.000000e+00> : vector<16x32xf32>
    %378 = tpu.matmul %377, %154, %cst_150 {dimension_numbers = #tpu.dot_dimension_numbers<[1], [0], [0], [1], [0, 0, 1, 1], [], []>} : vector<16x32xbf16>, vector<32x32xbf16>, vector<16x32xf32> -> vector<16x32xf32>
    %379 = vector.broadcast %155 : vector<1x32xf32> to vector<16x32xf32>
    %380 = arith.addf %378, %379 : vector<16x32xf32>
    %cst_151 = arith.constant 0.000000e+00 : f32
    %381 = vector.broadcast %cst_151 : f32 to vector<16x32xf32>
    %382 = arith.maximumf %380, %381 : vector<16x32xf32>
    %383 = arith.truncf %382 : vector<16x32xf32> to vector<16x32xbf16>
    %cst_152 = arith.constant dense<0.000000e+00> : vector<16x32xf32>
    %384 = tpu.matmul %383, %156, %cst_152 {dimension_numbers = #tpu.dot_dimension_numbers<[1], [0], [0], [1], [0, 0, 1, 1], [], []>} : vector<16x32xbf16>, vector<32x32xbf16>, vector<16x32xf32> -> vector<16x32xf32>
    %385 = vector.broadcast %157 : vector<1x32xf32> to vector<16x32xf32>
    %386 = arith.addf %384, %385 : vector<16x32xf32>
    %387 = arith.addf %386, %354 : vector<16x32xf32>
    %c0_153 = arith.constant 0 : index
    %c0_154 = arith.constant 0 : index
    %c0_155 = arith.constant 0 : index
    %388 = vector.load %arg37[%c0_153, %c0_154, %c0_155] : memref<1x16x32xf32, #tpu.memory_space<vmem>>, vector<1x16x32xf32>
    %389 = vector.shape_cast %388 : vector<1x16x32xf32> to vector<16x32xf32>
    %390 = vector.shape_cast %387 : vector<16x32xf32> to vector<1x16x32xf32>
    tpu.vector_store %arg37[%c0_153, %c0_154, %c0_155], %390 {strides = array<i32>} : memref<1x16x32xf32, #tpu.memory_space<vmem>>, vector<1x16x32xf32>,
    return
  }
  func.func @transform_0(%arg0: i32) -> (i32, i32, i32) {
    %c0_i32 = arith.constant 0 : i32
    %c0_i32_0 = arith.constant 0 : i32
    %c0_i32_1 = arith.constant 0 : i32
    return %arg0, %c0_i32, %c0_i32_0 : i32, i32, i32
  }
  func.func @transform_1(%arg0: i32) -> (i32, i32) {
    %c0_i32 = arith.constant 0 : i32
    %c0_i32_0 = arith.constant 0 : i32
    %c0_i32_1 = arith.constant 0 : i32
    return %c0_i32, %c0_i32_0 : i32, i32
  }
  func.func @transform_2(%arg0: i32) -> (i32, i32) {
    %c0_i32 = arith.constant 0 : i32
    %c0_i32_0 = arith.constant 0 : i32
    %c0_i32_1 = arith.constant 0 : i32
    return %c0_i32, %c0_i32_0 : i32, i32
  }
  func.func @transform_3(%arg0: i32) -> (i32, i32) {
    %c0_i32 = arith.constant 0 : i32
    %c0_i32_0 = arith.constant 0 : i32
    %c0_i32_1 = arith.constant 0 : i32
    return %c0_i32, %c0_i32_0 : i32, i32
  }
  func.func @transform_4(%arg0: i32) -> (i32, i32) {
    %c0_i32 = arith.constant 0 : i32
    %c0_i32_0 = arith.constant 0 : i32
    %c0_i32_1 = arith.constant 0 : i32
    return %c0_i32, %c0_i32_0 : i32, i32
  }
  func.func @transform_5(%arg0: i32) -> (i32, i32) {
    %c0_i32 = arith.constant 0 : i32
    %c0_i32_0 = arith.constant 0 : i32
    %c0_i32_1 = arith.constant 0 : i32
    return %c0_i32, %c0_i32_0 : i32, i32
  }
  func.func @transform_6(%arg0: i32) -> (i32, i32) {
    %c0_i32 = arith.constant 0 : i32
    %c0_i32_0 = arith.constant 0 : i32
    %c0_i32_1 = arith.constant 0 : i32
    return %c0_i32, %c0_i32_0 : i32, i32
  }
  func.func @transform_7(%arg0: i32) -> (i32, i32) {
    %c0_i32 = arith.constant 0 : i32
    %c0_i32_0 = arith.constant 0 : i32
    %c0_i32_1 = arith.constant 0 : i32
    return %c0_i32, %c0_i32_0 : i32, i32
  }
  func.func @transform_8(%arg0: i32) -> (i32, i32) {
    %c0_i32 = arith.constant 0 : i32
    %c0_i32_0 = arith.constant 0 : i32
    %c0_i32_1 = arith.constant 0 : i32
    return %c0_i32, %c0_i32_0 : i32, i32
  }
  func.func @transform_9(%arg0: i32) -> (i32, i32) {
    %c0_i32 = arith.constant 0 : i32
    %c0_i32_0 = arith.constant 0 : i32
    %c0_i32_1 = arith.constant 0 : i32
    return %c0_i32, %c0_i32_0 : i32, i32
  }
  func.func @transform_10(%arg0: i32) -> (i32, i32) {
    %c0_i32 = arith.constant 0 : i32
    %c0_i32_0 = arith.constant 0 : i32
    %c0_i32_1 = arith.constant 0 : i32
    return %c0_i32, %c0_i32_0 : i32, i32
  }
  func.func @transform_11(%arg0: i32) -> (i32, i32) {
    %c0_i32 = arith.constant 0 : i32
    %c0_i32_0 = arith.constant 0 : i32
    %c0_i32_1 = arith.constant 0 : i32
    return %c0_i32, %c0_i32_0 : i32, i32
  }
  func.func @transform_12(%arg0: i32) -> (i32, i32) {
    %c0_i32 = arith.constant 0 : i32
    %c0_i32_0 = arith.constant 0 : i32
    %c0_i32_1 = arith.constant 0 : i32
    return %c0_i32, %c0_i32_0 : i32, i32
  }
  func.func @transform_13(%arg0: i32) -> (i32, i32) {
    %c0_i32 = arith.constant 0 : i32
    %c0_i32_0 = arith.constant 0 : i32
    %c0_i32_1 = arith.constant 0 : i32
    return %c0_i32, %c0_i32_0 : i32, i32
  }
  func.func @transform_14(%arg0: i32) -> (i32, i32) {
    %c0_i32 = arith.constant 0 : i32
    %c0_i32_0 = arith.constant 0 : i32
    %c0_i32_1 = arith.constant 0 : i32
    return %c0_i32, %c0_i32_0 : i32, i32
  }
  func.func @transform_15(%arg0: i32) -> (i32, i32) {
    %c0_i32 = arith.constant 0 : i32
    %c0_i32_0 = arith.constant 0 : i32
    %c0_i32_1 = arith.constant 0 : i32
    return %c0_i32, %c0_i32_0 : i32, i32
  }
  func.func @transform_16(%arg0: i32) -> (i32, i32) {
    %c0_i32 = arith.constant 0 : i32
    %c0_i32_0 = arith.constant 0 : i32
    %c0_i32_1 = arith.constant 0 : i32
    return %c0_i32, %c0_i32_0 : i32, i32
  }
  func.func @transform_17(%arg0: i32) -> (i32, i32) {
    %c0_i32 = arith.constant 0 : i32
    %c0_i32_0 = arith.constant 0 : i32
    %c0_i32_1 = arith.constant 0 : i32
    return %c0_i32, %c0_i32_0 : i32, i32
  }
  func.func @transform_18(%arg0: i32) -> (i32, i32) {
    %c0_i32 = arith.constant 0 : i32
    %c0_i32_0 = arith.constant 0 : i32
    %c0_i32_1 = arith.constant 0 : i32
    return %c0_i32, %c0_i32_0 : i32, i32
  }
  func.func @transform_19(%arg0: i32) -> (i32, i32) {
    %c0_i32 = arith.constant 0 : i32
    %c0_i32_0 = arith.constant 0 : i32
    %c0_i32_1 = arith.constant 0 : i32
    return %c0_i32, %c0_i32_0 : i32, i32
  }
  func.func @transform_20(%arg0: i32) -> (i32, i32) {
    %c0_i32 = arith.constant 0 : i32
    %c0_i32_0 = arith.constant 0 : i32
    %c0_i32_1 = arith.constant 0 : i32
    return %c0_i32, %c0_i32_0 : i32, i32
  }
  func.func @transform_21(%arg0: i32) -> (i32, i32) {
    %c0_i32 = arith.constant 0 : i32
    %c0_i32_0 = arith.constant 0 : i32
    %c0_i32_1 = arith.constant 0 : i32
    return %c0_i32, %c0_i32_0 : i32, i32
  }
  func.func @transform_22(%arg0: i32) -> (i32, i32) {
    %c0_i32 = arith.constant 0 : i32
    %c0_i32_0 = arith.constant 0 : i32
    %c0_i32_1 = arith.constant 0 : i32
    return %c0_i32, %c0_i32_0 : i32, i32
  }
  func.func @transform_23(%arg0: i32) -> (i32, i32) {
    %c0_i32 = arith.constant 0 : i32
    %c0_i32_0 = arith.constant 0 : i32
    %c0_i32_1 = arith.constant 0 : i32
    return %c0_i32, %c0_i32_0 : i32, i32
  }
  func.func @transform_24(%arg0: i32) -> (i32, i32) {
    %c0_i32 = arith.constant 0 : i32
    %c0_i32_0 = arith.constant 0 : i32
    %c0_i32_1 = arith.constant 0 : i32
    return %c0_i32, %c0_i32_0 : i32, i32
  }
  func.func @transform_25(%arg0: i32) -> (i32, i32) {
    %c0_i32 = arith.constant 0 : i32
    %c0_i32_0 = arith.constant 0 : i32
    %c0_i32_1 = arith.constant 0 : i32
    return %c0_i32, %c0_i32_0 : i32, i32
  }
  func.func @transform_26(%arg0: i32) -> (i32, i32) {
    %c0_i32 = arith.constant 0 : i32
    %c0_i32_0 = arith.constant 0 : i32
    %c0_i32_1 = arith.constant 0 : i32
    return %c0_i32, %c0_i32_0 : i32, i32
  }
  func.func @transform_27(%arg0: i32) -> (i32, i32) {
    %c0_i32 = arith.constant 0 : i32
    %c0_i32_0 = arith.constant 0 : i32
    %c0_i32_1 = arith.constant 0 : i32
    return %c0_i32, %c0_i32_0 : i32, i32
  }
  func.func @transform_28(%arg0: i32) -> (i32, i32) {
    %c0_i32 = arith.constant 0 : i32
    %c0_i32_0 = arith.constant 0 : i32
    %c0_i32_1 = arith.constant 0 : i32
    return %c0_i32, %c0_i32_0 : i32, i32
  }
  func.func @transform_29(%arg0: i32) -> (i32, i32) {
    %c0_i32 = arith.constant 0 : i32
    %c0_i32_0 = arith.constant 0 : i32
    %c0_i32_1 = arith.constant 0 : i32
    return %c0_i32, %c0_i32_0 : i32, i32
  }
  func.func @transform_30(%arg0: i32) -> (i32, i32) {
    %c0_i32 = arith.constant 0 : i32
    %c0_i32_0 = arith.constant 0 : i32
    %c0_i32_1 = arith.constant 0 : i32
    return %c0_i32, %c0_i32_0 : i32, i32
  }
  func.func @transform_31(%arg0: i32) -> (i32, i32) {
    %c0_i32 = arith.constant 0 : i32
    %c0_i32_0 = arith.constant 0 : i32
    %c0_i32_1 = arith.constant 0 : i32
    return %c0_i32, %c0_i32_0 : i32, i32
  }
  func.func @transform_32(%arg0: i32) -> (i32, i32) {
    %c0_i32 = arith.constant 0 : i32
    %c0_i32_0 = arith.constant 0 : i32
    %c0_i32_1 = arith.constant 0 : i32
    return %c0_i32, %c0_i32_0 : i32, i32
  }
  func.func @transform_33(%arg0: i32) -> (i32, i32) {
    %c0_i32 = arith.constant 0 : i32
    %c0_i32_0 = arith.constant 0 : i32
    %c0_i32_1 = arith.constant 0 : i32
    return %c0_i32, %c0_i32_0 : i32, i32
  }
  func.func @transform_34(%arg0: i32) -> (i32, i32) {
    %c0_i32 = arith.constant 0 : i32
    %c0_i32_0 = arith.constant 0 : i32
    %c0_i32_1 = arith.constant 0 : i32
    return %c0_i32, %c0_i32_0 : i32, i32
  }
  func.func @transform_35(%arg0: i32) -> (i32, i32) {
    %c0_i32 = arith.constant 0 : i32
    %c0_i32_0 = arith.constant 0 : i32
    %c0_i32_1 = arith.constant 0 : i32
    return %c0_i32, %c0_i32_0 : i32, i32
  }
  func.func @transform_36(%arg0: i32) -> (i32, i32, i32) {
    %c0_i32 = arith.constant 0 : i32
    %c0_i32_0 = arith.constant 0 : i32
    %c0_i32_1 = arith.constant 0 : i32
    return %arg0, %c0_i32, %c0_i32_0 : i32, i32, i32
  }
}

</mosaic_0001>

<bundles_post_ra>
// kernel: tpu_custom_call.1
= control target key start
LH: loop header
LB: loop body
LE: loop exit
PB: predicated region body
PF: predicated region fallthrough
CT: control target
= control target key end

     0   :  { %s5178_s6 = smov 1   ;;  %s5179_s10 = smov 2   ;;  %s6117_s0 = inlined_call_operand.smem [shape: u32[37], index: -1, kind: input, shape index: {}] }
   0x1   :  { %s5248_s5 = sld [smem:[%s6117_s0]]   ;;  %s5180_s14 = smov 3  }
   0x2   :  { %s5253_s9 = sld [smem:[%s6117_s0 + %s5178_s6]]   ;;  %s5181_s18 = smov 4  }
   0x3   :  { %s5258_s13 = sld [smem:[%s6117_s0 + %s5179_s10]]   ;;  %s5182_s22 = smov 5  }
   0x4   :  { %s5263_s17 = sld [smem:[%s6117_s0 + %s5180_s14]]   ;;  %s5183_s26 = smov 6  }
   0x5   :  { %s5268_s21 = sld [smem:[%s6117_s0 + %s5181_s18]]   ;;  %s5184_s30 = smov 7  }
   0x6   :  { %s5273_s25 = sld [smem:[%s6117_s0 + %s5182_s22]]   ;;  %s5185_s4 = smov 8  }
   0x7   :  { %6149 = sst [smem:[#allocation40_spill]] %s5248_s5  ;;  %s5186_s10 = smov 9  }
   0x8   :  { %6150 = sst [smem:[#allocation41_spill]] %s5253_s9  ;;  %s5187_s15 = smov 10  }
   0x9   :  { %6151 = sst [smem:[#allocation42_spill]] %s5258_s13  ;;  %s5188_s20 = smov 11  }
   0xa   :  { %s5278_s29 = sld [smem:[%s6117_s0 + %s5183_s26]]   ;;  %s5189_s26 = smov 12  }
   0xb   :  { %s5283_s3 = sld [smem:[%s6117_s0 + %s5184_s30]]   ;;  %s5190_s1 = smov 13  }
   0xc   :  { %s5288_s8 = sld [smem:[%s6117_s0 + %s5185_s4]]   ;;  %s5191_s7 = smov 14  }
   0xd   :  { %s5293_s14 = sld [smem:[%s6117_s0 + %s5186_s10]]   ;;  %s5193_s22 = smov 16  }
   0xe   :  { %s5298_s19 = sld [smem:[%s6117_s0 + %s5187_s15]]   ;;  %s5192_s15 = smov 15  }
   0xf   :  { %s5303_s24 = sld [smem:[%s6117_s0 + %s5188_s20]]   ;;  %s5194_s28 = smov 17  }
  0x10   :  { %6152 = sst [smem:[#allocation43_spill]] %s5278_s29 }
  0x11   :  { %6153 = sst [smem:[#allocation44_spill]] %s5283_s3 }
  0x12   :  { %6154 = sst [smem:[#allocation45_spill]] %s5288_s8 }
  0x13   :  { %s5308_s30 = sld [smem:[%s6117_s0 + %s5189_s26]]  }
  0x14   :  { %6155 = sst [smem:[#allocation46_spill]] %s5298_s19 }
  0x15   :  { %s5313_s6 = sld [smem:[%s6117_s0 + %s5190_s1]]  }
  0x16   :  { %s5318_s12 = sld [smem:[%s6117_s0 + %s5191_s7]]   ;;  %s5195_s7 = smov 18  }
  0x17   :  { %s5323_s20 = sld [smem:[%s6117_s0 + %s5192_s15]]   ;;  %s5196_s15 = smov 19  }
  0x18   :  { %s5328_s27 = sld [smem:[%s6117_s0 + %s5193_s22]]   ;;  %s5197_s22 = smov 20  }
  0x19   :  { %6156 = sst [smem:[#allocation47_spill]] %s5308_s30 }
  0x1a   :  { %s5333_s4 = sld [smem:[%s6117_s0 + %s5194_s28]]   ;;  %s5198_s28 = smov 21  }
  0x1b   :  { %6157 = sst [smem:[#allocation48_spill]] %s5313_s6 }
  0x1c   :  { %s5338_s30 = sld [smem:[%s6117_s0 + %s5195_s7]]   ;;  %s5199_s7 = smov 22  }
  0x1d   :  { %s5343_s9 = sld [smem:[%s6117_s0 + %s5196_s15]]   ;;  %s5200_s15 = smov 23  }
  0x1e   :  { %6158 = sst [smem:[#allocation49_spill]] %s5328_s27 }
  0x1f   :  { %s5348_s27 = sld [smem:[%s6117_s0 + %s5197_s22]]   ;;  %s5201_s22 = smov 24  }
  0x20   :  { %6159 = sst [smem:[#allocation50_spill]] %s5333_s4 }
  0x21   :  { %s5353_s8 = sld [smem:[%s6117_s0 + %s5198_s28]]   ;;  %s5202_s28 = smov 25  }
  0x22   :  { %6160 = sst [smem:[#allocation51_spill]] %s5338_s30 }
  0x23   :  { %6161 = sst [smem:[#allocation52_spill]] %s5343_s9 }
  0x24   :  { %s5358_s30 = sld [smem:[%s6117_s0 + %s5199_s7]]   ;;  %s5203_s7 = smov 26  }
  0x25   :  { %6162 = sst [smem:[#allocation53_spill]] %s5348_s27 }
  0x26   :  { %s5363_s9 = sld [smem:[%s6117_s0 + %s5200_s15]]   ;;  %s5204_s15 = smov 27  }
  0x27   :  { %6163 = sst [smem:[#allocation54_spill]] %s5353_s8 }
  0x28   :  { %s5368_s27 = sld [smem:[%s6117_s0 + %s5201_s22]]   ;;  %s5205_s22 = smov 28  }
  0x29   :  { %s5373_s8 = sld [smem:[%s6117_s0 + %s5202_s28]]   ;;  %s5206_s28 = smov 29  }
  0x2a   :  { %6164 = sst [smem:[#allocation55_spill]] %s5358_s30 }
  0x2b   :  { %s5378_s30 = sld [smem:[%s6117_s0 + %s5203_s7]]   ;;  %s5207_s7 = smov 30  }
  0x2c   :  { %6165 = sst [smem:[#allocation56_spill]] %s5363_s9 }
  0x2d   :  { %s5383_s19 = sld [smem:[%s6117_s0 + %s5204_s15]]   ;;  %s5208_s15 = smov 31  }
  0x2e   :  { %s5388_s29 = sld [smem:[%s6117_s0 + %s5205_s22]]   ;;  %s5209_s22 = smov 32  }
  0x2f   :  { %6166 = sst [smem:[#allocation57_spill]] %s5373_s8 }
  0x30   :  { %s5393_s5 = sld [smem:[%s6117_s0 + %s5206_s28]]   ;;  %s5210_s28 = smov 33  }
  0x31   :  { %s5398_s13 = sld [smem:[%s6117_s0 + %s5207_s7]]   ;;  %s5211_s7 = smov 34  }
  0x32   :  { %s5413_s8 = sld [smem:[%s6117_s0 + %s5210_s28]]  }
  0x33   :  { %6167 = sst [smem:[#allocation58_spill]] %s5383_s19 }
  0x34   :  { %6168 = sst [smem:[#allocation59_spill]] %s5388_s29 }
  0x35   :  { %s5403_s19 = sld [smem:[%s6117_s0 + %s5208_s15]]   ;;  %s5212_s15 = smov 35  }
  0x36   :  { %6169 = sst [smem:[#allocation60_spill]] %s5393_s5 }
  0x37   :  { %6170 = sst [smem:[#allocation61_spill]] %s5398_s13 }
  0x38   :  { %s5408_s29 = sld [smem:[%s6117_s0 + %s5209_s22]]   ;;  %s5213_s22 = smov 36  }
  0x39   :  { %6173 = sst [smem:[#allocation64_spill]] %s5413_s8 }
  0x3a   :  { %s5418_s13 = sld [smem:[%s6117_s0 + %s5211_s7]]  }
  0x3b   :  { %6171 = sst [smem:[#allocation62_spill]] %s5403_s19 }
  0x3c   :  { %s5423_s19 = sld [smem:[%s6117_s0 + %s5212_s15]]  }
  0x3e   :  { %6172 = sst [smem:[#allocation63_spill]] %s5408_s29 }
  0x3f   :  { %s5428_s29 = sld [smem:[%s6117_s0 + %s5213_s22]]  }
  0x40   :  { %78 = vsyncpa [#allocation3], 0 }
  0x41   :  { %79 = vsyncpa [#allocation6], 0 }
  0x42   :  { %80 = vsyncpa [#allocation9], 0 }
  0x43   :  { %81 = vsyncpa [#allocation12], 0 }
  0x44   :  { %82 = vsyncpa [#allocation15], 0 }
  0x45   :  { %83 = vsyncpa [#allocation18], 0 }
  0x46   :  { %84 = vsyncpa [#allocation21], 0 }
  0x47   :  { %85 = vsyncpa [#allocation24], 0 }
  0x48   :  { %86 = vsyncpa [#allocation27], 0 }
  0x49   :  { %87 = vsyncpa [#allocation4], 0 }
  0x4a   :  { %89 = vsyncpa [#allocation4 + $0x1], 0  ;;  %s5430_s28 = smov 0   ;;  %s5432_s1 = smov 0  }
  0x4b   :  { %s5434_s2 = smov 0   ;;  %s5436_s7 = smov 0  }
  0x4c   :  { %6174 = sst [smem:[#allocation65_spill]] %s5434_s2 }
  0x4d LB: > { %s6176_s2 = sld [smem:[#allocation65_spill]]  ;;  %s5451_s0 = sadd.s32 4294967295, %s5176_s7   ;;  %s5176_s7 = sphi %s5436_s7, %s6244_s7   ;;  %s5168_s1 = sphi %s5432_s1, %s6248_s1   ;;  %s5164_s28 = sphi %s5430_s28, %s6247_s28  }
  0x4e   : > { %6177 = sst [smem:[#allocation65_spill]] %s5164_s28  ;;  %s3804_s10 = sadd.s32 4294967294, %s5176_s7  }
  0x4f   : > { %6179 = sst [smem:[#allocation67_spill]] %s5176_s7  ;;  %s5455_s11 = sadd.s32 1, %s5176_s7  }
  0x50   : > { %6180 = sst [smem:[#allocation68_spill]] %s5455_s11  ;;  %s860_s16 = ssub.s32 %s5176_s7, %s5455_s11 }
  0x51   : > { %p861_p1 = scmp.eq.s32.totalorder %s860_s16, 0  ;;  %p874_p2 = scmp.eq.s32.totalorder %s5451_s0, 1 }
  0x52   : > { %p879_p3 = scmp.ne.s32.totalorder %s5168_s1, %s5164_s28  ;;  %p880_p4 = scmp.eq.s32.totalorder %s3804_s10, 1 }
  0x53   : > { %6178 = sst [smem:[#allocation66_spill]] %s6176_s2  ;;  %s863_s15 = sadd.s32 1, %s6176_s2 }
  0x54   : > { %p873_p0 = scmp.ne.s32.totalorder %s6176_s2, %s5168_s1  ;;  %p5472_p6 = por %p880_p4, %p879_p3 }
  0x55   : > { %s5466_s18 = scalar_select %p861_p1, %s6176_s2, %s863_s15  }
  0x56   : > { %p5468_p5 = por %p874_p2, %p873_p0  ;;  %p3805_p7 = scmp.ge.s32.totalorder %s5176_s7, 1 }
  0x57   : > { %6181 = sst [smem:[#allocation69_spill]] %s5466_s18  ;;  %p887_p8 = scmp.lt.s32.totalorder %s5176_s7, 3 }
  0x58   : > { %s6182_s22 = scalar_select %p5468_p5, 1, 0 }
  0x59   : > { %s6183_s23 = scalar_select %p5472_p6, 1, 0 }
  0x5a   : > { %p6134_p9 = scmp.eq.s32.totalorder %s5451_s0, 0  ;;  %p5479_p10 = pnand %p3805_p7, %p887_p8 }
  0x5b   : > { %6184 = sst [smem:[#allocation70_spill]] %s6183_s23  ;;  %s5214_s16 = smov [#allocation5]  }
  0x5c   : > { %s6185_s26 = scalar_select %p5479_p10, 1, 0 }
  0x5d   : > { %s917_s10 = sshll.u32 %s5214_s16, 4  ;;  %p4335_p11 = pneg %p5479_p10  ;;  %s918_s10 = int_to_ptr.vmem [resolvable:$true] %s917_s10 }
  0x5e   : > { %s5215_s15 = smov [#allocation8]   ;;  %s5216_s11 = smov [#allocation11]  }
  0x5f   : > { %s942_s18 = sshll.u32 %s5215_s15, 4  ;;  %p5487_p12 = pnand %p6134_p9, %p4335_p11  ;;  %s943_s18 = int_to_ptr.vmem [resolvable:$true] %s942_s18 }
  0x60   : > { %s970_s23 = sshll.u32 %s5216_s11, 4  ;;  %s4649_s16 = scalar_lea.vmem %s918_s10, 16  ;;  %s5491_s23 = int_to_ptr.vmem [resolvable:$true] %s970_s23 }
  0x61   : > { %p5495_p13 = pneg %p5487_p12  ;;  %p4650_p0 = scmp.ne.s32.totalorder %s918_s10, %s4649_s16 }
  0x62   : > { %s4656_s15 = scalar_lea.vmem %s918_s10, 32  ;;  %p4657_p3 = scmp.lt.s32.totalorder %s918_s10, %s918_s10 }
  0x63   : > { %p4652_p1 = pnand %p4650_p0, %p5495_p13  ;;  %p4658_p4 = scmp.lt.s32.totalorder %s4656_s15, %s4649_s16 }
  0x65   : > { %p4653_p2 = pneg %p4652_p1  ;;  %p4659_p7 = por %p4658_p4, %p4657_p3 }
  0x67   : > { %p4660_p8 = pnand %p4659_p7, %p4653_p2 }
  0x69   : > { %4663 = shalt.err (!%p4660_p8)
}
  0x6a   : > { %4341 = dma.hbm_to_vmem [thread:$0]  (!%p5487_p12), %s5268_s21, 16, %s918_s10, [#allocation6]  }
  0x6b   : > { %s4675_s11 = scalar_lea.vmem %s943_s18, 16  ;;  %s4682_s7 = scalar_lea.vmem %s943_s18, 32 }
  0x6c   : > { %p4676_p11 = scmp.ne.s32.totalorder %s943_s18, %s4675_s11  ;;  %p4683_p5 = scmp.lt.s32.totalorder %s943_s18, %s943_s18 }
  0x6d   : > { %p4684_p0 = scmp.lt.s32.totalorder %s4682_s7, %s4675_s11 }
  0x6e   : > { %p4678_p9 = pnand %p4676_p11, %p5495_p13 }
  0x6f   : > { %p4685_p1 = por %p4684_p0, %p4683_p5 }
  0x70   : > { %p4679_p6 = pneg %p4678_p9 }
  0x72   : > { %p4686_p10 = pnand %p4685_p1, %p4679_p6 }
  0x74   : > { %4689 = shalt.err (!%p4686_p10)
}
  0x75   : > { %s6188_s3 = sld [smem:[#allocation44_spill]]  ;;  %s4701_s10 = scalar_lea.vmem %s5491_s23, 16 }
  0x76   : > { %p4702_p2 = scmp.ne.s32.totalorder %s5491_s23, %s4701_s10  ;;  %s4708_s16 = scalar_lea.vmem %s5491_s23, 32 }
  0x77   : > { %p4709_p4 = scmp.lt.s32.totalorder %s5491_s23, %s5491_s23  ;;  %p4710_p5 = scmp.lt.s32.totalorder %s4708_s16, %s4701_s10 }
  0x78   : > { %p4704_p3 = pnand %p4702_p2, %p5495_p13 }
  0x79   : > { %p4711_p6 = por %p4710_p5, %p4709_p4 }
  0x7a   : > { %p4705_p9 = pneg %p4704_p3 }
  0x7b   : > { %4347 = dma.hbm_to_vmem [thread:$0]  (!%p5487_p12), %s6188_s3, 16, %s943_s18, [#allocation9]  }
  0x7c   : > { %p4712_p10 = pnand %p4711_p6, %p4705_p9 }
  0x7e   : > { %4715 = shalt.err (!%p4712_p10)
}
  0x7f   : > { %4353 = dma.hbm_to_vmem [thread:$0]  (!%p5487_p12), %s5303_s24, 16, %s5491_s23, [#allocation12]  }
  0x80   : > { %s5217_s7 = smov [#allocation14]   ;;  %s5218_s15 = smov [#allocation17]  }
  0x81   : > { %s995_s18 = sshll.u32 %s5217_s7, 4  ;;  %s1020_s11 = sshll.u32 %s5218_s15, 4  ;;  %s996_s18 = int_to_ptr.vmem [resolvable:$true] %s995_s18  ;;  %s1021_s11 = int_to_ptr.vmem [resolvable:$true] %s1020_s11 }
  0x82   : > { %s4727_s3 = scalar_lea.vmem %s996_s18, 16  ;;  %s4734_s10 = scalar_lea.vmem %s996_s18, 32 }
  0x83   : > { %p4728_p7 = scmp.ne.s32.totalorder %s996_s18, %s4727_s3  ;;  %p4735_p0 = scmp.lt.s32.totalorder %s996_s18, %s996_s18 }
  0x84   : > { %p4736_p1 = scmp.lt.s32.totalorder %s4734_s10, %s4727_s3 }
  0x85   : > { %p4730_p8 = pnand %p4728_p7, %p5495_p13 }
  0x86   : > { %p4737_p2 = por %p4736_p1, %p4735_p0 }
  0x87   : > { %p4731_p11 = pneg %p4730_p8 }
  0x89   : > { %p4738_p3 = pnand %p4737_p2, %p4731_p11 }
  0x8b   : > { %4741 = shalt.err (!%p4738_p3)
}
  0x8c   : > { %4359 = dma.hbm_to_vmem [thread:$0]  (!%p5487_p12), %s5318_s12, 16, %s996_s18, [#allocation15]  }
  0x8d   : > { %s4753_s23 = scalar_lea.vmem %s1021_s11, 16  ;;  %s4760_s16 = scalar_lea.vmem %s1021_s11, 32 }
  0x8e   : > { %p4754_p9 = scmp.ne.s32.totalorder %s1021_s11, %s4753_s23  ;;  %p4761_p6 = scmp.lt.s32.totalorder %s1021_s11, %s1021_s11 }
  0x8f   : > { %p4762_p10 = scmp.lt.s32.totalorder %s4760_s16, %s4753_s23 }
  0x90   : > { %p4756_p4 = pnand %p4754_p9, %p5495_p13 }
  0x91   : > { %p4763_p7 = por %p4762_p10, %p4761_p6 }
  0x92   : > { %p4757_p5 = pneg %p4756_p4 }
  0x94   : > { %p4764_p8 = pnand %p4763_p7, %p4757_p5 }
  0x96   : > { %4767 = shalt.err (!%p4764_p8)
}
  0x97   : > { %s6189_s4 = sld [smem:[#allocation50_spill]]  ;;  %s5219_s3 = smov [#allocation20]  }
  0x98   : > { %s1056_s7 = sshll.u32 %s5219_s3, 4  ;;  %s1057_s7 = int_to_ptr.vmem [resolvable:$true] %s1056_s7 }
  0x99   : > { %s4779_s18 = scalar_lea.vmem %s1057_s7, 256  ;;  %p4787_p2 = scmp.lt.s32.totalorder %s1057_s7, %s1057_s7 }
  0x9a   : > { %p4780_p11 = scmp.ne.s32.totalorder %s1057_s7, %s4779_s18  ;;  %p4788_p3 = scmp.lt.s32.totalorder %s4779_s18, %s4779_s18 }
  0x9c   : > { %p4782_p0 = pnand %p4780_p11, %p5495_p13  ;;  %p4789_p9 = por %p4788_p3, %p4787_p2 }
  0x9d   : > { %4365 = dma.hbm_to_vmem [thread:$0]  (!%p5487_p12), %s6189_s4, 16, %s1021_s11, [#allocation18]  }
  0x9e   : > { %p4783_p1 = pneg %p4782_p0 }
  0xa0   : > { %p4790_p4 = pnand %p4789_p9, %p4783_p1 }
  0xa2   : > { %4793 = shalt.err (!%p4790_p4)
}
  0xa3   : > { %s6138_s15 = smov 64   ;;  %s5221_s10 = smov 4  }
  0xa4   : > { %4371 = dma.hbm_to_vmem [thread:$0]  (!%p5487_p12), %s5368_s27, 256, %s1057_s7, [#allocation21], %s6138_s15, %s6138_s15, %s5221_s10  }
  0xa5   : > { %s5222_s11 = smov [#allocation23]   ;;  %s5223_s16 = smov [#allocation26]  }
  0xa6   : > { %s1080_s23 = sshll.u32 %s5222_s11, 4  ;;  %s1108_s3 = sshll.u32 %s5223_s16, 4  ;;  %s1081_s23 = int_to_ptr.vmem [resolvable:$true] %s1080_s23  ;;  %s1109_s3 = int_to_ptr.vmem [resolvable:$true] %s1108_s3 }
  0xa7   : > { %s4805_s18 = scalar_lea.vmem %s1081_s23, 256  ;;  %p4813_p7 = scmp.lt.s32.totalorder %s1081_s23, %s1081_s23 }
  0xa8   : > { %p4806_p5 = scmp.ne.s32.totalorder %s1081_s23, %s4805_s18  ;;  %p4814_p8 = scmp.lt.s32.totalorder %s4805_s18, %s4805_s18 }
  0xaa   : > { %p4808_p6 = pnand %p4806_p5, %p5495_p13  ;;  %p4815_p11 = por %p4814_p8, %p4813_p7 }
  0xac   : > { %p4809_p10 = pneg %p4808_p6 }
  0xae   : > { %p4816_p0 = pnand %p4815_p11, %p4809_p10 }
  0xb0   : > { %4819 = shalt.err (!%p4816_p0)
}
  0xb1   : > { %4377 = dma.hbm_to_vmem [thread:$0]  (!%p5487_p12), %s5378_s30, 256, %s1081_s23, [#allocation24], %s6138_s15, %s6138_s15, %s5221_s10  }
  0xb2   : > { %s4831_s7 = scalar_lea.vmem %s1109_s3, 16  ;;  %s4838_s11 = scalar_lea.vmem %s1109_s3, 32 }
  0xb3   : > { %p4832_p1 = scmp.ne.s32.totalorder %s1109_s3, %s4831_s7  ;;  %p4839_p9 = scmp.lt.s32.totalorder %s1109_s3, %s1109_s3 }
  0xb4   : > { %p4840_p4 = scmp.lt.s32.totalorder %s4838_s11, %s4831_s7 }
  0xb5   : > { %p4834_p2 = pnand %p4832_p1, %p5495_p13 }
  0xb6   : > { %p4841_p5 = por %p4840_p4, %p4839_p9 }
  0xb7   : > { %p4835_p3 = pneg %p4834_p2 }
  0xb9   : > { %p4842_p6 = pnand %p4841_p5, %p4835_p3 }
  0xbb   : > { %4845 = shalt.err (!%p4842_p6)
}
  0xbc   : > { %s6190_s5 = sld [smem:[#allocation60_spill]]  ;;  %s5224_s16 = smov [#allocation2]  }
  0xbd   : > { %s906_s18 = sshll.u32 %s5224_s16, 4  ;;  %s5225_s4 = smov [#allocation7]   ;;  %s907_s18 = int_to_ptr.vmem [resolvable:$true] %s906_s18 }
  0xbe   : > { %s928_s23 = sshll.u32 %s5225_s4, 4  ;;  %s4857_s15 = scalar_lea.vmem %s907_s18, 16  ;;  %s929_s23 = int_to_ptr.vmem [resolvable:$true] %s928_s23 }
  0xbf   : > { %p4858_p10 = scmp.ne.s32.totalorder %s907_s18, %s4857_s15  ;;  %s4864_s7 = scalar_lea.vmem %s907_s18, 32 }
  0xc0   : > { %p4865_p11 = scmp.lt.s32.totalorder %s907_s18, %s907_s18  ;;  %p4866_p0 = scmp.lt.s32.totalorder %s4864_s7, %s4857_s15 }
  0xc1   : > { %p4860_p7 = pnand %p4858_p10, %p5495_p13 }
  0xc2   : > { %4383 = dma.hbm_to_vmem [thread:$0]  (!%p5487_p12), %s6190_s5, 16, %s1109_s3, [#allocation27]  }
  0xc3   : > { %p4861_p8 = pneg %p4860_p7  ;;  %p4867_p1 = por %p4866_p0, %p4865_p11 }
  0xc5   : > { %p4868_p2 = pnand %p4867_p1, %p4861_p8 }
  0xc7   : > { %4871 = shalt.err (!%p4868_p2)
}
  0xc8   : > { %4338 = dma.hbm_to_vmem [thread:$0]  (!%p5487_p12), %s5263_s17, 16, %s907_s18, [#allocation3]  }
  0xc9   : > { %s4883_s3 = scalar_lea.vmem %s929_s23, 16  ;;  %s4890_s4 = scalar_lea.vmem %s929_s23, 32 }
  0xca   : > { %p4884_p3 = scmp.ne.s32.totalorder %s929_s23, %s4883_s3  ;;  %p4891_p5 = scmp.lt.s32.totalorder %s929_s23, %s929_s23 }
  0xcb   : > { %p4892_p6 = scmp.lt.s32.totalorder %s4890_s4, %s4883_s3 }
  0xcc   : > { %p4886_p9 = pnand %p4884_p3, %p5495_p13 }
  0xcd   : > { %p4893_p10 = por %p4892_p6, %p4891_p5 }
  0xce   : > { %p4887_p4 = pneg %p4886_p9 }
  0xd0   : > { %p4894_p7 = pnand %p4893_p10, %p4887_p4 }
  0xd2   : > { %4897 = shalt.err (!%p4894_p7)
}
  0xd3   : > { %4344 = dma.hbm_to_vmem [thread:$0]  (!%p5487_p12), %s5273_s25, 16, %s929_s23, [#allocation6]  }
  0xd4   : > { %s5226_s15 = smov [#allocation10]   ;;  %s5227_s16 = smov [#allocation13]  }
  0xd5   : > { %s956_s11 = sshll.u32 %s5226_s15, 4  ;;  %s984_s18 = sshll.u32 %s5227_s16, 4  ;;  %s957_s11 = int_to_ptr.vmem [resolvable:$true] %s956_s11  ;;  %s985_s18 = int_to_ptr.vmem [resolvable:$true] %s984_s18 }
  0xd6   : > { %s4909_s7 = scalar_lea.vmem %s957_s11, 16  ;;  %s4916_s3 = scalar_lea.vmem %s957_s11, 32 }
  0xd7   : > { %p4910_p8 = scmp.ne.s32.totalorder %s957_s11, %s4909_s7  ;;  %p4917_p1 = scmp.lt.s32.totalorder %s957_s11, %s957_s11 }
  0xd8   : > { %p4918_p2 = scmp.lt.s32.totalorder %s4916_s3, %s4909_s7 }
  0xd9   : > { %p4912_p11 = pnand %p4910_p8, %p5495_p13 }
  0xda   : > { %p4919_p3 = por %p4918_p2, %p4917_p1 }
  0xdb   : > { %p4913_p0 = pneg %p4912_p11 }
  0xdd   : > { %p4920_p9 = pnand %p4919_p3, %p4913_p0 }
  0xdf   : > { %4923 = shalt.err (!%p4920_p9)
}
  0xe0   : > { %4350 = dma.hbm_to_vmem [thread:$0]  (!%p5487_p12), %s5293_s14, 16, %s957_s11, [#allocation9]  }
  0xe1   : > { %s4935_s23 = scalar_lea.vmem %s985_s18, 16  ;;  %s4942_s4 = scalar_lea.vmem %s985_s18, 32 }
  0xe2   : > { %p4936_p4 = scmp.ne.s32.totalorder %s985_s18, %s4935_s23  ;;  %p4943_p10 = scmp.lt.s32.totalorder %s985_s18, %s985_s18 }
  0xe3   : > { %p4944_p7 = scmp.lt.s32.totalorder %s4942_s4, %s4935_s23 }
  0xe4   : > { %p4938_p5 = pnand %p4936_p4, %p5495_p13 }
  0xe5   : > { %p4945_p8 = por %p4944_p7, %p4943_p10 }
  0xe6   : > { %p4939_p6 = pneg %p4938_p5 }
  0xe8   : > { %p4946_p11 = pnand %p4945_p8, %p4939_p6 }
  0xea   : > { %4949 = shalt.err (!%p4946_p11)
}
  0xeb   : > { %s6191_s6 = sld [smem:[#allocation48_spill]]  ;;  %s5228_s15 = smov [#allocation16]  }
  0xec   : > { %s1006_s16 = sshll.u32 %s5228_s15, 4  ;;  %s5229_s7 = smov [#allocation19]   ;;  %s1007_s16 = int_to_ptr.vmem [resolvable:$true] %s1006_s16 }
  0xed   : > { %s1046_s11 = sshll.u32 %s5229_s7, 4  ;;  %s4961_s3 = scalar_lea.vmem %s1007_s16, 16  ;;  %s1047_s11 = int_to_ptr.vmem [resolvable:$true] %s1046_s11 }
  0xee   : > { %p4962_p0 = scmp.ne.s32.totalorder %s1007_s16, %s4961_s3  ;;  %s4968_s23 = scalar_lea.vmem %s1007_s16, 32 }
  0xef   : > { %p4969_p3 = scmp.lt.s32.totalorder %s1007_s16, %s1007_s16  ;;  %p4970_p9 = scmp.lt.s32.totalorder %s4968_s23, %s4961_s3 }
  0xf0   : > { %p4964_p1 = pnand %p4962_p0, %p5495_p13 }
  0xf1   : > { %4356 = dma.hbm_to_vmem [thread:$0]  (!%p5487_p12), %s6191_s6, 16, %s985_s18, [#allocation12]  }
  0xf2   : > { %p4965_p2 = pneg %p4964_p1  ;;  %p4971_p4 = por %p4970_p9, %p4969_p3 }
  0xf4   : > { %p4972_p5 = pnand %p4971_p4, %p4965_p2 }
  0xf6   : > { %4975 = shalt.err (!%p4972_p5)
}
  0xf7   : > { %4362 = dma.hbm_to_vmem [thread:$0]  (!%p5487_p12), %s5323_s20, 16, %s1007_s16, [#allocation15]  }
  0xf8   : > { %s4987_s18 = scalar_lea.vmem %s1047_s11, 16  ;;  %s4994_s4 = scalar_lea.vmem %s1047_s11, 32 }
  0xf9   : > { %p4988_p6 = scmp.ne.s32.totalorder %s1047_s11, %s4987_s18  ;;  %p4995_p8 = scmp.lt.s32.totalorder %s1047_s11, %s1047_s11 }
  0xfa   : > { %p4996_p11 = scmp.lt.s32.totalorder %s4994_s4, %s4987_s18 }
  0xfb   : > { %p4990_p10 = pnand %p4988_p6, %p5495_p13 }
  0xfc   : > { %p4997_p0 = por %p4996_p11, %p4995_p8 }
  0xfd   : > { %p4991_p7 = pneg %p4990_p10 }
  0xff   : > { %p4998_p1 = pnand %p4997_p0, %p4991_p7 }
 0x101   : > { %5001 = shalt.err (!%p4998_p1)
}
 0x102   : > { %s6192_s9 = sld [smem:[#allocation56_spill]]  ;;  %s5230_s15 = smov [#allocation22]  }
 0x103   : > { %s1070_s7 = sshll.u32 %s5230_s15, 4  ;;  %s5231_s3 = smov [#allocation25]   ;;  %s1071_s7 = int_to_ptr.vmem [resolvable:$true] %s1070_s7 }
 0x104   : > { %s1094_s16 = sshll.u32 %s5231_s3, 4  ;;  %s5013_s23 = scalar_lea.vmem %s1071_s7, 16  ;;  %s1095_s16 = int_to_ptr.vmem [resolvable:$true] %s1094_s16 }
 0x105   : > { %p5014_p2 = scmp.ne.s32.totalorder %s1071_s7, %s5013_s23  ;;  %s5020_s18 = scalar_lea.vmem %s1071_s7, 32 }
 0x106   : > { %p5021_p4 = scmp.lt.s32.totalorder %s1071_s7, %s1071_s7  ;;  %p5022_p5 = scmp.lt.s32.totalorder %s5020_s18, %s5013_s23 }
 0x107   : > { %p5016_p3 = pnand %p5014_p2, %p5495_p13 }
 0x108   : > { %4368 = dma.hbm_to_vmem [thread:$0]  (!%p5487_p12), %s6192_s9, 16, %s1047_s11, [#allocation18]  }
 0x109   : > { %p5017_p9 = pneg %p5016_p3  ;;  %p5023_p6 = por %p5022_p5, %p5021_p4 }
 0x10b   : > { %p5024_p10 = pnand %p5023_p6, %p5017_p9 }
 0x10d   : > { %5027 = shalt.err (!%p5024_p10)
}
 0x10e   : > { %s6193_s11 = sld [smem:[#allocation57_spill]]  ;;  %s5039_s4 = scalar_lea.vmem %s1095_s16, 16 }
 0x10f   : > { %p5040_p7 = scmp.ne.s32.totalorder %s1095_s16, %s5039_s4  ;;  %s5046_s15 = scalar_lea.vmem %s1095_s16, 32 }
 0x110   : > { %p5047_p0 = scmp.lt.s32.totalorder %s1095_s16, %s1095_s16  ;;  %p5048_p1 = scmp.lt.s32.totalorder %s5046_s15, %s5039_s4 }
 0x111   : > { %p5042_p8 = pnand %p5040_p7, %p5495_p13 }
 0x112   : > { %p5049_p2 = por %p5048_p1, %p5047_p0 }
 0x113   : > { %p5043_p11 = pneg %p5042_p8 }
 0x114   : > { %4374 = dma.hbm_to_vmem [thread:$0]  (!%p5487_p12), %s6193_s11, 16, %s1071_s7, [#allocation21]  }
 0x115   : > { %p5050_p3 = pnand %p5049_p2, %p5043_p11 }
 0x117   : > { %5053 = shalt.err (!%p5050_p3)
}
 0x118   : > { %s6194_s3 = sld [smem:[#allocation58_spill]]  ;;  %s5232_s23 = smov [#allocation28]  }
 0x119   : > { %s1130_s18 = sshll.u32 %s5232_s23, 4  ;;  %s1131_s18 = int_to_ptr.vmem [resolvable:$true] %s1130_s18 }
 0x11a   : > { %s5065_s7 = scalar_lea.vmem %s1131_s18, 256  ;;  %p5073_p6 = scmp.lt.s32.totalorder %s1131_s18, %s1131_s18 }
 0x11b   : > { %p5066_p9 = scmp.ne.s32.totalorder %s1131_s18, %s5065_s7  ;;  %p5074_p10 = scmp.lt.s32.totalorder %s5065_s7, %s5065_s7 }
 0x11d   : > { %p5068_p4 = pnand %p5066_p9, %p5495_p13  ;;  %p5075_p7 = por %p5074_p10, %p5073_p6 }
 0x11e   : > { %4380 = dma.hbm_to_vmem [thread:$0]  (!%p5487_p12), %s6194_s3, 16, %s1095_s16, [#allocation24]  }
 0x11f   : > { %p5069_p5 = pneg %p5068_p4 }
 0x121   : > { %p5076_p8 = pnand %p5075_p7, %p5069_p5 }
 0x123   : > { %5079 = shalt.err (!%p5076_p8)
}
 0x124   : > { %s6195_s11 = smov 64   ;;  %p6196_p11 = scmp.ne.s32.totalorder %s6185_s26, 0 }
 0x125   : > { %4386 = dma.hbm_to_vmem [thread:$0]  (!%p5487_p12), %s5418_s13, 256, %s1131_s18, [#allocation27], %s6195_s11, %s6195_s11, %s5221_s10  }
 0x126   : > { %1157 = sbr.rel (%p6196_p11) target bundleno = 7704 (0x1e18), region = 164  ;;  %p6197_p0 = scmp.eq.s32.totalorder (!%p6196_p11), %s5451_s0, 0 }
 0x12b   : > { %5123 = dma.done.wait (%p6197_p0), [#allocation3], 16   ;;  %p6198_p13 = pmov %p6197_p0 }
 0x12c   : > { %p6199_p1 = pmov %p6197_p0 }
 0x12d   : > { %5125 = vsyncadd (%p6198_p13), [#allocation3], 4294967280 }
 0x12e   : > { %5127 = dma.done.wait (%p6199_p1), [#allocation6], 32   ;;  %p6200_p2 = pmov %p6197_p0 }
 0x12f   : > { %p6201_p3 = pmov %p6197_p0 }
 0x130   : > { %5129 = vsyncadd (%p6200_p2), [#allocation6], 4294967264 }
 0x131   : > { %5131 = dma.done.wait (%p6201_p3), [#allocation9], 32   ;;  %p6202_p12 = pmov %p6197_p0 }
 0x132   : > { %p6203_p9 = pmov %p6197_p0 }
 0x133   : > { %5133 = vsyncadd (%p6202_p12), [#allocation9], 4294967264 }
 0x134   : > { %5135 = dma.done.wait (%p6203_p9), [#allocation12], 32   ;;  %p6204_p4 = pmov %p6197_p0 }
 0x135   : > { %p6205_p5 = pmov %p6197_p0 }
 0x136   : > { %5137 = vsyncadd (%p6204_p4), [#allocation12], 4294967264 }
 0x137   : > { %5139 = dma.done.wait (%p6205_p5), [#allocation15], 32   ;;  %p6206_p6 = pmov %p6197_p0 }
 0x138   : > { %p6207_p10 = pmov %p6197_p0 }
 0x139   : > { %5141 = vsyncadd (%p6206_p6), [#allocation15], 4294967264 }
 0x13a   : > { %5143 = dma.done.wait (%p6207_p10), [#allocation18], 32   ;;  %p6208_p7 = pmov %p6197_p0 }
 0x13b   : > { %p6209_p8 = pmov %p6197_p0 }
 0x13c   : > { %5145 = vsyncadd (%p6208_p7), [#allocation18], 4294967264 }
 0x13d   : > { %5147 = dma.done.wait (%p6209_p8), [#allocation21], 272   ;;  %p6210_p11 = pmov %p6197_p0 }
 0x13f   : > { %5149 = vsyncadd (%p6210_p11), [#allocation21], 4294967024 }
 0x140   : > { %5151 = dma.done.wait (%p6197_p0), [#allocation24], 272   ;;  %p6211_p13 = pmov %p6197_p0 }
 0x141   : > { %p6212_p1 = pmov %p6197_p0 }
 0x142   : > { %5153 = vsyncadd (%p6211_p13), [#allocation24], 4294967024 }
 0x143   : > { %5155 = dma.done.wait (%p6212_p1), [#allocation27], 272   ;;  %p6213_p2 = pmov %p6197_p0 }
 0x144   : > { %s6214_s28 = sld [smem:[#allocation42_spill]]  ;;  %v5233_v0 = vmov 0.0   ;;  %vm5234_vm0 = vmmov 0   ;;  %p1311_p3 = scmp.lt.s32.totalorder %s5451_s0, 1  ;;  %vm1359_vm1 = vcmask 523264   ;;  %vm1444_vm2 = vcmask 261120  }
 0x145   : > { %5157 = vsyncadd (%p6213_p2), [#allocation27], 4294967024  ;;  %s6216_s2 = sld [smem:[#allocation40_spill]]  ;;  %4025 = vmatprep.subr.bf16.mxu0 %v5233_v0  ;;  %4033 = vmatprep.mubr.msk.bf16.mxu0 %vm5234_vm0, %v5233_v0  ;;  %v3845_v8 = vld [vmem:[#allocation2] ss:$0 sm:$0xff]  ;;  %s6139_s18 = smov 96  }
 0x146   : > { %4037 = vmatprep.subr.bf16.mxu1 %v5233_v0  ;;  %4041 = vmatprep.mubr.msk.bf16.mxu1 %vm5234_vm0, %v5233_v0  ;;  %s1312_s10 = scalar_select %p1311_p3, %s5451_s0, 1  ;;  %v3851_v39 = vld [vmem:[#allocation5] ss:$0 sm:$0xff]  ;;  %v3852_v43 = vld [vmem:[#allocation7] ss:$0 sm:$0xff]  ;;  %vm1722_vm3 = vcmask 130048  }
 0x147   : > { %s6217_s15 = sld [smem:[#allocation43_spill]]  ;;  %v3853_v52 = vld [vmem:[#allocation8] ss:$0 sm:$0xff]  ;;  %v3861_v53 = vld [vmem:[#allocation11] ss:$0 sm:$0xff]  ;;  %p6239_p9 = scmp.ne.s32.totalorder %s6182_s22, 0 }
 0x148   : > { %s3934_s16 = sshll.u32 %s1312_s10, 4  ;;  %s6218_s3 = sld [smem:[#allocation46_spill]] }
 0x149   : > { %s6219_s23 = sld [smem:[#allocation45_spill]] }
 0x14a   : > { %s6215_s26 = smov %s6214_s28  ;;  %v4534_v1 = vld [vmem:[%s6214_s28 + $0x18] sm:$0xff]   ;;  %s6220_s7 = sld [smem:[#allocation41_spill]] }
 0x14b   : > { %4026 = vmatpush3.bf16.msra.mxu0 %v4534_v1  ;;  %v4535_v2 = vld [vmem:[%s6215_s26 + $0x10] sm:$0xff]   ;;  %v4536_v3 = vld [vmem:[%s6215_s26 + $0x8] sm:$0xff]   ;;  %s1315_s4 = scalar_lea.vmem %s6216_s2, %s3934_s16  ;;  %v4537_v4 = vld [vmem:[%s6215_s26] sm:$0xff]   ;;  %s6222_s28 = sld [smem:[#allocation47_spill]] }
 0x14c   : > { %4027 = vmatprep.subr.bf16.mxu0 %v5233_v0  ;;  %v1317_v5 = vld [vmem:[%s1315_s4] sm:$0xff]  ;;  %v1318_v6 = vld [vmem:[%s1315_s4 + $0x8] sm:$0xff]  ;;  %s6141_s2 = smov 32   ;;  %s6224_s16 = sld [smem:[#allocation49_spill]] }
 0x14d   : > { %v1327_v7 = vpack.c.bf16 %v1318_v6, %v1317_v5  ;;  %v4538_v27 = vld [vmem:[%s6217_s15 + $0x8] sm:$0xff]   ;;  %v4540_v29 = vld [vmem:[%s6217_s15] sm:$0xff]   ;;  %s6225_s4 = sld [smem:[#allocation51_spill]] }
 0x14e   : > { %v4539_v28 = vld [vmem:[%s6218_s3 + $0x8] sm:$0xff]   ;;  %4038 = vmatpush3.bf16.msra.mxu1 %v4538_v27  ;;  %v4541_v30 = vld [vmem:[%s6218_s3] sm:$0xff]   ;;  %s6236_s3 = sld [smem:[#allocation61_spill]] }
 0x14f   : > { %4028 = vmatpush3.bf16.msra.mxu0 %v4535_v2  ;;  %4039 = vmatprep.subr.bf16.mxu1 %v5233_v0  ;;  %v4542_v47 = vld [vmem:[%s6219_s23 + $0x8] sm:$0xff]   ;;  %v4543_v49 = vld [vmem:[%s6219_s23] sm:$0xff]   ;;  %s6238_s8 = sld [smem:[#allocation64_spill]] }
 0x150   : > { %4029 = vmatprep.subr.bf16.mxu0 %v5233_v0  ;;  %v3857_v5 = vld [vmem:[#allocation10] ss:$0 sm:$0xff]  ;;  %s6221_s11 = smov %s6220_s7 }
 0x151   : > { %s6223_s10 = smov %s6222_s28 }
 0x152   : > { %4040 = vmatpush3.bf16.msra.mxu1 %v4540_v29 }
 0x153   : > { %4030 = vmatpush3.bf16.msra.mxu0 %v4536_v3  ;;  %4045 = vmatprep.subr.bf16.mxu1 %v5233_v0 }
 0x154   : > { %4031 = vmatprep.subr.bf16.mxu0 %v5233_v0 }
 0x157   : > { %4032 = vmatpush3.bf16.msra.mxu0 %v4537_v4 }
 0x158   : > { %4053 = vmatprep.subr.bf16.mxu0 %v5233_v0 }
 0x15a   : > { %4034 = vmatmul.mubr.msk.bf16.vlgmr.msra.gmra.mxu0 %vm1359_vm1, %v1327_v7 }
 0x15b   : > { %4057 = vmatprep.mubr.msk.bf16.mxu0 %vm5234_vm0, %v5233_v0  ;;  %4054 = vmatpush3.bf16.msra.mxu0 %v4539_v28 }
 0x15c   : > { %4055 = vmatprep.subr.bf16.mxu0 %v5233_v0 }
 0x15f   : > { %4056 = vmatpush3.bf16.msra.mxu0 %v4541_v30 }
 0x160   : > { %4067 = vmatprep.subr.bf16.mxu0 %v5233_v0 }
 0x21a   : > { %v1397_v9 = vpop.f32.mrf.mxu0 }
 0x21b   : > { %v5657_v10 = vadd.f32 %v3845_v8, %v1397_v9 }
 0x21c   : > { %v4035_v11 = vpop.f32.mrf.mxu0 }
 0x21d   : > { %v1445_v12 = vsel %vm1444_vm2, %v5657_v10, 0.0 }
 0x21e   : > { %1446 = vadd.xlane.f32.xlu0 %v1445_v12  ;;  %v1400_v13 = vpop.f32.mrf.mxu0 }
 0x21f   : > { %v5661_v14 = vadd.f32 %v3845_v8, %v1400_v13 }
 0x220   : > { %v4036_v15 = vpop.f32.mrf.mxu0 }
 0x221   : > { %v1448_v16 = vsel %vm1444_vm2, %v5661_v14, 0.0 }
 0x222   : > { %1449 = vadd.xlane.f32.xlu0 %v1448_v16 }
 0x2a7   : > { %v1447_v17 = vpop.xlane.xlu0 %1446 }
 0x2a8   : > { %v1452_v18 = vmul.f32 0.03125, %v1447_v17 }
 0x2aa   : > { %v1454_v19 = vsub.f32 %v5657_v10, %v1452_v18  ;;  %v1442_v18 = vld [vmem:[%s6220_s7] sm:$0xff]  ;;  %s6226_s7 = sld [smem:[#allocation52_spill]] }
 0x2ab   : > { %v1450_v20 = vpop.xlane.xlu0 %1449 }
 0x2ac   : > { %v1453_v21 = vmul.f32 0.03125, %v1450_v20  ;;  %v1456_v22 = vmul.f32 %v1454_v19, %v1454_v19 }
 0x2ae   : > { %v1455_v23 = vsub.f32 %v5661_v14, %v1453_v21  ;;  %v1458_v24 = vsel %vm1444_vm2, %v1456_v22, 0.0 }
 0x2af   : > { %1459 = vadd.xlane.f32.xlu1 %v1458_v24 }
 0x2b0   : > { %v1457_v25 = vmul.f32 %v1455_v23, %v1455_v23 }
 0x2b2   : > { %v1461_v26 = vsel %vm1444_vm2, %v1457_v25, 0.0 }
 0x2b3   : > { %1462 = vadd.xlane.f32.xlu1 %v1461_v26 }
 0x338   : > { %v1460_v31 = vpop.xlane.xlu1 %1459 }
 0x339   : > { %v1464_v32 = vmul.f32 0.03125, %v1460_v31 }
 0x33b   : > { %v1466_v33 = vadd.f32 1e-05, %v1464_v32 }
 0x33c   : > { %v1463_v34 = vpop.xlane.xlu1 %1462 }
 0x33d   : > { %4566 = vrsqrt.f32 %v1466_v33  ;;  %v1465_v35 = vmul.f32 0.03125, %v1463_v34 }
 0x33f   : > { %v1467_v36 = vadd.f32 1e-05, %v1465_v35 }
 0x341   : > { %4568 = vrsqrt.f32 %v1467_v36 }
 0x34a   : > { %v4567_v37 = vpop.eup %4566 }
 0x34b   : > { %v1470_v38 = vmul.f32 %v4567_v37, %v1454_v19 }
 0x34d   : > { %v1478_v42 = vmul.f32 %v3851_v39, %v1470_v38 }
 0x34e   : > { %v4569_v40 = vpop.eup %4568 }
 0x34f   : > { %v1471_v41 = vmul.f32 %v4569_v40, %v1455_v23  ;;  %v1486_v45 = vadd.f32 %v3852_v43, %v1478_v42  ;;  %v1443_v23 = vld [vmem:[%s6221_s11 + $0x8] sm:$0xff] }
 0x351   : > { %v1479_v44 = vmul.f32 %v3851_v39, %v1471_v41 }
 0x353   : > { %v1487_v46 = vadd.f32 %v3852_v43, %v1479_v44 }
 0x355   : > { %v1488_v48 = vpack.c.bf16 %v1487_v46, %v1486_v45 }
 0x357   : > { %4042 = vmatmul.mubr.msk.bf16.vlgmr.msra.gmra.mxu1 %vm1444_vm2, %v1488_v48  ;;  %4058 = vmatmul.mubr.msk.bf16.vlgmr.msra.gmra.mxu0 %vm1444_vm2, %v1488_v48 }
 0x358   : > { %4046 = vmatpush3.bf16.msra.mxu1 %v4542_v47  ;;  %4049 = vmatprep.mubr.msk.bf16.mxu1 %vm5234_vm0, %v5233_v0 }
 0x359   : > { %4047 = vmatprep.subr.bf16.mxu1 %v5233_v0  ;;  %4069 = vmatprep.mubr.msk.bf16.mxu0 %vm5234_vm0, %v5233_v0 }
 0x35c   : > { %4048 = vmatpush3.bf16.msra.mxu1 %v4543_v49 }
 0x35d   : > { %4061 = vmatprep.subr.bf16.mxu1 %v5233_v0 }
 0x35f   : > { %4050 = vmatmul.mubr.msk.bf16.vlgmr.msra.gmra.mxu1 %vm1444_vm2, %v1488_v48 }
 0x360   : > { %4063 = vmatprep.mubr.msk.bf16.mxu1 %vm5234_vm0, %v5233_v0 }
 0x417   : > { %v1544_v50 = vpop.f32.mrf.mxu1  ;;  %v1662_v51 = vpop.f32.mrf.mxu0 }
 0x418   : > { %v1545_v58 = vadd.f32 %v3853_v52, %v1544_v50  ;;  %v1663_v59 = vadd.f32 %v3861_v53, %v1662_v51 }
 0x419   : > { %v4043_v54 = vpop.f32.mrf.mxu1  ;;  %v4059_v55 = vpop.f32.mrf.mxu0 }
 0x41b   : > { %v1547_v56 = vpop.f32.mrf.mxu1  ;;  %v1665_v57 = vpop.f32.mrf.mxu0 }
 0x41c   : > { %v1548_v60 = vadd.f32 %v3853_v52, %v1547_v56  ;;  %v1666_v61 = vadd.f32 %v3861_v53, %v1665_v57 }
 0x41d   : > { %v4044_v62 = vpop.f32.mrf.mxu1  ;;  %v4060_v63 = vpop.f32.mrf.mxu0 }
 0x41e   : > { %v1670_v1 = vpack.c.bf16 %v1548_v60, %v1545_v58  ;;  %v5690_v2 = vpack.c.bf16 %v1666_v61, %v1663_v59 }
 0x41f   : > { %v1603_v3 = vpop.f32.mrf.mxu1 }
 0x420   : > { %1795 = vrot.lane.b32.xlu0 %v1670_v1, %s6139_s18  ;;  %4068 = vmatpush3.bf16.msra.mxu0 %v5690_v2  ;;  %v1675_v4 = vsel %vm1444_vm2, %v1670_v1, 0  ;;  %v1604_v8 = vadd.f32 %v3857_v5, %v1603_v3 }
 0x421   : > { %v4051_v6 = vpop.f32.mrf.mxu1  ;;  %4062 = vmatpush3.bf16.xpose.msra.mxu1 %v1675_v4  ;;  %4079 = vmatprep.subr.bf16.mxu0 %v5233_v0 }
 0x422   : > { %4073 = vmatprep.subr.bf16.mxu1 %v5233_v0 }
 0x423   : > { %v1606_v7 = vpop.f32.mrf.mxu1 }
 0x424   : > { %v1607_v9 = vadd.f32 %v3857_v5, %v1606_v7 }
 0x425   : > { %v4052_v11 = vpop.f32.mrf.mxu1 }
 0x426   : > { %v1669_v12 = vpack.c.bf16 %v1607_v9, %v1604_v8 }
 0x428   : > { %1792 = vrot.lane.b32.xlu1 %v1669_v12, %s6139_s18  ;;  %4064 = vmatmul.mubr.msk.bf16.vlgmr.msra.gmra.mxu1 %vm1444_vm2, %v1669_v12  ;;  %v4544_v12 = vld [vmem:[%s6222_s28 + $0x18] sm:$0xff]   ;;  %s6227_s28 = sld [smem:[#allocation55_spill]] }
 0x429   : > { %4075 = vmatprep.mubr.msk.bf16.mxu1 %vm5234_vm0, %v5233_v0 }
 0x492   : > { %v1796_v13 = vpop.permute.xlu0 %1795 }
 0x493   : > { %v1801_v15 = vsel %vm1444_vm2, %v1796_v13, 0  ;;  %v4545_v13 = vld [vmem:[%s6223_s10 + $0x10] sm:$0xff]  }
 0x494   : > { %4074 = vmatpush3.bf16.xpose.msra.mxu1 %v1801_v15 }
 0x495   : > { %4085 = vmatprep.subr.bf16.mxu1 %v5233_v0 }
 0x49a   : > { %v1793_v16 = vpop.permute.xlu1 %1792 }
 0x49b   : > { %4076 = vmatmul.mubr.msk.bf16.vlgmr.msra.gmra.mxu1 %vm1444_vm2, %v1793_v16  ;;  %v4546_v16 = vld [vmem:[%s6223_s10 + $0x8] sm:$0xff]  }
 0x49c   : > { %4093 = vmatprep.mubr.msk.bf16.mxu1 %vm5234_vm0, %v5233_v0  ;;  %4086 = vmatpush3.bf16.msra.mxu1 %v4544_v12 }
 0x49d   : > { %4087 = vmatprep.subr.bf16.mxu1 %v5233_v0 }
 0x4a0   : > { %4088 = vmatpush3.bf16.msra.mxu1 %v4545_v13 }
 0x4a1   : > { %4089 = vmatprep.subr.bf16.mxu1 %v5233_v0 }
 0x4a4   : > { %4090 = vmatpush3.bf16.msra.mxu1 %v4546_v16 }
 0x4a5   : > { %4091 = vmatprep.subr.bf16.mxu1 %v5233_v0 }
 0x4e8   : > { %v1711_v17 = vpop.f32.mrf.mxu1 }
 0x4e9   : > { %v1718_v19 = vmul.f32 0.17677669, %v1711_v17 }
 0x4ea   : > { %v4065_v20 = vpop.f32.mrf.mxu1 }
 0x4eb   : > { %v1720_v21 = vadd.f32 %v1718_v19, %v1442_v18  ;;  %v4547_v20 = vld [vmem:[%s6223_s10] sm:$0xff]  }
 0x4ec   : > { %v1714_v22 = vpop.f32.mrf.mxu1  ;;  %4092 = vmatpush3.bf16.msra.mxu1 %v4547_v20 }
 0x4ed   : > { %v1719_v24 = vmul.f32 0.17677669, %v1714_v22  ;;  %v1723_v25 = vsel %vm1722_vm3, %v1720_v21, -inf  ;;  %4113 = vmatprep.subr.bf16.mxu1 %v5233_v0 }
 0x4ee   : > { %1724 = vmax.xlane.f32.xlu1 %v1723_v25  ;;  %v4066_v26 = vpop.f32.mrf.mxu1 }
 0x4ef   : > { %v1721_v27 = vadd.f32 %v1719_v24, %v1443_v23 }
 0x4f1   : > { %v1726_v28 = vsel %vm1722_vm3, %v1721_v27, -inf }
 0x4f2   : > { %1727 = vmax.xlane.f32.xlu0 %v1726_v28 }
 0x55b   : > { %v1837_v29 = vpop.f32.mrf.mxu1 }
 0x55c   : > { %v1844_v30 = vmul.f32 0.17677669, %v1837_v29 }
 0x55d   : > { %v4077_v31 = vpop.f32.mrf.mxu1 }
 0x55e   : > { %v1846_v32 = vadd.f32 %v1844_v30, %v1442_v18 }
 0x55f   : > { %v1840_v33 = vpop.f32.mrf.mxu1 }
 0x560   : > { %v1845_v34 = vmul.f32 0.17677669, %v1840_v33  ;;  %v1848_v35 = vsel %vm1722_vm3, %v1846_v32, -inf }
 0x561   : > { %1849 = vmax.xlane.f32.xlu0 %v1848_v35  ;;  %v4078_v36 = vpop.f32.mrf.mxu1 }
 0x562   : > { %v1847_v37 = vadd.f32 %v1845_v34, %v1443_v23 }
 0x564   : > { %v1851_v38 = vsel %vm1722_vm3, %v1847_v37, -inf }
 0x565   : > { %1852 = vmax.xlane.f32.xlu1 %v1851_v38 }
 0x577   : > { %v1725_v39 = vpop.xlane.xlu1 %1724 }
 0x578   : > { %v1729_v40 = vsub.f32 %v1720_v21, %v1725_v39 }
 0x57a   : > { %v1731_v41 = vmul.f32 1.442695, %v1729_v40 }
 0x57b   : > { %v1728_v42 = vpop.xlane.xlu0 %1727 }
 0x57c   : > { %4570 = vpow2.f32 %v1731_v41  ;;  %v1730_v43 = vsub.f32 %v1721_v27, %v1728_v42 }
 0x57e   : > { %v1733_v44 = vmul.f32 1.442695, %v1730_v43 }
 0x580   : > { %4572 = vpow2.f32 %v1733_v44 }
 0x589   : > { %v4571_v45 = vpop.eup %4570 }
 0x58a   : > { %v1735_v46 = vsel %vm1722_vm3, %v4571_v45, 0.0 }
 0x58b   : > { %1736 = vadd.xlane.f32.xlu0 %v1735_v46 }
 0x58d   : > { %v4573_v47 = vpop.eup %4572 }
 0x58e   : > { %v1738_v48 = vsel %vm1722_vm3, %v4573_v47, 0.0 }
 0x58f   : > { %1739 = vadd.xlane.f32.xlu1 %v1738_v48 }
 0x5ea   : > { %v1850_v49 = vpop.xlane.xlu0 %1849 }
 0x5eb   : > { %v1854_v50 = vsub.f32 %v1846_v32, %v1850_v49  ;;  %v3869_v32 = vld [vmem:[#allocation13] ss:$0 sm:$0xff] }
 0x5ed   : > { %v1856_v51 = vmul.f32 1.442695, %v1854_v50 }
 0x5ee   : > { %v1853_v52 = vpop.xlane.xlu1 %1852 }
 0x5ef   : > { %4574 = vpow2.f32 %v1856_v51  ;;  %v1855_v53 = vsub.f32 %v1847_v37, %v1853_v52  ;;  %v4548_v51 = vld [vmem:[%s6224_s16 + $0x8] sm:$0xff]   ;;  %v4549_v52 = vld [vmem:[%s6224_s16] sm:$0xff]  }
 0x5f1   : > { %v1858_v54 = vmul.f32 1.442695, %v1855_v53 }
 0x5f3   : > { %4576 = vpow2.f32 %v1858_v54 }
 0x5fc   : > { %v4575_v55 = vpop.eup %4574 }
 0x5fd   : > { %v1860_v56 = vsel %vm1722_vm3, %v4575_v55, 0.0 }
 0x5fe   : > { %1861 = vadd.xlane.f32.xlu0 %v1860_v56 }
 0x600   : > { %v4577_v57 = vpop.eup %4576 }
 0x601   : > { %v1863_v58 = vsel %vm1722_vm3, %v4577_v57, 0.0 }
 0x602   : > { %1864 = vadd.xlane.f32.xlu1 %v1863_v58 }
 0x614   : > { %v1737_v59 = vpop.xlane.xlu0 %1736  ;;  %1872 = vrot.lane.b32.xlu0 %v5690_v2, %s6139_s18  ;;  %s6228_s18 = smov %s6227_s28 }
 0x615   : > { %4578 = vrcp.f32 %v1737_v59 }
 0x618   : > { %v1740_v60 = vpop.xlane.xlu1 %1739 }
 0x619   : > { %4580 = vrcp.f32 %v1740_v60 }
 0x622   : > { %v4579_v61 = vpop.eup %4578 }
 0x623   : > { %v1743_v63 = vmul.f32 %v4579_v61, %v4571_v45  ;;  %v3875_v61 = vld [vmem:[#allocation14] ss:$0 sm:$0xff] }
 0x626   : > { %v4581_v62 = vpop.eup %4580 }
 0x627   : > { %v1744_v1 = vmul.f32 %v4581_v62, %v4573_v47 }
 0x629   : > { %v1745_v3 = vpack.c.bf16 %v1744_v1, %v1743_v63 }
 0x62b   : > { %4070 = vmatmul.mubr.msk.bf16.vlgmr.msra.gmra.mxu0 %vm1722_vm3, %v1745_v3  ;;  %v3876_v3 = vld [vmem:[#allocation16] ss:$0 sm:$0xff] }
 0x62c   : > { %4081 = vmatprep.mubr.msk.bf16.mxu0 %vm5234_vm0, %v5233_v0 }
 0x687   : > { %v1862_v4 = vpop.xlane.xlu0 %1861 }
 0x688   : > { %4582 = vrcp.f32 %v1862_v4 }
 0x68b   : > { %v1865_v5 = vpop.xlane.xlu1 %1864  ;;  %v1873_v6 = vpop.permute.xlu0 %1872 }
 0x68c   : > { %4584 = vrcp.f32 %v1865_v5  ;;  %4080 = vmatpush3.bf16.msra.mxu0 %v1873_v6 }
 0x68d   : > { %4097 = vmatprep.subr.bf16.mxu0 %v5233_v0 }
 0x695   : > { %v4583_v2 = vpop.eup %4582 }
 0x696   : > { %v1868_v8 = vmul.f32 %v4583_v2, %v4575_v55 }
 0x699   : > { %v4585_v7 = vpop.eup %4584 }
 0x69a   : > { %v1869_v9 = vmul.f32 %v4585_v7, %v4577_v57  ;;  %v4550_v7 = vld [vmem:[%s6225_s4 + $0x8] sm:$0xff]  }
 0x69c   : > { %v1870_v11 = vpack.c.bf16 %v1869_v9, %v1868_v8  ;;  %v4551_v8 = vld [vmem:[%s6225_s4] sm:$0xff]   ;;  %v3877_v9 = vld [vmem:[#allocation17] ss:$0 sm:$0xff]  ;;  %s6237_s4 = sld [smem:[#allocation62_spill]] }
 0x69e   : > { %4082 = vmatmul.mubr.msk.bf16.vlgmr.msra.gmra.mxu0 %vm1722_vm3, %v1870_v11 }
 0x69f   : > { %4101 = vmatprep.mubr.msk.bf16.mxu0 %vm5234_vm0, %v5233_v0  ;;  %4098 = vmatpush3.bf16.msra.mxu0 %v4548_v51 }
 0x6a0   : > { %4099 = vmatprep.subr.bf16.mxu0 %v5233_v0 }
 0x6a3   : > { %4100 = vmatpush3.bf16.msra.mxu0 %v4549_v52 }
 0x6a4   : > { %4105 = vmatprep.subr.bf16.mxu0 %v5233_v0 }
 0x6eb   : > { %v1784_v15 = vpop.f32.mrf.mxu0 }
 0x6ed   : > { %v4071_v17 = vpop.f32.mrf.mxu0 }
 0x6ef   : > { %v1787_v18 = vpop.f32.mrf.mxu0 }
 0x6f1   : > { %v4072_v19 = vpop.f32.mrf.mxu0 }
 0x75e   : > { %v1912_v21 = vpop.f32.mrf.mxu0 }
 0x760   : > { %v4083_v22 = vpop.f32.mrf.mxu0 }
 0x762   : > { %v1915_v23 = vpop.f32.mrf.mxu0 }
 0x763   : > { %v4519_v24 = vpack.i.bf16 %v1915_v23, %v1912_v21  ;;  %v3881_v21 = vld [vmem:[%s6226_s7] ss:$0 sm:$0xff]  ;;  %s6229_s7 = sld [smem:[#allocation53_spill]] }
 0x764   : > { %v4084_v25 = vpop.f32.mrf.mxu0 }
 0x765   : > { %4520 = vrot.lane.b32.xlu1 %v4519_v24, %s6141_s2 }
 0x769   : > { %v5801_v52 = vld [vmem:[%s6229_s7] ss:$0 sm:$0xff]  ;;  %s6231_s7 = smov 96  }
 0x7d7   : > { %v4521_v26 = vpop.permute.xlu1 %4520 }
 0x7d8   : > { %v4523_v27 = vunpack.i.h.bf16 %v4521_v26  ;;  %v4522_v28 = vunpack.i.l.bf16 %v4521_v26 }
 0x7da   : > { %v1928_v29 = vsel %vm1444_vm2, %v1787_v18, %v4523_v27  ;;  %v1927_v30 = vsel %vm1444_vm2, %v1784_v15, %v4522_v28 }
 0x7db   : > { %v1929_v31 = vpack.c.bf16 %v1928_v29, %v1927_v30 }
 0x7dd   : > { %4094 = vmatmul.mubr.msk.bf16.vlgmr.msra.gmra.mxu1 %vm1359_vm1, %v1929_v31 }
 0x7de   : > { %4117 = vmatprep.mubr.msk.bf16.mxu1 %vm5234_vm0, %v5233_v0 }
 0x89d   : > { %v1997_v33 = vpop.f32.mrf.mxu1 }
 0x89e   : > { %v1998_v34 = vadd.f32 %v3869_v32, %v1997_v33 }
 0x89f   : > { %v4095_v35 = vpop.f32.mrf.mxu1 }
 0x8a0   : > { %v5740_v36 = vadd.f32 %v1998_v34, %v5657_v10 }
 0x8a1   : > { %v2000_v37 = vpop.f32.mrf.mxu1 }
 0x8a2   : > { %v2001_v38 = vadd.f32 %v3869_v32, %v2000_v37  ;;  %v2006_v39 = vsel %vm1444_vm2, %v5740_v36, 0.0 }
 0x8a3   : > { %2007 = vadd.xlane.f32.xlu1 %v2006_v39  ;;  %v4096_v40 = vpop.f32.mrf.mxu1 }
 0x8a4   : > { %v5745_v41 = vadd.f32 %v2001_v38, %v5661_v14 }
 0x8a6   : > { %v2009_v42 = vsel %vm1444_vm2, %v5745_v41, 0.0 }
 0x8a7   : > { %2010 = vadd.xlane.f32.xlu0 %v2009_v42  ;;  %v5783_v42 = vld [vmem:[%s6227_s28 + $0x8] sm:$0xff]   ;;  %s6230_s28 = sld [smem:[#allocation54_spill]] }
 0x8a8   : > { %4114 = vmatpush3.bf16.msra.mxu1 %v5783_v42 }
 0x8a9   : > { %4115 = vmatprep.subr.bf16.mxu1 %v5233_v0 }
 0x92c   : > { %v2008_v43 = vpop.xlane.xlu1 %2007 }
 0x92d   : > { %v2012_v44 = vmul.f32 0.03125, %v2008_v43  ;;  %v5785_v43 = vld [vmem:[#allocation20 + $0x8] sm:$0xff]  }
 0x92f   : > { %v2014_v10 = vsub.f32 %v5740_v36, %v2012_v44  ;;  %v5790_v44 = vld [vmem:[%s6228_s18] sm:$0xff]  }
 0x930   : > { %v2011_v45 = vpop.xlane.xlu0 %2010  ;;  %4116 = vmatpush3.bf16.msra.mxu1 %v5790_v44 }
 0x931   : > { %v2013_v46 = vmul.f32 0.03125, %v2011_v45  ;;  %v2016_v47 = vmul.f32 %v2014_v10, %v2014_v10  ;;  %4129 = vmatprep.subr.bf16.mxu1 %v5233_v0 }
 0x933   : > { %v2015_v48 = vsub.f32 %v5745_v41, %v2013_v46  ;;  %v2018_v49 = vsel %vm1444_vm2, %v2016_v47, 0.0 }
 0x934   : > { %2019 = vadd.xlane.f32.xlu0 %v2018_v49 }
 0x935   : > { %v2017_v50 = vmul.f32 %v2015_v48, %v2015_v48 }
 0x937   : > { %v2021_v14 = vsel %vm1444_vm2, %v2017_v50, 0.0 }
 0x938   : > { %2022 = vadd.xlane.f32.xlu1 %v2021_v14 }
 0x9bd   : > { %v2020_v53 = vpop.xlane.xlu0 %2019 }
 0x9be   : > { %v2024_v54 = vmul.f32 0.03125, %v2020_v53 }
 0x9c0   : > { %v2026_v55 = vadd.f32 1e-05, %v2024_v54 }
 0x9c1   : > { %v2023_v56 = vpop.xlane.xlu1 %2022 }
 0x9c2   : > { %4586 = vrsqrt.f32 %v2026_v55  ;;  %v2025_v57 = vmul.f32 0.03125, %v2023_v56  ;;  %v5805_v56 = vld [vmem:[%s6230_s28] ss:$0 sm:$0xff]  ;;  %s6232_s28 = sld [smem:[#allocation59_spill]] }
 0x9c4   : > { %v2027_v58 = vadd.f32 1e-05, %v2025_v57 }
 0x9c6   : > { %4588 = vrsqrt.f32 %v2027_v58 }
 0x9c8   : > { %s6233_s2 = smov %s6232_s28 }
 0x9cf   : > { %v4587_v59 = vpop.eup %4586 }
 0x9d0   : > { %v2030_v60 = vmul.f32 %v4587_v59, %v2014_v10  ;;  %v5792_v10 = vld [vmem:[#allocation20] sm:$0xff]  }
 0x9d2   : > { %v2038_v1 = vmul.f32 %v3875_v61, %v2030_v60  ;;  %v5810_v60 = vld [vmem:[#allocation23 + $0x8] sm:$0xff]  }
 0x9d3   : > { %v4589_v62 = vpop.eup %4588 }
 0x9d4   : > { %v2031_v63 = vmul.f32 %v4589_v62, %v2015_v48  ;;  %v2046_v5 = vadd.f32 %v3876_v3, %v2038_v1  ;;  %v5815_v62 = vld [vmem:[#allocation23] sm:$0xff]  }
 0x9d6   : > { %v2039_v4 = vmul.f32 %v3875_v61, %v2031_v63 }
 0x9d8   : > { %v2047_v6 = vadd.f32 %v3876_v3, %v2039_v4  ;;  %v5827_v3 = vld [vmem:[#allocation19] ss:$0 sm:$0xff]  ;;  %v5829_v4 = vld [vmem:[#allocation22] ss:$0 sm:$0xff] }
 0x9da   : > { %v2048_v2 = vpack.c.bf16 %v2047_v6, %v2046_v5 }
 0x9dc   : > { %4102 = vmatmul.mubr.msk.bf16.vlgmr.msra.gmra.mxu0 %vm1444_vm2, %v2048_v2 }
 0x9dd   : > { %4109 = vmatprep.mubr.msk.bf16.mxu0 %vm5234_vm0, %v5233_v0  ;;  %4106 = vmatpush3.bf16.msra.mxu0 %v4550_v7 }
 0x9de   : > { %4107 = vmatprep.subr.bf16.mxu0 %v5233_v0 }
 0x9e1   : > { %4108 = vmatpush3.bf16.msra.mxu0 %v4551_v8 }
 0x9e2   : > { %4121 = vmatprep.subr.bf16.mxu0 %v5233_v0 }
 0xa9c   : > { %v2104_v11 = vpop.f32.mrf.mxu0 }
 0xa9d   : > { %v2105_v13 = vadd.f32 %v3877_v9, %v2104_v11 }
 0xa9e   : > { %v4103_v12 = vpop.f32.mrf.mxu0 }
 0xa9f   : > { %v2111_v18 = vmax.f32 %v2105_v13, 0.0 }
 0xaa0   : > { %v2107_v15 = vpop.f32.mrf.mxu0 }
 0xaa1   : > { %v2108_v16 = vadd.f32 %v3877_v9, %v2107_v15 }
 0xaa2   : > { %v4104_v17 = vpop.f32.mrf.mxu0 }
 0xaa3   : > { %v2112_v19 = vmax.f32 %v2108_v16, 0.0 }
 0xaa5   : > { %v2113_v20 = vpack.c.bf16 %v2112_v19, %v2111_v18 }
 0xaa7   : > { %4110 = vmatmul.mubr.msk.bf16.vlgmr.msra.gmra.mxu0 %vm1444_vm2, %v2113_v20  ;;  %v5838_v20 = vld [vmem:[#allocation25] ss:$0 sm:$0xff] }
 0xaa8   : > { %4125 = vmatprep.mubr.msk.bf16.mxu0 %vm5234_vm0, %v5233_v0  ;;  %4122 = vmatpush3.bf16.msra.mxu0 %v5785_v43 }
 0xaa9   : > { %4123 = vmatprep.subr.bf16.mxu0 %v5233_v0 }
 0xaac   : > { %4124 = vmatpush3.bf16.msra.mxu0 %v5792_v10 }
 0xaad   : > { %4137 = vmatprep.subr.bf16.mxu0 %v5233_v0 }
 0xb67   : > { %v2169_v22 = vpop.f32.mrf.mxu0 }
 0xb68   : > { %v2170_v23 = vadd.f32 %v3881_v21, %v2169_v22 }
 0xb69   : > { %v4111_v24 = vpop.f32.mrf.mxu0 }
 0xb6a   : > { %v5769_v25 = vadd.f32 %v2170_v23, %v5740_v36 }
 0xb6b   : > { %v2172_v26 = vpop.f32.mrf.mxu0 }
 0xb6c   : > { %v2173_v27 = vadd.f32 %v3881_v21, %v2172_v26  ;;  %v2216_v28 = vsel %vm1444_vm2, %v5769_v25, 0.0 }
 0xb6d   : > { %2217 = vadd.xlane.f32.xlu0 %v2216_v28  ;;  %v4112_v29 = vpop.f32.mrf.mxu0 }
 0xb6e   : > { %v5774_v30 = vadd.f32 %v2173_v27, %v5745_v41 }
 0xb70   : > { %v2219_v31 = vsel %vm1444_vm2, %v5774_v30, 0.0 }
 0xb71   : > { %2220 = vadd.xlane.f32.xlu1 %v2219_v31 }
 0xbf6   : > { %v2218_v32 = vpop.xlane.xlu0 %2217 }
 0xbf7   : > { %v2222_v33 = vmul.f32 0.03125, %v2218_v32 }
 0xbf9   : > { %v2224_v34 = vsub.f32 %v5769_v25, %v2222_v33 }
 0xbfa   : > { %v2221_v35 = vpop.xlane.xlu1 %2220 }
 0xbfb   : > { %v2223_v36 = vmul.f32 0.03125, %v2221_v35  ;;  %v2226_v37 = vmul.f32 %v2224_v34, %v2224_v34 }
 0xbfd   : > { %v2225_v38 = vsub.f32 %v5774_v30, %v2223_v36  ;;  %v2228_v39 = vsel %vm1444_vm2, %v2226_v37, 0.0 }
 0xbfe   : > { %2229 = vadd.xlane.f32.xlu0 %v2228_v39 }
 0xbff   : > { %v2227_v40 = vmul.f32 %v2225_v38, %v2225_v38 }
 0xc01   : > { %v2231_v41 = vsel %vm1444_vm2, %v2227_v40, 0.0 }
 0xc02   : > { %2232 = vadd.xlane.f32.xlu1 %v2231_v41 }
 0xc87   : > { %v2230_v45 = vpop.xlane.xlu0 %2229 }
 0xc88   : > { %v2234_v46 = vmul.f32 0.03125, %v2230_v45 }
 0xc8a   : > { %v2236_v47 = vadd.f32 1e-05, %v2234_v46 }
 0xc8b   : > { %v2233_v48 = vpop.xlane.xlu1 %2232 }
 0xc8c   : > { %4590 = vrsqrt.f32 %v2236_v47  ;;  %v2235_v49 = vmul.f32 0.03125, %v2233_v48 }
 0xc8e   : > { %v2237_v50 = vadd.f32 1e-05, %v2235_v49 }
 0xc90   : > { %4592 = vrsqrt.f32 %v2237_v50 }
 0xc99   : > { %v4591_v14 = vpop.eup %4590 }
 0xc9a   : > { %v2240_v51 = vmul.f32 %v4591_v14, %v2224_v34 }
 0xc9c   : > { %v2248_v55 = vmul.f32 %v5801_v52, %v2240_v51 }
 0xc9d   : > { %v4593_v53 = vpop.eup %4592 }
 0xc9e   : > { %v2241_v54 = vmul.f32 %v4593_v53, %v2225_v38  ;;  %v2256_v58 = vadd.f32 %v5805_v56, %v2248_v55 }
 0xca0   : > { %v2249_v57 = vmul.f32 %v5801_v52, %v2241_v54 }
 0xca2   : > { %v2257_v59 = vadd.f32 %v5805_v56, %v2249_v57 }
 0xca4   : > { %v2258_v61 = vpack.c.bf16 %v2257_v59, %v2256_v58 }
 0xca6   : > { %4118 = vmatmul.mubr.msk.bf16.vlgmr.msra.gmra.mxu1 %vm1444_vm2, %v2258_v61  ;;  %4126 = vmatmul.mubr.msk.bf16.vlgmr.msra.gmra.mxu0 %vm1444_vm2, %v2258_v61 }
 0xca7   : > { %4130 = vmatpush3.bf16.msra.mxu1 %v5810_v60  ;;  %4133 = vmatprep.mubr.msk.bf16.mxu1 %vm5234_vm0, %v5233_v0 }
 0xca8   : > { %4131 = vmatprep.subr.bf16.mxu1 %v5233_v0  ;;  %4139 = vmatprep.mubr.msk.bf16.mxu0 %vm5234_vm0, %v5233_v0 }
 0xcab   : > { %4132 = vmatpush3.bf16.msra.mxu1 %v5815_v62 }
 0xcac   : > { %4143 = vmatprep.subr.bf16.mxu1 %v5233_v0 }
 0xcae   : > { %4134 = vmatmul.mubr.msk.bf16.vlgmr.msra.gmra.mxu1 %vm1444_vm2, %v2258_v61 }
 0xcaf   : > { %4145 = vmatprep.mubr.msk.bf16.mxu1 %vm5234_vm0, %v5233_v0 }
 0xd66   : > { %v2314_v63 = vpop.f32.mrf.mxu1  ;;  %v2373_v1 = vpop.f32.mrf.mxu0 }
 0xd67   : > { %v2315_v8 = vadd.f32 %v5827_v3, %v2314_v63  ;;  %v2374_v9 = vadd.f32 %v5829_v4, %v2373_v1 }
 0xd68   : > { %v4119_v5 = vpop.f32.mrf.mxu1  ;;  %v4127_v6 = vpop.f32.mrf.mxu0 }
 0xd6a   : > { %v2317_v2 = vpop.f32.mrf.mxu1  ;;  %v2376_v7 = vpop.f32.mrf.mxu0 }
 0xd6b   : > { %v2318_v11 = vadd.f32 %v5827_v3, %v2317_v2  ;;  %v2377_v12 = vadd.f32 %v5829_v4, %v2376_v7 }
 0xd6c   : > { %v4120_v13 = vpop.f32.mrf.mxu1  ;;  %v4128_v15 = vpop.f32.mrf.mxu0 }
 0xd6d   : > { %v2440_v16 = vpack.c.bf16 %v2318_v11, %v2315_v8  ;;  %v2439_v17 = vpack.c.bf16 %v2377_v12, %v2374_v9 }
 0xd6e   : > { %v2432_v18 = vpop.f32.mrf.mxu1 }
 0xd6f   : > { %2562 = vrot.lane.b32.xlu0 %v2440_v16, %s6231_s7  ;;  %2559 = vrot.lane.b32.xlu1 %v2439_v17, %s6231_s7  ;;  %v2445_v19 = vsel %vm1444_vm2, %v2440_v16, 0  ;;  %v2433_v23 = vadd.f32 %v5838_v20, %v2432_v18 }
 0xd70   : > { %v4135_v21 = vpop.f32.mrf.mxu1  ;;  %4138 = vmatpush3.bf16.xpose.msra.mxu0 %v2445_v19 }
 0xd71   : > { %4149 = vmatprep.subr.bf16.mxu0 %v5233_v0 }
 0xd72   : > { %v2435_v22 = vpop.f32.mrf.mxu1 }
 0xd73   : > { %v2436_v24 = vadd.f32 %v5838_v20, %v2435_v22 }
 0xd74   : > { %v4136_v26 = vpop.f32.mrf.mxu1 }
 0xd75   : > { %v2513_v27 = vpack.c.bf16 %v2436_v24, %v2433_v23 }
 0xd77   : > { %4140 = vmatmul.mubr.msk.bf16.vlgmr.msra.gmra.mxu0 %vm1444_vm2, %v2439_v17  ;;  %4144 = vmatpush3.bf16.msra.mxu1 %v2513_v27 }
 0xd78   : > { %4151 = vmatprep.mubr.msk.bf16.mxu0 %vm5234_vm0, %v5233_v0  ;;  %4155 = vmatprep.subr.bf16.mxu1 %v5233_v0 }
 0xde1   : > { %v2563_v28 = vpop.permute.xlu0 %2562  ;;  %v2560_v31 = vpop.permute.xlu1 %2559 }
 0xde2   : > { %v2568_v29 = vsel %vm1444_vm2, %v2563_v28, 0 }
 0xde3   : > { %4150 = vmatpush3.bf16.xpose.msra.mxu0 %v2568_v29 }
 0xde4   : > { %4161 = vmatprep.subr.bf16.mxu0 %v5233_v0 }
 0xdea   : > { %4152 = vmatmul.mubr.msk.bf16.vlgmr.msra.gmra.mxu0 %vm1444_vm2, %v2560_v31 }
 0xdeb   : > { %4169 = vmatprep.mubr.msk.bf16.mxu0 %vm5234_vm0, %v5233_v0 }
 0xe37   : > { %v2481_v32 = vpop.f32.mrf.mxu0 }
 0xe38   : > { %v2488_v33 = vmul.f32 0.17677669, %v2481_v32 }
 0xe39   : > { %v4141_v34 = vpop.f32.mrf.mxu0 }
 0xe3a   : > { %v2490_v35 = vsel %vm1722_vm3, %v2488_v33, -inf  ;;  %v5873_v34 = vld [vmem:[%s6233_s2 + $0x10] sm:$0xff]  }
 0xe3b   : > { %2491 = vmax.xlane.f32.xlu1 %v2490_v35  ;;  %v2484_v36 = vpop.f32.mrf.mxu0 }
 0xe3c   : > { %v2489_v37 = vmul.f32 0.17677669, %v2484_v36  ;;  %v5878_v36 = vld [vmem:[%s6233_s2 + $0x8] sm:$0xff]  }
 0xe3d   : > { %v4142_v38 = vpop.f32.mrf.mxu0 }
 0xe3e   : > { %v2493_v39 = vsel %vm1722_vm3, %v2489_v37, -inf }
 0xe3f   : > { %2494 = vmax.xlane.f32.xlu0 %v2493_v39 }
 0xeaa   : > { %v2604_v40 = vpop.f32.mrf.mxu0 }
 0xeab   : > { %v2611_v41 = vmul.f32 0.17677669, %v2604_v40  ;;  %v5884_v40 = vld [vmem:[%s6233_s2] sm:$0xff]   ;;  %s6235_s2 = sld [smem:[#allocation63_spill]] }
 0xeac   : > { %v4153_v45 = vpop.f32.mrf.mxu0 }
 0xead   : > { %v2613_v46 = vsel %vm1722_vm3, %v2611_v41, -inf }
 0xeae   : > { %2614 = vmax.xlane.f32.xlu0 %v2613_v46  ;;  %v2607_v47 = vpop.f32.mrf.mxu0 }
 0xeaf   : > { %v2612_v48 = vmul.f32 0.17677669, %v2607_v47 }
 0xeb0   : > { %v4154_v49 = vpop.f32.mrf.mxu0 }
 0xeb1   : > { %v2616_v50 = vsel %vm1722_vm3, %v2612_v48, -inf }
 0xeb2   : > { %2617 = vmax.xlane.f32.xlu1 %v2616_v50 }
 0xec4   : > { %v2492_v14 = vpop.xlane.xlu1 %2491 }
 0xec5   : > { %v2496_v51 = vsub.f32 %v2488_v33, %v2492_v14  ;;  %v5869_v33 = vld [vmem:[%s6232_s28 + $0x18] sm:$0xff]   ;;  %s6234_s28 = smov 32  }
 0xec6   : > { %4162 = vmatpush3.bf16.msra.mxu0 %v5869_v33 }
 0xec7   : > { %v2498_v53 = vmul.f32 1.442695, %v2496_v51  ;;  %4163 = vmatprep.subr.bf16.mxu0 %v5233_v0 }
 0xec8   : > { %v2495_v54 = vpop.xlane.xlu0 %2494 }
 0xec9   : > { %4594 = vpow2.f32 %v2498_v53  ;;  %v2497_v55 = vsub.f32 %v2489_v37, %v2495_v54 }
 0xeca   : > { %4164 = vmatpush3.bf16.msra.mxu0 %v5873_v34 }
 0xecb   : > { %v2500_v57 = vmul.f32 1.442695, %v2497_v55  ;;  %4165 = vmatprep.subr.bf16.mxu0 %v5233_v0  ;;  %v5898_v55 = vld [vmem:[#allocation26] ss:$0 sm:$0xff] }
 0xecd   : > { %4596 = vpow2.f32 %v2500_v57 }
 0xece   : > { %4166 = vmatpush3.bf16.msra.mxu0 %v5878_v36 }
 0xecf   : > { %4167 = vmatprep.subr.bf16.mxu0 %v5233_v0 }
 0xed2   : > { %4168 = vmatpush3.bf16.msra.mxu0 %v5884_v40 }
 0xed3   : > { %4189 = vmatprep.subr.bf16.mxu0 %v5233_v0 }
 0xed6   : > { %v4595_v58 = vpop.eup %4594 }
 0xed7   : > { %v2502_v59 = vsel %vm1722_vm3, %v4595_v58, 0.0 }
 0xed8   : > { %2503 = vadd.xlane.f32.xlu0 %v2502_v59 }
 0xeda   : > { %v4597_v61 = vpop.eup %4596 }
 0xedb   : > { %v2505_v63 = vsel %vm1722_vm3, %v4597_v61, 0.0 }
 0xedc   : > { %2506 = vadd.xlane.f32.xlu1 %v2505_v63 }
 0xf37   : > { %v2615_v1 = vpop.xlane.xlu0 %2614 }
 0xf38   : > { %v2619_v5 = vsub.f32 %v2611_v41, %v2615_v1 }
 0xf3a   : > { %v2621_v6 = vmul.f32 1.442695, %v2619_v5 }
 0xf3b   : > { %v2618_v2 = vpop.xlane.xlu1 %2617 }
 0xf3c   : > { %4598 = vpow2.f32 %v2621_v6  ;;  %v2620_v7 = vsub.f32 %v2612_v48, %v2618_v2 }
 0xf3e   : > { %v2623_v8 = vmul.f32 1.442695, %v2620_v7 }
 0xf40   : > { %4600 = vpow2.f32 %v2623_v8 }
 0xf49   : > { %v4599_v9 = vpop.eup %4598 }
 0xf4a   : > { %v2625_v11 = vsel %vm1722_vm3, %v4599_v9, 0.0 }
 0xf4b   : > { %2626 = vadd.xlane.f32.xlu0 %v2625_v11 }
 0xf4d   : > { %v4601_v12 = vpop.eup %4600 }
 0xf4e   : > { %v2628_v13 = vsel %vm1722_vm3, %v4601_v12, 0.0 }
 0xf4f   : > { %2629 = vadd.xlane.f32.xlu1 %v2628_v13 }
 0xf61   : > { %2637 = vrot.lane.b32.xlu0 %v2513_v27, %s6231_s7  ;;  %v2504_v15 = vpop.xlane.xlu0 %2503 }
 0xf62   : > { %4602 = vrcp.f32 %v2504_v15 }
 0xf65   : > { %v2507_v16 = vpop.xlane.xlu1 %2506 }
 0xf66   : > { %4604 = vrcp.f32 %v2507_v16  ;;  %v5917_v16 = vld [vmem:[%s6235_s2 + $0x8] sm:$0xff]  }
 0xf6f   : > { %v4603_v17 = vpop.eup %4602 }
 0xf70   : > { %v2510_v19 = vmul.f32 %v4603_v17, %v4595_v58  ;;  %v5921_v17 = vld [vmem:[%s6235_s2] sm:$0xff]  }
 0xf73   : > { %v4605_v18 = vpop.eup %4604 }
 0xf74   : > { %v2511_v21 = vmul.f32 %v4605_v18, %v4597_v61 }
 0xf76   : > { %v2512_v22 = vpack.c.bf16 %v2511_v21, %v2510_v19 }
 0xf78   : > { %4146 = vmatmul.mubr.msk.bf16.vlgmr.msra.gmra.mxu1 %vm1722_vm3, %v2512_v22 }
 0xf79   : > { %4157 = vmatprep.mubr.msk.bf16.mxu1 %vm5234_vm0, %v5233_v0 }
 0xfd4   : > { %v2627_v23 = vpop.xlane.xlu0 %2626 }
 0xfd5   : > { %4606 = vrcp.f32 %v2627_v23 }
 0xfd8   : > { %v2638_v24 = vpop.permute.xlu0 %2637  ;;  %v2630_v26 = vpop.xlane.xlu1 %2629 }
 0xfd9   : > { %4608 = vrcp.f32 %v2630_v26  ;;  %4156 = vmatpush3.bf16.msra.mxu1 %v2638_v24 }
 0xfda   : > { %4173 = vmatprep.subr.bf16.mxu1 %v5233_v0 }
 0xfe2   : > { %v4607_v27 = vpop.eup %4606 }
 0xfe3   : > { %v2633_v29 = vmul.f32 %v4607_v27, %v4599_v9 }
 0xfe6   : > { %v4609_v28 = vpop.eup %4608 }
 0xfe7   : > { %v2634_v31 = vmul.f32 %v4609_v28, %v4601_v12  ;;  %v5927_v28 = vld [vmem:[%s6236_s3] ss:$0 sm:$0xff]  ;;  %s1308_s3 = sand.u32 1, %s5168_s1  }
 0xfe8   : > { %s6081_s6 = scalar_lea.sflag [#allocation4], %s1308_s3 }
 0xfe9   : > { %v2635_v32 = vpack.c.bf16 %v2634_v31, %v2633_v29 }
 0xfeb   : > { %4158 = vmatmul.mubr.msk.bf16.vlgmr.msra.gmra.mxu1 %vm1722_vm3, %v2635_v32 }
 0xfec   : > { %4177 = vmatprep.mubr.msk.bf16.mxu1 %vm5234_vm0, %v5233_v0  ;;  %4174 = vmatpush3.bf16.msra.mxu1 %v5917_v16 }
 0xfed   : > { %4175 = vmatprep.subr.bf16.mxu1 %v5233_v0 }
 0xff0   : > { %4176 = vmatpush3.bf16.msra.mxu1 %v5921_v17 }
 0xff1   : > { %4181 = vmatprep.subr.bf16.mxu1 %v5233_v0 }
0x1038   : > { %v2551_v35 = vpop.f32.mrf.mxu1 }
0x103a   : > { %v4147_v37 = vpop.f32.mrf.mxu1 }
0x103c   : > { %v2554_v38 = vpop.f32.mrf.mxu1 }
0x103e   : > { %v4148_v39 = vpop.f32.mrf.mxu1 }
0x10ab   : > { %v2677_v41 = vpop.f32.mrf.mxu1 }
0x10ad   : > { %v4159_v45 = vpop.f32.mrf.mxu1 }
0x10ae   : > { %v5939_v45 = vld [vmem:[#allocation28 + $0x8] sm:$0xff]  }
0x10af   : > { %v2680_v46 = vpop.f32.mrf.mxu1 }
0x10b0   : > { %v4524_v47 = vpack.i.bf16 %v2680_v46, %v2677_v41  ;;  %v5943_v46 = vld [vmem:[#allocation28] sm:$0xff]  }
0x10b1   : > { %v4160_v48 = vpop.f32.mrf.mxu1 }
0x10b2   : > { %4525 = vrot.lane.b32.xlu1 %v4524_v47, %s6234_s28  ;;  %v5948_v47 = vld [vmem:[%s6238_s8] ss:$0 sm:$0xff] }
0x1124   : > { %v4526_v49 = vpop.permute.xlu1 %4525 }
0x1125   : > { %v4528_v50 = vunpack.i.h.bf16 %v4526_v49  ;;  %v4527_v14 = vunpack.i.l.bf16 %v4526_v49 }
0x1127   : > { %v2693_v51 = vsel %vm1444_vm2, %v2554_v38, %v4528_v50  ;;  %v2692_v53 = vsel %vm1444_vm2, %v2551_v35, %v4527_v14  ;;  %v5931_v35 = vld [vmem:[%s6237_s4] ss:$0 sm:$0xff]  ;;  %s3842_s4 = sshll.u32 %s1308_s3, 4 }
0x1128   : > { %v2694_v54 = vpack.c.bf16 %v2693_v51, %v2692_v53 }
0x112a   : > { %4170 = vmatmul.mubr.msk.bf16.vlgmr.msra.gmra.mxu0 %vm1359_vm1, %v2694_v54 }
0x112b   : > { %4190 = vmatpush3.bf16.msra.mxu0 %v5783_v42  ;;  %4193 = vmatprep.mubr.msk.bf16.mxu0 %vm5234_vm0, %v5233_v0 }
0x112c   : > { %4191 = vmatprep.subr.bf16.mxu0 %v5233_v0 }
0x112f   : > { %4192 = vmatpush3.bf16.msra.mxu0 %v5790_v44 }
0x1130   : > { %4205 = vmatprep.subr.bf16.mxu0 %v5233_v0 }
0x11ea   : > { %v2762_v57 = vpop.f32.mrf.mxu0 }
0x11eb   : > { %v2763_v58 = vadd.f32 %v5898_v55, %v2762_v57 }
0x11ec   : > { %v4171_v59 = vpop.f32.mrf.mxu0 }
0x11ed   : > { %v5902_v61 = vadd.f32 %v2763_v58, %v5769_v25  ;;  %v5960_v59 = vld [vmem:[%s5423_s19] ss:$0 sm:$0xff] }
0x11ee   : > { %v2765_v63 = vpop.f32.mrf.mxu0 }
0x11ef   : > { %v2766_v42 = vadd.f32 %v5898_v55, %v2765_v63  ;;  %v2771_v1 = vsel %vm1444_vm2, %v5902_v61, 0.0 }
0x11f0   : > { %2772 = vadd.xlane.f32.xlu1 %v2771_v1  ;;  %v4172_v5 = vpop.f32.mrf.mxu0 }
0x11f1   : > { %v5908_v44 = vadd.f32 %v2766_v42, %v5774_v30 }
0x11f3   : > { %v2774_v6 = vsel %vm1444_vm2, %v5908_v44, 0.0 }
0x11f4   : > { %2775 = vadd.xlane.f32.xlu0 %v2774_v6 }
0x1279   : > { %v2773_v2 = vpop.xlane.xlu1 %2772 }
0x127a   : > { %v2777_v25 = vmul.f32 0.03125, %v2773_v2 }
0x127c   : > { %v2779_v7 = vsub.f32 %v5902_v61, %v2777_v25 }
0x127d   : > { %v2776_v8 = vpop.xlane.xlu0 %2775 }
0x127e   : > { %v2778_v9 = vmul.f32 0.03125, %v2776_v8  ;;  %v2781_v11 = vmul.f32 %v2779_v7, %v2779_v7 }
0x1280   : > { %v2780_v12 = vsub.f32 %v5908_v44, %v2778_v9  ;;  %v2783_v13 = vsel %vm1444_vm2, %v2781_v11, 0.0 }
0x1281   : > { %2784 = vadd.xlane.f32.xlu0 %v2783_v13 }
0x1282   : > { %v2782_v15 = vmul.f32 %v2780_v12, %v2780_v12 }
0x1284   : > { %v2786_v30 = vsel %vm1444_vm2, %v2782_v15, 0.0 }
0x1285   : > { %2787 = vadd.xlane.f32.xlu1 %v2786_v30 }
0x130a   : > { %v2785_v18 = vpop.xlane.xlu0 %2784 }
0x130b   : > { %v2789_v19 = vmul.f32 0.03125, %v2785_v18 }
0x130d   : > { %v2791_v21 = vadd.f32 1e-05, %v2789_v19 }
0x130e   : > { %v2788_v22 = vpop.xlane.xlu1 %2787 }
0x130f   : > { %4610 = vrsqrt.f32 %v2791_v21  ;;  %v2790_v23 = vmul.f32 0.03125, %v2788_v22 }
0x1311   : > { %v2792_v24 = vadd.f32 1e-05, %v2790_v23 }
0x1313   : > { %4612 = vrsqrt.f32 %v2792_v24 }
0x131c   : > { %v4611_v26 = vpop.eup %4610 }
0x131d   : > { %v2795_v27 = vmul.f32 %v4611_v26, %v2779_v7 }
0x131f   : > { %v2803_v32 = vmul.f32 %v5927_v28, %v2795_v27 }
0x1320   : > { %v4613_v29 = vpop.eup %4612 }
0x1321   : > { %v2796_v31 = vmul.f32 %v4613_v29, %v2780_v12  ;;  %v2811_v38 = vadd.f32 %v5931_v35, %v2803_v32 }
0x1323   : > { %v2804_v37 = vmul.f32 %v5927_v28, %v2796_v31 }
0x1325   : > { %v2812_v39 = vadd.f32 %v5931_v35, %v2804_v37 }
0x1327   : > { %v2813_v41 = vpack.c.bf16 %v2812_v39, %v2811_v38 }
0x1329   : > { %4178 = vmatmul.mubr.msk.bf16.vlgmr.msra.gmra.mxu1 %vm1444_vm2, %v2813_v41 }
0x132a   : > { %4185 = vmatprep.mubr.msk.bf16.mxu1 %vm5234_vm0, %v5233_v0  ;;  %4182 = vmatpush3.bf16.msra.mxu1 %v5939_v45 }
0x132b   : > { %4183 = vmatprep.subr.bf16.mxu1 %v5233_v0 }
0x132e   : > { %4184 = vmatpush3.bf16.msra.mxu1 %v5943_v46 }
0x132f   : > { %4197 = vmatprep.subr.bf16.mxu1 %v5233_v0 }
0x13e9   : > { %v2869_v48 = vpop.f32.mrf.mxu1 }
0x13ea   : > { %v2870_v50 = vadd.f32 %v5948_v47, %v2869_v48 }
0x13eb   : > { %v4179_v49 = vpop.f32.mrf.mxu1 }
0x13ec   : > { %v2876_v54 = vmax.f32 %v2870_v50, 0.0 }
0x13ed   : > { %v2872_v14 = vpop.f32.mrf.mxu1 }
0x13ee   : > { %v2873_v51 = vadd.f32 %v5948_v47, %v2872_v14 }
0x13ef   : > { %v4180_v53 = vpop.f32.mrf.mxu1 }
0x13f0   : > { %v2877_v57 = vmax.f32 %v2873_v51, 0.0 }
0x13f2   : > { %v2878_v58 = vpack.c.bf16 %v2877_v57, %v2876_v54 }
0x13f4   : > { %4186 = vmatmul.mubr.msk.bf16.vlgmr.msra.gmra.mxu1 %vm1444_vm2, %v2878_v58 }
0x13f5   : > { %4198 = vmatpush3.bf16.msra.mxu1 %v5785_v43  ;;  %4201 = vmatprep.mubr.msk.bf16.mxu1 %vm5234_vm0, %v5233_v0 }
0x13f6   : > { %4199 = vmatprep.subr.bf16.mxu1 %v5233_v0 }
0x13f9   : > { %4200 = vmatpush3.bf16.msra.mxu1 %v5792_v10 }
0x13fa   : > { %4213 = vmatprep.subr.bf16.mxu1 %v5233_v0 }
0x14b4   : > { %v2934_v63 = vpop.f32.mrf.mxu1 }
0x14b5   : > { %v2935_v42 = vadd.f32 %v5960_v59, %v2934_v63 }
0x14b6   : > { %v4187_v1 = vpop.f32.mrf.mxu1 }
0x14b7   : > { %v5964_v5 = vadd.f32 %v2935_v42, %v5902_v61 }
0x14b8   : > { %v2937_v6 = vpop.f32.mrf.mxu1 }
0x14b9   : > { %v2938_v43 = vadd.f32 %v5960_v59, %v2937_v6  ;;  %v2943_v2 = vsel %vm1444_vm2, %v5964_v5, 0.0 }
0x14ba   : > { %2944 = vadd.xlane.f32.xlu0 %v2943_v2  ;;  %v4188_v25 = vpop.f32.mrf.mxu1 }
0x14bb   : > { %v5970_v10 = vadd.f32 %v2938_v43, %v5908_v44 }
0x14bd   : > { %v2946_v7 = vsel %vm1444_vm2, %v5970_v10, 0.0 }
0x14be   : > { %2947 = vadd.xlane.f32.xlu1 %v2946_v7 }
0x1543   : > { %v2945_v8 = vpop.xlane.xlu0 %2944 }
0x1544   : > { %v2949_v9 = vmul.f32 0.03125, %v2945_v8 }
0x1546   : > { %v2951_v61 = vsub.f32 %v5964_v5, %v2949_v9 }
0x1547   : > { %v2948_v11 = vpop.xlane.xlu1 %2947 }
0x1548   : > { %v2950_v12 = vmul.f32 0.03125, %v2948_v11  ;;  %v2953_v13 = vmul.f32 %v2951_v61, %v2951_v61 }
0x154a   : > { %v2952_v15 = vsub.f32 %v5970_v10, %v2950_v12  ;;  %v2955_v30 = vsel %vm1444_vm2, %v2953_v13, 0.0 }
0x154b   : > { %2956 = vadd.xlane.f32.xlu0 %v2955_v30 }
0x154c   : > { %v2954_v18 = vmul.f32 %v2952_v15, %v2952_v15 }
0x154e   : > { %v2958_v44 = vsel %vm1444_vm2, %v2954_v18, 0.0 }
0x154f   : > { %2959 = vadd.xlane.f32.xlu1 %v2958_v44 }
0x15d4   : > { %v2957_v19 = vpop.xlane.xlu0 %2956 }
0x15d5   : > { %v2961_v21 = vmul.f32 0.03125, %v2957_v19 }
0x15d7   : > { %v2963_v22 = vadd.f32 1e-05, %v2961_v21 }
0x15d8   : > { %v2960_v23 = vpop.xlane.xlu1 %2959 }
0x15d9   : > { %4614 = vrsqrt.f32 %v2963_v22  ;;  %v2962_v24 = vmul.f32 0.03125, %v2960_v23 }
0x15db   : > { %v2964_v26 = vadd.f32 1e-05, %v2962_v24 }
0x15dd   : > { %4616 = vrsqrt.f32 %v2964_v26 }
0x15e6   : > { %v4615_v27 = vpop.eup %4614 }
0x15e7   : > { %v2967_v29 = vmul.f32 %v4615_v27, %v2951_v61 }
0x15e9   : > { %v2969_v37 = vmul.f32 %v5801_v52, %v2967_v29 }
0x15ea   : > { %v4617_v31 = vpop.eup %4616 }
0x15eb   : > { %v2968_v32 = vmul.f32 %v4617_v31, %v2952_v15  ;;  %v2971_v39 = vadd.f32 %v5805_v56, %v2969_v37 }
0x15ed   : > { %v2970_v38 = vmul.f32 %v5801_v52, %v2968_v32 }
0x15ef   : > { %v2972_v41 = vadd.f32 %v5805_v56, %v2970_v38 }
0x15f1   : > { %v2973_v48 = vpack.c.bf16 %v2972_v41, %v2971_v39 }
0x15f3   : > { %4194 = vmatmul.mubr.msk.bf16.vlgmr.msra.gmra.mxu0 %vm1444_vm2, %v2973_v48  ;;  %4202 = vmatmul.mubr.msk.bf16.vlgmr.msra.gmra.mxu1 %vm1444_vm2, %v2973_v48 }
0x15f4   : > { %4206 = vmatpush3.bf16.msra.mxu0 %v5810_v60  ;;  %4209 = vmatprep.mubr.msk.bf16.mxu0 %vm5234_vm0, %v5233_v0 }
0x15f5   : > { %4207 = vmatprep.subr.bf16.mxu0 %v5233_v0  ;;  %4215 = vmatprep.mubr.msk.bf16.mxu1 %vm5234_vm0, %v5233_v0 }
0x15f8   : > { %4208 = vmatpush3.bf16.msra.mxu0 %v5815_v62 }
0x15f9   : > { %4219 = vmatprep.subr.bf16.mxu0 %v5233_v0 }
0x15fb   : > { %4210 = vmatmul.mubr.msk.bf16.vlgmr.msra.gmra.mxu0 %vm1444_vm2, %v2973_v48 }
0x15fc   : > { %4221 = vmatprep.mubr.msk.bf16.mxu0 %vm5234_vm0, %v5233_v0 }
0x16b3   : > { %v3011_v52 = vpop.f32.mrf.mxu0  ;;  %v3052_v56 = vpop.f32.mrf.mxu1 }
0x16b4   : > { %v3012_v51 = vadd.f32 %v5827_v3, %v3011_v52  ;;  %v3053_v53 = vadd.f32 %v5829_v4, %v3052_v56 }
0x16b5   : > { %v4195_v60 = vpop.f32.mrf.mxu0  ;;  %v4203_v49 = vpop.f32.mrf.mxu1 }
0x16b7   : > { %v3014_v50 = vpop.f32.mrf.mxu0  ;;  %v3055_v14 = vpop.f32.mrf.mxu1 }
0x16b8   : > { %v3015_v54 = vadd.f32 %v5827_v3, %v3014_v50  ;;  %v3056_v62 = vadd.f32 %v5829_v4, %v3055_v14 }
0x16b9   : > { %v4196_v57 = vpop.f32.mrf.mxu0  ;;  %v4204_v58 = vpop.f32.mrf.mxu1 }
0x16ba   : > { %v3101_v63 = vpack.c.bf16 %v3015_v54, %v3012_v51  ;;  %v3100_v42 = vpack.c.bf16 %v3056_v62, %v3053_v53 }
0x16bb   : > { %v3093_v1 = vpop.f32.mrf.mxu0 }
0x16bc   : > { %3220 = vrot.lane.b32.xlu1 %v3100_v42, %s6231_s7  ;;  %3223 = vrot.lane.b32.xlu0 %v3101_v63, %s6231_s7  ;;  %v3106_v6 = vsel %vm1444_vm2, %v3101_v63, 0  ;;  %v3094_v3 = vadd.f32 %v5838_v20, %v3093_v1 }
0x16bd   : > { %v4211_v43 = vpop.f32.mrf.mxu0  ;;  %4214 = vmatpush3.bf16.xpose.msra.mxu1 %v3106_v6 }
0x16be   : > { %4225 = vmatprep.subr.bf16.mxu1 %v5233_v0 }
0x16bf   : > { %v3096_v2 = vpop.f32.mrf.mxu0 }
0x16c0   : > { %v3097_v4 = vadd.f32 %v5838_v20, %v3096_v2 }
0x16c1   : > { %v4212_v25 = vpop.f32.mrf.mxu0 }
0x16c2   : > { %v6005_v7 = vpack.c.bf16 %v3097_v4, %v3094_v3 }
0x16c4   : > { %4216 = vmatmul.mubr.msk.bf16.vlgmr.msra.gmra.mxu1 %vm1444_vm2, %v3100_v42  ;;  %4220 = vmatpush3.bf16.msra.mxu0 %v6005_v7 }
0x16c5   : > { %4227 = vmatprep.mubr.msk.bf16.mxu1 %vm5234_vm0, %v5233_v0  ;;  %4231 = vmatprep.subr.bf16.mxu0 %v5233_v0 }
0x172e   : > { %v3224_v8 = vpop.permute.xlu0 %3223  ;;  %v3221_v61 = vpop.permute.xlu1 %3220 }
0x172f   : > { %v3229_v9 = vsel %vm1444_vm2, %v3224_v8, 0 }
0x1730   : > { %4226 = vmatpush3.bf16.xpose.msra.mxu1 %v3229_v9 }
0x1731   : > { %4237 = vmatprep.subr.bf16.mxu1 %v5233_v0 }
0x1737   : > { %4228 = vmatmul.mubr.msk.bf16.vlgmr.msra.gmra.mxu1 %vm1444_vm2, %v3221_v61 }
0x1738   : > { %4238 = vmatpush3.bf16.msra.mxu1 %v5869_v33  ;;  %4245 = vmatprep.mubr.msk.bf16.mxu1 %vm5234_vm0, %v5233_v0 }
0x1739   : > { %4239 = vmatprep.subr.bf16.mxu1 %v5233_v0 }
0x173c   : > { %4240 = vmatpush3.bf16.msra.mxu1 %v5873_v34 }
0x173d   : > { %4241 = vmatprep.subr.bf16.mxu1 %v5233_v0 }
0x1740   : > { %4242 = vmatpush3.bf16.msra.mxu1 %v5878_v36 }
0x1741   : > { %4243 = vmatprep.subr.bf16.mxu1 %v5233_v0 }
0x1744   : > { %4244 = vmatpush3.bf16.msra.mxu1 %v5884_v40 }
0x1784   : > { %v3142_v20 = vpop.f32.mrf.mxu1 }
0x1785   : > { %v3149_v11 = vmul.f32 0.17677669, %v3142_v20 }
0x1786   : > { %v4217_v12 = vpop.f32.mrf.mxu1 }
0x1787   : > { %v3151_v33 = vsel %vm1722_vm3, %v3149_v11, -inf }
0x1788   : > { %3152 = vmax.xlane.f32.xlu1 %v3151_v33  ;;  %v3145_v13 = vpop.f32.mrf.mxu1 }
0x1789   : > { %v3150_v15 = vmul.f32 0.17677669, %v3145_v13 }
0x178a   : > { %v4218_v30 = vpop.f32.mrf.mxu1 }
0x178b   : > { %v3154_v18 = vsel %vm1722_vm3, %v3150_v15, -inf }
0x178c   : > { %3155 = vmax.xlane.f32.xlu0 %v3154_v18 }
0x17f7   : > { %v3265_v34 = vpop.f32.mrf.mxu1 }
0x17f8   : > { %v3272_v44 = vmul.f32 0.17677669, %v3265_v34 }
0x17f9   : > { %v4229_v19 = vpop.f32.mrf.mxu1 }
0x17fa   : > { %v3274_v36 = vsel %vm1722_vm3, %v3272_v44, -inf }
0x17fb   : > { %3275 = vmax.xlane.f32.xlu0 %v3274_v36  ;;  %v3268_v21 = vpop.f32.mrf.mxu1 }
0x17fc   : > { %v3273_v40 = vmul.f32 0.17677669, %v3268_v21 }
0x17fd   : > { %v4230_v22 = vpop.f32.mrf.mxu1 }
0x17fe   : > { %v3277_v23 = vsel %vm1722_vm3, %v3273_v40, -inf }
0x17ff   : > { %3278 = vmax.xlane.f32.xlu1 %v3277_v23 }
0x1811   : > { %v3153_v24 = vpop.xlane.xlu1 %3152 }
0x1812   : > { %v3157_v26 = vsub.f32 %v3149_v11, %v3153_v24 }
0x1814   : > { %v3159_v27 = vmul.f32 1.442695, %v3157_v26 }
0x1815   : > { %v3156_v29 = vpop.xlane.xlu0 %3155 }
0x1816   : > { %4618 = vpow2.f32 %v3159_v27  ;;  %v3158_v31 = vsub.f32 %v3150_v15, %v3156_v29 }
0x1818   : > { %v3161_v32 = vmul.f32 1.442695, %v3158_v31 }
0x181a   : > { %4620 = vpow2.f32 %v3161_v32 }
0x1823   : > { %v4619_v37 = vpop.eup %4618 }
0x1824   : > { %v3163_v38 = vsel %vm1722_vm3, %v4619_v37, 0.0 }
0x1825   : > { %3164 = vadd.xlane.f32.xlu0 %v3163_v38 }
0x1827   : > { %v4621_v39 = vpop.eup %4620 }
0x1828   : > { %v3166_v41 = vsel %vm1722_vm3, %v4621_v39, 0.0 }
0x1829   : > { %3167 = vadd.xlane.f32.xlu1 %v3166_v41 }
0x1884   : > { %v3276_v48 = vpop.xlane.xlu0 %3275 }
0x1885   : > { %v3280_v52 = vsub.f32 %v3272_v44, %v3276_v48 }
0x1887   : > { %v3282_v56 = vmul.f32 1.442695, %v3280_v52 }
0x1888   : > { %v3279_v60 = vpop.xlane.xlu1 %3278 }
0x1889   : > { %4622 = vpow2.f32 %v3282_v56  ;;  %v3281_v49 = vsub.f32 %v3273_v40, %v3279_v60 }
0x188b   : > { %v3284_v50 = vmul.f32 1.442695, %v3281_v49 }
0x188d   : > { %4624 = vpow2.f32 %v3284_v50 }
0x1896   : > { %v4623_v14 = vpop.eup %4622 }
0x1897   : > { %v3286_v51 = vsel %vm1722_vm3, %v4623_v14, 0.0 }
0x1898   : > { %3287 = vadd.xlane.f32.xlu0 %v3286_v51 }
0x189a   : > { %v4625_v53 = vpop.eup %4624 }
0x189b   : > { %v3289_v54 = vsel %vm1722_vm3, %v4625_v53, 0.0 }
0x189c   : > { %3290 = vadd.xlane.f32.xlu1 %v3289_v54 }
0x18ae   : > { %v3165_v62 = vpop.xlane.xlu0 %3164  ;;  %3298 = vrot.lane.b32.xlu0 %v6005_v7, %s6231_s7  ;;  %s3935_s7 = sshll.u32 %s5451_s0, 8 }
0x18af   : > { %4626 = vrcp.f32 %v3165_v62  ;;  %s6076_s5 = scalar_lea.hbm %s5428_s29, %s3935_s7 }
0x18b2   : > { %v3168_v57 = vpop.xlane.xlu1 %3167 }
0x18b3   : > { %4628 = vrcp.f32 %v3168_v57 }
0x18bc   : > { %v4627_v58 = vpop.eup %4626 }
0x18bd   : > { %v3171_v42 = vmul.f32 %v4627_v58, %v4619_v37 }
0x18c0   : > { %v4629_v63 = vpop.eup %4628 }
0x18c1   : > { %v3172_v1 = vmul.f32 %v4629_v63, %v4621_v39 }
0x18c3   : > { %v3173_v6 = vpack.c.bf16 %v3172_v1, %v3171_v42 }
0x18c5   : > { %4222 = vmatmul.mubr.msk.bf16.vlgmr.msra.gmra.mxu0 %vm1722_vm3, %v3173_v6 }
0x18c6   : > { %4233 = vmatprep.mubr.msk.bf16.mxu0 %vm5234_vm0, %v5233_v0 }
0x1921   : > { %v3288_v43 = vpop.xlane.xlu0 %3287 }
0x1922   : > { %4630 = vrcp.f32 %v3288_v43 }
0x1925   : > { %v3291_v2 = vpop.xlane.xlu1 %3290  ;;  %v3299_v3 = vpop.permute.xlu0 %3298 }
0x1926   : > { %4632 = vrcp.f32 %v3291_v2  ;;  %4232 = vmatpush3.bf16.msra.mxu0 %v3299_v3 }
0x1927   : > { %4249 = vmatprep.subr.bf16.mxu0 %v5233_v0 }
0x192f   : > { %v4631_v4 = vpop.eup %4630 }
0x1930   : > { %v3294_v7 = vmul.f32 %v4631_v4, %v4623_v14 }
0x1933   : > { %v4633_v25 = vpop.eup %4632 }
0x1934   : > { %v3295_v8 = vmul.f32 %v4633_v25, %v4625_v53 }
0x1936   : > { %v3296_v9 = vpack.c.bf16 %v3295_v8, %v3294_v7 }
0x1938   : > { %4234 = vmatmul.mubr.msk.bf16.vlgmr.msra.gmra.mxu0 %vm1722_vm3, %v3296_v9 }
0x1939   : > { %4250 = vmatpush3.bf16.msra.mxu0 %v5917_v16  ;;  %4253 = vmatprep.mubr.msk.bf16.mxu0 %vm5234_vm0, %v5233_v0 }
0x193a   : > { %4251 = vmatprep.subr.bf16.mxu0 %v5233_v0 }
0x193d   : > { %4252 = vmatpush3.bf16.msra.mxu0 %v5921_v17 }
0x193e   : > { %4257 = vmatprep.subr.bf16.mxu0 %v5233_v0 }
0x1985   : > { %v3212_v61 = vpop.f32.mrf.mxu0 }
0x1987   : > { %v4223_v20 = vpop.f32.mrf.mxu0 }
0x1989   : > { %v3215_v11 = vpop.f32.mrf.mxu0 }
0x198b   : > { %v4224_v12 = vpop.f32.mrf.mxu0 }
0x19f8   : > { %v3338_v33 = vpop.f32.mrf.mxu0 }
0x19fa   : > { %v4235_v13 = vpop.f32.mrf.mxu0 }
0x19fc   : > { %v3341_v15 = vpop.f32.mrf.mxu0 }
0x19fd   : > { %v4529_v30 = vpack.i.bf16 %v3341_v15, %v3338_v33 }
0x19fe   : > { %v4236_v18 = vpop.f32.mrf.mxu0 }
0x19ff   : > { %4530 = vrot.lane.b32.xlu1 %v4529_v30, %s6234_s28  ;;  %s1310_s28 = scalar_lea.vmem [#allocation29], %s3842_s4  ;;  %s5237_s4 = smov [#allocation29]  }
0x1a00   : > { %s3542_s2 = sshll.u32 %s1310_s28, 4  ;;  %s5084_s8 = sshll.u32 %s5237_s4, 4  ;;  %s6078_s2 = int_to_ptr.vmem [resolvable:$true] %s3542_s2  ;;  %s5085_s8 = int_to_ptr.vmem [resolvable:$false] %s5084_s8 }
0x1a01   : > { %s5080_s0 = scalar_lea.vmem %s6078_s2, 256  ;;  %s5086_s7 = scalar_lea.vmem %s5085_s8, 512 }
0x1a02   : > { %p5081_p12 = scmp.ne.s32.totalorder %s6078_s2, %s5080_s0  ;;  %p5087_p6 = scmp.lt.s32.totalorder %s6078_s2, %s5085_s8 }
0x1a03   : > { %p5088_p10 = scmp.lt.s32.totalorder %s5086_s7, %s5080_s0 }
0x1a04   : > { %p5082_p4 = pnand %p5081_p12, %p6239_p9 }
0x1a05   : > { %p5089_p7 = por %p5088_p10, %p5087_p6 }
0x1a06   : > { %p5083_p5 = pneg %p5082_p4 }
0x1a08   : > { %p5090_p8 = pnand %p5089_p7, %p5083_p5 }
0x1a71   : > { %v4531_v16 = vpop.permute.xlu1 %4530 }
0x1a72   : > { %v4533_v34 = vunpack.i.h.bf16 %v4531_v16  ;;  %v4532_v44 = vunpack.i.l.bf16 %v4531_v16 }
0x1a74   : > { %v3354_v19 = vsel %vm1444_vm2, %v3215_v11, %v4533_v34  ;;  %v3353_v17 = vsel %vm1444_vm2, %v3212_v61, %v4532_v44 }
0x1a75   : > { %v3355_v36 = vpack.c.bf16 %v3354_v19, %v3353_v17 }
0x1a77   : > { %4246 = vmatmul.mubr.msk.bf16.vlgmr.msra.gmra.mxu1 %vm1359_vm1, %v3355_v36 }
0x1b37   : > { %v3393_v21 = vpop.f32.mrf.mxu1 }
0x1b38   : > { %v3394_v40 = vadd.f32 %v5898_v55, %v3393_v21 }
0x1b39   : > { %v4247_v22 = vpop.f32.mrf.mxu1 }
0x1b3a   : > { %v3400_v23 = vadd.f32 %v3394_v40, %v5964_v5 }
0x1b3b   : > { %v3396_v24 = vpop.f32.mrf.mxu1 }
0x1b3c   : > { %v3397_v26 = vadd.f32 %v5898_v55, %v3396_v24  ;;  %v3402_v27 = vsel %vm1444_vm2, %v3400_v23, 0.0 }
0x1b3d   : > { %3403 = vadd.xlane.f32.xlu1 %v3402_v27  ;;  %v4248_v29 = vpop.f32.mrf.mxu1 }
0x1b3e   : > { %v3401_v31 = vadd.f32 %v3397_v26, %v5970_v10 }
0x1b40   : > { %v3405_v32 = vsel %vm1444_vm2, %v3401_v31, 0.0 }
0x1b41   : > { %3406 = vadd.xlane.f32.xlu0 %v3405_v32 }
0x1bc6   : > { %v3404_v37 = vpop.xlane.xlu1 %3403 }
0x1bc7   : > { %v3408_v38 = vmul.f32 0.03125, %v3404_v37 }
0x1bc9   : > { %v3410_v39 = vsub.f32 %v3400_v23, %v3408_v38 }
0x1bca   : > { %v3407_v41 = vpop.xlane.xlu0 %3406 }
0x1bcb   : > { %v3409_v48 = vmul.f32 0.03125, %v3407_v41  ;;  %v3412_v52 = vmul.f32 %v3410_v39, %v3410_v39 }
0x1bcd   : > { %v3411_v56 = vsub.f32 %v3401_v31, %v3409_v48  ;;  %v3414_v5 = vsel %vm1444_vm2, %v3412_v52, 0.0 }
0x1bce   : > { %3415 = vadd.xlane.f32.xlu0 %v3414_v5 }
0x1bcf   : > { %v3413_v55 = vmul.f32 %v3411_v56, %v3411_v56 }
0x1bd1   : > { %v3417_v60 = vsel %vm1444_vm2, %v3413_v55, 0.0 }
0x1bd2   : > { %3418 = vadd.xlane.f32.xlu1 %v3417_v60 }
0x1c57   : > { %v3416_v49 = vpop.xlane.xlu0 %3415 }
0x1c58   : > { %v3420_v50 = vmul.f32 0.03125, %v3416_v49 }
0x1c5a   : > { %v3422_v10 = vadd.f32 1e-05, %v3420_v50 }
0x1c5b   : > { %v3419_v14 = vpop.xlane.xlu1 %3418 }
0x1c5c   : > { %4634 = vrsqrt.f32 %v3422_v10  ;;  %v3421_v51 = vmul.f32 0.03125, %v3419_v14 }
0x1c5e   : > { %v3423_v53 = vadd.f32 1e-05, %v3421_v51 }
0x1c60   : > { %4636 = vrsqrt.f32 %v3423_v53 }
0x1c69   : > { %v4635_v54 = vpop.eup %4634 }
0x1c6a   : > { %v3426_v62 = vmul.f32 %v4635_v54, %v3410_v39 }
0x1c6c   : > { %v3428_v63 = vmul.f32 %v5927_v28, %v3426_v62 }
0x1c6d   : > { %v4637_v57 = vpop.eup %4636 }
0x1c6e   : > { %v3427_v58 = vmul.f32 %v4637_v57, %v3411_v56  ;;  %v3430_v1 = vadd.f32 %v5931_v35, %v3428_v63 }
0x1c70   : > { %v3429_v42 = vmul.f32 %v5927_v28, %v3427_v58 }
0x1c72   : > { %v3431_v6 = vadd.f32 %v5931_v35, %v3429_v42 }
0x1c74   : > { %v3432_v43 = vpack.c.bf16 %v3431_v6, %v3430_v1 }
0x1c76   : > { %4254 = vmatmul.mubr.msk.bf16.vlgmr.msra.gmra.mxu0 %vm1444_vm2, %v3432_v43 }
0x1c77   : > { %4258 = vmatpush3.bf16.msra.mxu0 %v5939_v45  ;;  %4261 = vmatprep.mubr.msk.bf16.mxu0 %vm5234_vm0, %v5233_v0 }
0x1c78   : > { %4259 = vmatprep.subr.bf16.mxu0 %v5233_v0 }
0x1c7b   : > { %4260 = vmatpush3.bf16.msra.mxu0 %v5943_v46 }
0x1d36   : > { %v3470_v2 = vpop.f32.mrf.mxu0 }
0x1d37   : > { %v3471_v3 = vadd.f32 %v5948_v47, %v3470_v2 }
0x1d38   : > { %v4255_v28 = vpop.f32.mrf.mxu0 }
0x1d39   : > { %v3477_v7 = vmax.f32 %v3471_v3, 0.0 }
0x1d3a   : > { %v3473_v4 = vpop.f32.mrf.mxu0 }
0x1d3b   : > { %v3474_v35 = vadd.f32 %v5948_v47, %v3473_v4 }
0x1d3c   : > { %v4256_v25 = vpop.f32.mrf.mxu0 }
0x1d3d   : > { %v3478_v8 = vmax.f32 %v3474_v35, 0.0 }
0x1d3f   : > { %v3479_v45 = vpack.c.bf16 %v3478_v8, %v3477_v7 }
0x1d41   : > { %4262 = vmatmul.mubr.msk.bf16.vlgmr.msra.gmra.mxu0 %vm1444_vm2, %v3479_v45 }
0x1e01   : > { %v3517_v0 = vpop.f32.mrf.mxu0 }
0x1e02   : > { %v3518_v46 = vadd.f32 %v5960_v59, %v3517_v0 }
0x1e03   : > { %v4263_v9 = vpop.f32.mrf.mxu0 }
0x1e04   : > { %v3524_v61 = vadd.f32 %v3518_v46, %v3400_v23 }
0x1e05   : > { %v3520_v20 = vpop.f32.mrf.mxu0 }
0x1e06   : > { %3526 = vst.msk [vmem:[%s1310_s28] sm:$0xff] %vm1444_vm2, %v3524_v61  ;;  %v3521_v47 = vadd.f32 %v5960_v59, %v3520_v20 }
0x1e07   : > { %v4264_v11 = vpop.f32.mrf.mxu0 }
0x1e08   : > { %v3525_v12 = vadd.f32 %v3521_v47, %v3401_v31 }
0x1e0a   : > { %3527 = vst.msk [vmem:[%s1310_s28 + $0x8] sm:$0xff] %vm1444_vm2, %v3525_v12 }
0x1e0b   : > { %5093 = shalt.err (!%p5090_p8)
}
0x1e0c   : > { %s5094_s3 = scalar_lea.hbm %s6076_s5, 256  ;;  %s5098_s28 = scalar_lea.hbm %s5428_s29, 512 }
0x1e0d   : > { %p5095_p11 = scmp.ne.s32.totalorder %s6076_s5, %s5094_s3  ;;  %p5099_p1 = scmp.lt.s32.totalorder %s6076_s5, %s5428_s29 }
0x1e0e   : > { %p5100_p2 = scmp.lt.s32.totalorder %s5098_s28, %s5094_s3 }
0x1e0f   : > { %p5096_p0 = pnand %p5095_p11, %p6239_p9 }
0x1e10   : > { %p5101_p3 = por %p5100_p2, %p5099_p1 }
0x1e11   : > { %p5097_p13 = pneg %p5096_p0 }
0x1e13   : > { %p5102_p12 = pnand %p5101_p3, %p5097_p13 }
0x1e15   : > { %5105 = shalt.err (!%p5102_p12)
}
0x1e16   : > { %s5238_s8 = smov 128   ;;  %s5239_s0 = smov 8  }
0x1e17   : > { %4333 = dma.vmem_to_hbm [thread:$0]  (%p6239_p9), %s6078_s2, 256, %s6076_s5, %s6081_s6, %s5238_s8, %s5238_s8, %s5239_s0  }
0x1e18 PF: > { %s6240_s4 = sld [smem:[#allocation67_spill]] }
0x1e19   : > { %s6241_s7 = sld [smem:[#allocation65_spill]] }
0x1e1a   : > { %s6242_s9 = sld [smem:[#allocation70_spill]] }
0x1e1e   : > { %p4425_p4 = scmp.ge.s32.totalorder %s6240_s4, 2 }
0x1e1f   : > { %s3557_s10 = sand.u32 1, %s6241_s7  }
0x1e20   : > { %p6243_p5 = scmp.ne.s32.totalorder %s6242_s9, 0  ;;  %s3558_s3 = scalar_lea.sflag [#allocation4], %s3557_s10 }
0x1e22   : > { %p4388_p6 = pnand %p4425_p4, %p6243_p5 }
0x1e24   : > { %p4389_p10 = pneg %p4388_p6 }
0x1e26   : > { %5159 = dma.done.wait (%p4389_p10), %s3558_s3, 256  }
0x1e27   : > { %5161 = vsyncadd (%p4389_p10), %s3558_s3, 4294967040  ;;  %s6244_s7 = sld [smem:[#allocation68_spill]]  ;;  %s6247_s28 = smov %s5168_s1 }
0x1e28   : > { %s6245_s11 = sld [smem:[#allocation66_spill]] }
0x1e29   : > { %s6246_s2 = sld [smem:[#allocation69_spill]] }
0x1e2d   : > { %p92_p7 = scmp.ge.s32.totalorder %s6244_s7, 4  }
0x1e2e   : > { %s6248_s1 = smov %s6245_s11 }
0x1e2f   : > { %6249 = sst [smem:[#allocation65_spill]] %s6246_s2  ;;  %94 = sbr.rel (!%p92_p7) target bundleno = 77 (0x4d), region = 304 }
0x1e34   :  { %3563 = vsyncpa [#allocation3], 1 }
0x1e35   :  { %3565 = vsyncpa [#allocation3 + $0x1], 1 }
0x1e36   :  { %3566 = vsyncpa [#allocation6], 1 }
0x1e37   :  { %3567 = vsyncpa [#allocation9], 1 }
0x1e38   :  { %3568 = vsyncpa [#allocation12], 1 }
0x1e39   :  { %3569 = vsyncpa [#allocation15], 1 }
0x1e3a   :  { %3570 = vsyncpa [#allocation18], 1 }
0x1e3b   :  { %3571 = vsyncpa [#allocation21], 1 }
0x1e3c   :  { %3572 = vsyncpa [#allocation24], 1 }
0x1e3d   :  { %3573 = vsyncpa [#allocation27], 1 }
0x1e3e   :  { %3574 = vsyncpa [#allocation4], 1 }
0x1e3f   :  { %3576 = vsyncpa [#allocation4 + $0x1], 1 }

</bundles_post_ra>
